<compile_context>
chip_gen: v7x
topology: tpu7x:2x2x1
jax: 0.10.0
libtpu: 0.0.40
codegen_flags: <defaults>
</compile_context>

<pallas_src>
import functools

import jax
import jax.numpy as jnp
from jax.experimental import pallas as pl
from jax.experimental.pallas import tpu as pltpu


def _gemm_bias_act_kernel(w_ref, a_ref, b_ref, o_ref, *, apply_relu):
    """One output tile of O^T = W @ patches^T with fused bias (+ ReLU).

    w_ref: (Cout, K), a_ref: (K, TM), b_ref: (Cout, 1), o_ref: (Cout, TM).
    M (= B*Ho*Wo) sits on the lane axis -> lane-dense loads/stores.
    """
    acc = jnp.dot(w_ref[...], a_ref[...], preferred_element_type=jnp.float32)
    acc = acc + b_ref[...]                 # (Cout, 1) broadcasts over lanes
    if apply_relu:
        acc = jnp.maximum(acc, 0.0)
    o_ref[...] = acc.astype(o_ref.dtype)


def _im2col_t(act_cf, k, stride):
    """Channel-first activations (C, B, H, W) -> patches^T (C*k*k, B*Ho*Wo).

    Row ordering is (ci, i, j), matching PyTorch's weight.reshape(Cout, -1).
    `k` / `stride` are Python ints, so every slice below is static.
    """
    C, B, H, W = act_cf.shape
    Ho = (H - k) // stride + 1
    Wo = (W - k) // stride + 1
    taps = []
    for i in range(k):
        for j in range(k):
            taps.append(
                act_cf[:, :,
                       i:i + stride * (Ho - 1) + 1:stride,
                       j:j + stride * (Wo - 1) + 1:stride])    # (C, B, Ho, Wo)
    col = jnp.stack(taps, axis=1)                               # (C, k*k, B, Ho, Wo)
    return col.reshape(C * k * k, B * Ho * Wo), Ho, Wo


def conv2d_cf_pallas(act_cf, w_mat, b_col, k, stride, apply_relu):
    """Valid Conv2d + bias (+ ReLU); channel-first in / channel-first out."""
    Cout, K = w_mat.shape
    _, B, _, _ = act_cf.shape

    patches_t, Ho, Wo = _im2col_t(act_cf, k, stride)
    M = patches_t.shape[1]

    # Lane-dense padding of M. Split large-M layers into 2 parallel grid steps
    # so both TensorCores of a v7x chip get work; small layers run in 1 step.
    grid_m = 2 if M >= 1024 else 1
    mult = 128 * grid_m
    Mp = ((M + mult - 1) // mult) * mult
    tm = Mp // grid_m
    if Mp != M:
        patches_t = jnp.pad(patches_t, ((0, 0), (0, Mp - M)))

    out_t = pl.pallas_call(
        functools.partial(_gemm_bias_act_kernel, apply_relu=apply_relu),
        out_shape=jax.ShapeDtypeStruct((Cout, Mp), jnp.float32),
        grid=(grid_m,),
        in_specs=[
            pl.BlockSpec((Cout, K), lambda i: (0, 0)),   # weights (resident)
            pl.BlockSpec((K, tm), lambda i: (0, i)),     # patches^T tile
            pl.BlockSpec((Cout, 1), lambda i: (0, 0)),   # bias (resident)
        ],
        out_specs=pl.BlockSpec((Cout, tm), lambda i: (0, i)),
        compiler_params=pltpu.CompilerParams(
            dimension_semantics=("parallel",),
            vmem_limit_bytes=32 * 1024 * 1024),
    )(w_mat, patches_t, b_col)

    # (Cout, Mp) -> (Cout, B, Ho, Wo): already the channel-first layout the
    # next layer consumes; padded garbage columns are sliced off here.
    return out_t[:, :M].reshape(Cout, B, Ho, Wo)


# (Cin, Cout, kernel, stride, relu) for the nn.Sequential in CNN.__init__
def _layer_specs(n_channels):
    return [
        (n_channels, 4, 3, 1, True),
        (4, 8, 3, 2, True),
        (8, 16, 3, 2, True),
        (16, 32, 3, 2, True),
        (32, 64, 3, 1, True),
        (64, 128, 3, 1, False),   # final conv has no ReLU
    ]


def init_cnn_params(key, n_channels):
    """PyTorch-default-style init, pre-packed as (Cout, K) / (Cout, 1)."""
    params = []
    for (cin, cout, k, stride, relu) in _layer_specs(n_channels):
        key, wk, bk = jax.random.split(key, 3)
        fan_in = cin * k * k
        bound = 1.0 / (fan_in ** 0.5)
        w = jax.random.uniform(wk, (cout, cin, k, k), jnp.float32, -bound, bound)
        b = jax.random.uniform(bk, (cout,), jnp.float32, -bound, bound)
        params.append((w.reshape(cout, cin * k * k), b.reshape(cout, 1)))
    return params


@jax.jit
def cnn_forward(x, params):
    n_channels = x.shape[1]
    act = jnp.transpose(x, (1, 0, 2, 3))          # NCHW -> (C, B, H, W), once
    for (w_mat, b_col), (_, _, k, stride, relu) in zip(
            params, _layer_specs(n_channels)):
        act = conv2d_cf_pallas(act, w_mat, b_col, k, stride, relu)
    return jnp.transpose(act, (1, 0, 2, 3))       # back to NCHW, once


def _reference_forward(x, params, n_channels):
    """Pure-JAX reference (lax.conv) for a correctness check."""
    out = x
    for (w_mat, b_col), (cin, cout, k, stride, relu) in zip(
            params, _layer_specs(n_channels)):
        w = w_mat.reshape(cout, cin, k, k)
        out = jax.lax.conv_general_dilated(
            out, w, window_strides=(stride, stride), padding="VALID",
            dimension_numbers=("NCHW", "OIHW", "NCHW"),
            precision=jax.lax.Precision.HIGHEST)
        out = out + b_col.reshape(1, cout, 1, 1)
        if relu:
            out = jnp.maximum(out, 0.0)
    return out


if __name__ == "__main__":
    key = jax.random.PRNGKey(0)
    key_p, key_x = jax.random.split(key)

    n_channels = 3
    # spatial 64 is the smallest "round" size surviving 6 valid convs (3 strided)
    x = jax.random.normal(key_x, (2, n_channels, 64, 64), dtype=jnp.float32)

    params = init_cnn_params(key_p, n_channels)
    out = jax.block_until_ready(cnn_forward(x, params))
    assert out.shape == (2, 128, 2, 2), out.shape

    ref = jax.block_until_ready(_reference_forward(x, params, n_channels))
    max_err = float(jnp.max(jnp.abs(out - ref)))
    assert jnp.allclose(out, ref, rtol=2e-2, atol=2e-2), max_err

    print("KERNEL_OK")
</pallas_src>

<mosaic_0001>
module attributes {stable_mosaic.version = 11 : i64} {
  func.func @_gemm_bias_act_kernel(%arg0: i32, %arg1: memref<4x27xf32, #tpu.memory_space<vmem>>, %arg2: memref<27x3968xf32, #tpu.memory_space<vmem>>, %arg3: memref<4x1xf32, #tpu.memory_space<vmem>>, %arg4: memref<4x3968xf32, #tpu.memory_space<vmem>>) attributes {dimension_semantics = [#tpu.dimension_semantics<parallel>], iteration_bounds = array<i64: 2>, scalar_prefetch = 0 : i64, scratch_operands = 0 : i64, tpu.core_type = #tpu.core_type<tc>, window_params = [{pipeline_mode = #tpu.pipeline_mode<synchronous>, transform_indices = @transform_0, window_bounds = array<i64: 4, 27>}, {transform_indices = @transform_1, window_bounds = array<i64: 27, 3968>}, {pipeline_mode = #tpu.pipeline_mode<synchronous>, transform_indices = @transform_2, window_bounds = array<i64: 4, 1>}, {transform_indices = @transform_3, window_bounds = array<i64: 4, 3968>}]} {
    %c0 = arith.constant 0 : index
    %c0_0 = arith.constant 0 : index
    %0 = vector.load %arg1[%c0, %c0_0] : memref<4x27xf32, #tpu.memory_space<vmem>>, vector<4x27xf32>
    %c0_1 = arith.constant 0 : index
    %c0_2 = arith.constant 0 : index
    %1 = vector.load %arg2[%c0_1, %c0_2] : memref<27x3968xf32, #tpu.memory_space<vmem>>, vector<27x3968xf32>
    %cst = arith.constant dense<0.000000e+00> : vector<4x3968xf32>
    %2 = tpu.matmul %0, %1, %cst {dimension_numbers = #tpu.dot_dimension_numbers<[1], [0], [0], [1], [0, 0, 1, 1], [], []>} : vector<4x27xf32>, vector<27x3968xf32>, vector<4x3968xf32> -> vector<4x3968xf32>
    %c0_3 = arith.constant 0 : index
    %c0_4 = arith.constant 0 : index
    %3 = vector.load %arg3[%c0_3, %c0_4] : memref<4x1xf32, #tpu.memory_space<vmem>>, vector<4x1xf32>
    %4 = vector.broadcast %3 : vector<4x1xf32> to vector<4x3968xf32>
    %5 = arith.addf %2, %4 : vector<4x3968xf32>
    %cst_5 = arith.constant 0.000000e+00 : f32
    %6 = vector.broadcast %cst_5 : f32 to vector<4x3968xf32>
    %7 = arith.maximumf %5, %6 : vector<4x3968xf32>
    %c0_6 = arith.constant 0 : index
    %c0_7 = arith.constant 0 : index
    %8 = vector.load %arg4[%c0_6, %c0_7] : memref<4x3968xf32, #tpu.memory_space<vmem>>, vector<4x3968xf32>
    tpu.vector_store %arg4[%c0_6, %c0_7], %7 {strides = array<i32>} : memref<4x3968xf32, #tpu.memory_space<vmem>>, vector<4x3968xf32>,
    return
  }
  func.func @transform_0(%arg0: i32) -> (i32, i32) {
    %c0_i32 = arith.constant 0 : i32
    %c0_i32_0 = arith.constant 0 : i32
    %c0_i32_1 = arith.constant 0 : i32
    return %c0_i32, %c0_i32_0 : i32, i32
  }
  func.func @transform_1(%arg0: i32) -> (i32, i32) {
    %c0_i32 = arith.constant 0 : i32
    %c0_i32_0 = arith.constant 0 : i32
    return %c0_i32, %arg0 : i32, i32
  }
  func.func @transform_2(%arg0: i32) -> (i32, i32) {
    %c0_i32 = arith.constant 0 : i32
    %c0_i32_0 = arith.constant 0 : i32
    %c0_i32_1 = arith.constant 0 : i32
    return %c0_i32, %c0_i32_0 : i32, i32
  }
  func.func @transform_3(%arg0: i32) -> (i32, i32) {
    %c0_i32 = arith.constant 0 : i32
    %c0_i32_0 = arith.constant 0 : i32
    return %c0_i32, %arg0 : i32, i32
  }
}

module attributes {stable_mosaic.version = 11 : i64} {
  func.func @_gemm_bias_act_kernel(%arg0: i32, %arg1: memref<8x36xf32, #tpu.memory_space<vmem>>, %arg2: memref<36x1024xf32, #tpu.memory_space<vmem>>, %arg3: memref<8x1xf32, #tpu.memory_space<vmem>>, %arg4: memref<8x1024xf32, #tpu.memory_space<vmem>>) attributes {dimension_semantics = [#tpu.dimension_semantics<parallel>], iteration_bounds = array<i64: 2>, scalar_prefetch = 0 : i64, scratch_operands = 0 : i64, tpu.core_type = #tpu.core_type<tc>, window_params = [{pipeline_mode = #tpu.pipeline_mode<synchronous>, transform_indices = @transform_0, window_bounds = array<i64: 8, 36>}, {transform_indices = @transform_1, window_bounds = array<i64: 36, 1024>}, {pipeline_mode = #tpu.pipeline_mode<synchronous>, transform_indices = @transform_2, window_bounds = array<i64: 8, 1>}, {transform_indices = @transform_3, window_bounds = array<i64: 8, 1024>}]} {
    %c0 = arith.constant 0 : index
    %c0_0 = arith.constant 0 : index
    %0 = vector.load %arg1[%c0, %c0_0] : memref<8x36xf32, #tpu.memory_space<vmem>>, vector<8x36xf32>
    %c0_1 = arith.constant 0 : index
    %c0_2 = arith.constant 0 : index
    %1 = vector.load %arg2[%c0_1, %c0_2] : memref<36x1024xf32, #tpu.memory_space<vmem>>, vector<36x1024xf32>
    %cst = arith.constant dense<0.000000e+00> : vector<8x1024xf32>
    %2 = tpu.matmul %0, %1, %cst {dimension_numbers = #tpu.dot_dimension_numbers<[1], [0], [0], [1], [0, 0, 1, 1], [], []>} : vector<8x36xf32>, vector<36x1024xf32>, vector<8x1024xf32> -> vector<8x1024xf32>
    %c0_3 = arith.constant 0 : index
    %c0_4 = arith.constant 0 : index
    %3 = vector.load %arg3[%c0_3, %c0_4] : memref<8x1xf32, #tpu.memory_space<vmem>>, vector<8x1xf32>
    %4 = vector.broadcast %3 : vector<8x1xf32> to vector<8x1024xf32>
    %5 = arith.addf %2, %4 : vector<8x1024xf32>
    %cst_5 = arith.constant 0.000000e+00 : f32
    %6 = vector.broadcast %cst_5 : f32 to vector<8x1024xf32>
    %7 = arith.maximumf %5, %6 : vector<8x1024xf32>
    %c0_6 = arith.constant 0 : index
    %c0_7 = arith.constant 0 : index
    %8 = vector.load %arg4[%c0_6, %c0_7] : memref<8x1024xf32, #tpu.memory_space<vmem>>, vector<8x1024xf32>
    tpu.vector_store %arg4[%c0_6, %c0_7], %7 {strides = array<i32>} : memref<8x1024xf32, #tpu.memory_space<vmem>>, vector<8x1024xf32>,
    return
  }
  func.func @transform_0(%arg0: i32) -> (i32, i32) {
    %c0_i32 = arith.constant 0 : i32
    %c0_i32_0 = arith.constant 0 : i32
    %c0_i32_1 = arith.constant 0 : i32
    return %c0_i32, %c0_i32_0 : i32, i32
  }
  func.func @transform_1(%arg0: i32) -> (i32, i32) {
    %c0_i32 = arith.constant 0 : i32
    %c0_i32_0 = arith.constant 0 : i32
    return %c0_i32, %arg0 : i32, i32
  }
  func.func @transform_2(%arg0: i32) -> (i32, i32) {
    %c0_i32 = arith.constant 0 : i32
    %c0_i32_0 = arith.constant 0 : i32
    %c0_i32_1 = arith.constant 0 : i32
    return %c0_i32, %c0_i32_0 : i32, i32
  }
  func.func @transform_3(%arg0: i32) -> (i32, i32) {
    %c0_i32 = arith.constant 0 : i32
    %c0_i32_0 = arith.constant 0 : i32
    return %c0_i32, %arg0 : i32, i32
  }
}

module attributes {stable_mosaic.version = 11 : i64} {
  func.func @_gemm_bias_act_kernel(%arg0: i32, %arg1: memref<16x72xf32, #tpu.memory_space<vmem>>, %arg2: memref<72x512xf32, #tpu.memory_space<vmem>>, %arg3: memref<16x1xf32, #tpu.memory_space<vmem>>, %arg4: memref<16x512xf32, #tpu.memory_space<vmem>>) attributes {dimension_semantics = [#tpu.dimension_semantics<parallel>], iteration_bounds = array<i64: 1>, scalar_prefetch = 0 : i64, scratch_operands = 0 : i64, tpu.core_type = #tpu.core_type<tc>, window_params = [{pipeline_mode = #tpu.pipeline_mode<synchronous>, transform_indices = @transform_0, window_bounds = array<i64: 16, 72>}, {transform_indices = @transform_1, window_bounds = array<i64: 72, 512>}, {pipeline_mode = #tpu.pipeline_mode<synchronous>, transform_indices = @transform_2, window_bounds = array<i64: 16, 1>}, {transform_indices = @transform_3, window_bounds = array<i64: 16, 512>}]} {
    %c0 = arith.constant 0 : index
    %c0_0 = arith.constant 0 : index
    %0 = vector.load %arg1[%c0, %c0_0] : memref<16x72xf32, #tpu.memory_space<vmem>>, vector<16x72xf32>
    %c0_1 = arith.constant 0 : index
    %c0_2 = arith.constant 0 : index
    %1 = vector.load %arg2[%c0_1, %c0_2] : memref<72x512xf32, #tpu.memory_space<vmem>>, vector<72x512xf32>
    %cst = arith.constant dense<0.000000e+00> : vector<16x512xf32>
    %2 = tpu.matmul %0, %1, %cst {dimension_numbers = #tpu.dot_dimension_numbers<[1], [0], [0], [1], [0, 0, 1, 1], [], []>} : vector<16x72xf32>, vector<72x512xf32>, vector<16x512xf32> -> vector<16x512xf32>
    %c0_3 = arith.constant 0 : index
    %c0_4 = arith.constant 0 : index
    %3 = vector.load %arg3[%c0_3, %c0_4] : memref<16x1xf32, #tpu.memory_space<vmem>>, vector<16x1xf32>
    %4 = vector.broadcast %3 : vector<16x1xf32> to vector<16x512xf32>
    %5 = arith.addf %2, %4 : vector<16x512xf32>
    %cst_5 = arith.constant 0.000000e+00 : f32
    %6 = vector.broadcast %cst_5 : f32 to vector<16x512xf32>
    %7 = arith.maximumf %5, %6 : vector<16x512xf32>
    %c0_6 = arith.constant 0 : index
    %c0_7 = arith.constant 0 : index
    %8 = vector.load %arg4[%c0_6, %c0_7] : memref<16x512xf32, #tpu.memory_space<vmem>>, vector<16x512xf32>
    tpu.vector_store %arg4[%c0_6, %c0_7], %7 {strides = array<i32>} : memref<16x512xf32, #tpu.memory_space<vmem>>, vector<16x512xf32>,
    return
  }
  func.func @transform_0(%arg0: i32) -> (i32, i32) {
    %c0_i32 = arith.constant 0 : i32
    %c0_i32_0 = arith.constant 0 : i32
    %c0_i32_1 = arith.constant 0 : i32
    return %c0_i32, %c0_i32_0 : i32, i32
  }
  func.func @transform_1(%arg0: i32) -> (i32, i32) {
    %c0_i32 = arith.constant 0 : i32
    %c0_i32_0 = arith.constant 0 : i32
    return %c0_i32, %arg0 : i32, i32
  }
  func.func @transform_2(%arg0: i32) -> (i32, i32) {
    %c0_i32 = arith.constant 0 : i32
    %c0_i32_0 = arith.constant 0 : i32
    %c0_i32_1 = arith.constant 0 : i32
    return %c0_i32, %c0_i32_0 : i32, i32
  }
  func.func @transform_3(%arg0: i32) -> (i32, i32) {
    %c0_i32 = arith.constant 0 : i32
    %c0_i32_0 = arith.constant 0 : i32
    return %c0_i32, %arg0 : i32, i32
  }
}

module attributes {stable_mosaic.version = 11 : i64} {
  func.func @_gemm_bias_act_kernel(%arg0: i32, %arg1: memref<32x144xf32, #tpu.memory_space<vmem>>, %arg2: memref<144x128xf32, #tpu.memory_space<vmem>>, %arg3: memref<32x1xf32, #tpu.memory_space<vmem>>, %arg4: memref<32x128xf32, #tpu.memory_space<vmem>>) attributes {dimension_semantics = [#tpu.dimension_semantics<parallel>], iteration_bounds = array<i64: 1>, scalar_prefetch = 0 : i64, scratch_operands = 0 : i64, tpu.core_type = #tpu.core_type<tc>, window_params = [{pipeline_mode = #tpu.pipeline_mode<synchronous>, transform_indices = @transform_0, window_bounds = array<i64: 32, 144>}, {transform_indices = @transform_1, window_bounds = array<i64: 144, 128>}, {pipeline_mode = #tpu.pipeline_mode<synchronous>, transform_indices = @transform_2, window_bounds = array<i64: 32, 1>}, {transform_indices = @transform_3, window_bounds = array<i64: 32, 128>}]} {
    %c0 = arith.constant 0 : index
    %c0_0 = arith.constant 0 : index
    %0 = vector.load %arg1[%c0, %c0_0] : memref<32x144xf32, #tpu.memory_space<vmem>>, vector<32x144xf32>
    %c0_1 = arith.constant 0 : index
    %c0_2 = arith.constant 0 : index
    %1 = vector.load %arg2[%c0_1, %c0_2] : memref<144x128xf32, #tpu.memory_space<vmem>>, vector<144x128xf32>
    %cst = arith.constant dense<0.000000e+00> : vector<32x128xf32>
    %2 = tpu.matmul %0, %1, %cst {dimension_numbers = #tpu.dot_dimension_numbers<[1], [0], [0], [1], [0, 0, 1, 1], [], []>} : vector<32x144xf32>, vector<144x128xf32>, vector<32x128xf32> -> vector<32x128xf32>
    %c0_3 = arith.constant 0 : index
    %c0_4 = arith.constant 0 : index
    %3 = vector.load %arg3[%c0_3, %c0_4] : memref<32x1xf32, #tpu.memory_space<vmem>>, vector<32x1xf32>
    %4 = vector.broadcast %3 : vector<32x1xf32> to vector<32x128xf32>
    %5 = arith.addf %2, %4 : vector<32x128xf32>
    %cst_5 = arith.constant 0.000000e+00 : f32
    %6 = vector.broadcast %cst_5 : f32 to vector<32x128xf32>
    %7 = arith.maximumf %5, %6 : vector<32x128xf32>
    %c0_6 = arith.constant 0 : index
    %c0_7 = arith.constant 0 : index
    %8 = vector.load %arg4[%c0_6, %c0_7] : memref<32x128xf32, #tpu.memory_space<vmem>>, vector<32x128xf32>
    tpu.vector_store %arg4[%c0_6, %c0_7], %7 {strides = array<i32>} : memref<32x128xf32, #tpu.memory_space<vmem>>, vector<32x128xf32>,
    return
  }
  func.func @transform_0(%arg0: i32) -> (i32, i32) {
    %c0_i32 = arith.constant 0 : i32
    %c0_i32_0 = arith.constant 0 : i32
    %c0_i32_1 = arith.constant 0 : i32
    return %c0_i32, %c0_i32_0 : i32, i32
  }
  func.func @transform_1(%arg0: i32) -> (i32, i32) {
    %c0_i32 = arith.constant 0 : i32
    %c0_i32_0 = arith.constant 0 : i32
    return %c0_i32, %arg0 : i32, i32
  }
  func.func @transform_2(%arg0: i32) -> (i32, i32) {
    %c0_i32 = arith.constant 0 : i32
    %c0_i32_0 = arith.constant 0 : i32
    %c0_i32_1 = arith.constant 0 : i32
    return %c0_i32, %c0_i32_0 : i32, i32
  }
  func.func @transform_3(%arg0: i32) -> (i32, i32) {
    %c0_i32 = arith.constant 0 : i32
    %c0_i32_0 = arith.constant 0 : i32
    return %c0_i32, %arg0 : i32, i32
  }
}

module attributes {stable_mosaic.version = 11 : i64} {
  func.func @_gemm_bias_act_kernel(%arg0: i32, %arg1: memref<64x288xf32, #tpu.memory_space<vmem>>, %arg2: memref<288x128xf32, #tpu.memory_space<vmem>>, %arg3: memref<64x1xf32, #tpu.memory_space<vmem>>, %arg4: memref<64x128xf32, #tpu.memory_space<vmem>>) attributes {dimension_semantics = [#tpu.dimension_semantics<parallel>], iteration_bounds = array<i64: 1>, scalar_prefetch = 0 : i64, scratch_operands = 0 : i64, tpu.core_type = #tpu.core_type<tc>, window_params = [{pipeline_mode = #tpu.pipeline_mode<synchronous>, transform_indices = @transform_0, window_bounds = array<i64: 64, 288>}, {transform_indices = @transform_1, window_bounds = array<i64: 288, 128>}, {pipeline_mode = #tpu.pipeline_mode<synchronous>, transform_indices = @transform_2, window_bounds = array<i64: 64, 1>}, {transform_indices = @transform_3, window_bounds = array<i64: 64, 128>}]} {
    %c0 = arith.constant 0 : index
    %c0_0 = arith.constant 0 : index
    %0 = vector.load %arg1[%c0, %c0_0] : memref<64x288xf32, #tpu.memory_space<vmem>>, vector<64x288xf32>
    %c0_1 = arith.constant 0 : index
    %c0_2 = arith.constant 0 : index
    %1 = vector.load %arg2[%c0_1, %c0_2] : memref<288x128xf32, #tpu.memory_space<vmem>>, vector<288x128xf32>
    %cst = arith.constant dense<0.000000e+00> : vector<64x128xf32>
    %2 = tpu.matmul %0, %1, %cst {dimension_numbers = #tpu.dot_dimension_numbers<[1], [0], [0], [1], [0, 0, 1, 1], [], []>} : vector<64x288xf32>, vector<288x128xf32>, vector<64x128xf32> -> vector<64x128xf32>
    %c0_3 = arith.constant 0 : index
    %c0_4 = arith.constant 0 : index
    %3 = vector.load %arg3[%c0_3, %c0_4] : memref<64x1xf32, #tpu.memory_space<vmem>>, vector<64x1xf32>
    %4 = vector.broadcast %3 : vector<64x1xf32> to vector<64x128xf32>
    %5 = arith.addf %2, %4 : vector<64x128xf32>
    %cst_5 = arith.constant 0.000000e+00 : f32
    %6 = vector.broadcast %cst_5 : f32 to vector<64x128xf32>
    %7 = arith.maximumf %5, %6 : vector<64x128xf32>
    %c0_6 = arith.constant 0 : index
    %c0_7 = arith.constant 0 : index
    %8 = vector.load %arg4[%c0_6, %c0_7] : memref<64x128xf32, #tpu.memory_space<vmem>>, vector<64x128xf32>
    tpu.vector_store %arg4[%c0_6, %c0_7], %7 {strides = array<i32>} : memref<64x128xf32, #tpu.memory_space<vmem>>, vector<64x128xf32>,
    return
  }
  func.func @transform_0(%arg0: i32) -> (i32, i32) {
    %c0_i32 = arith.constant 0 : i32
    %c0_i32_0 = arith.constant 0 : i32
    %c0_i32_1 = arith.constant 0 : i32
    return %c0_i32, %c0_i32_0 : i32, i32
  }
  func.func @transform_1(%arg0: i32) -> (i32, i32) {
    %c0_i32 = arith.constant 0 : i32
    %c0_i32_0 = arith.constant 0 : i32
    return %c0_i32, %arg0 : i32, i32
  }
  func.func @transform_2(%arg0: i32) -> (i32, i32) {
    %c0_i32 = arith.constant 0 : i32
    %c0_i32_0 = arith.constant 0 : i32
    %c0_i32_1 = arith.constant 0 : i32
    return %c0_i32, %c0_i32_0 : i32, i32
  }
  func.func @transform_3(%arg0: i32) -> (i32, i32) {
    %c0_i32 = arith.constant 0 : i32
    %c0_i32_0 = arith.constant 0 : i32
    return %c0_i32, %arg0 : i32, i32
  }
}

module attributes {stable_mosaic.version = 11 : i64} {
  func.func @_gemm_bias_act_kernel(%arg0: i32, %arg1: memref<128x576xf32, #tpu.memory_space<vmem>>, %arg2: memref<576x128xf32, #tpu.memory_space<vmem>>, %arg3: memref<128x1xf32, #tpu.memory_space<vmem>>, %arg4: memref<128x128xf32, #tpu.memory_space<vmem>>) attributes {dimension_semantics = [#tpu.dimension_semantics<parallel>], iteration_bounds = array<i64: 1>, scalar_prefetch = 0 : i64, scratch_operands = 0 : i64, tpu.core_type = #tpu.core_type<tc>, window_params = [{pipeline_mode = #tpu.pipeline_mode<synchronous>, transform_indices = @transform_0, window_bounds = array<i64: 128, 576>}, {transform_indices = @transform_1, window_bounds = array<i64: 576, 128>}, {pipeline_mode = #tpu.pipeline_mode<synchronous>, transform_indices = @transform_2, window_bounds = array<i64: 128, 1>}, {transform_indices = @transform_3, window_bounds = array<i64: 128, 128>}]} {
    %c0 = arith.constant 0 : index
    %c0_0 = arith.constant 0 : index
    %0 = vector.load %arg1[%c0, %c0_0] : memref<128x576xf32, #tpu.memory_space<vmem>>, vector<128x576xf32>
    %c0_1 = arith.constant 0 : index
    %c0_2 = arith.constant 0 : index
    %1 = vector.load %arg2[%c0_1, %c0_2] : memref<576x128xf32, #tpu.memory_space<vmem>>, vector<576x128xf32>
    %cst = arith.constant dense<0.000000e+00> : vector<128x128xf32>
    %2 = tpu.matmul %0, %1, %cst {dimension_numbers = #tpu.dot_dimension_numbers<[1], [0], [0], [1], [0, 0, 1, 1], [], []>} : vector<128x576xf32>, vector<576x128xf32>, vector<128x128xf32> -> vector<128x128xf32>
    %c0_3 = arith.constant 0 : index
    %c0_4 = arith.constant 0 : index
    %3 = vector.load %arg3[%c0_3, %c0_4] : memref<128x1xf32, #tpu.memory_space<vmem>>, vector<128x1xf32>
    %4 = vector.broadcast %3 : vector<128x1xf32> to vector<128x128xf32>
    %5 = arith.addf %2, %4 : vector<128x128xf32>
    %c0_5 = arith.constant 0 : index
    %c0_6 = arith.constant 0 : index
    %6 = vector.load %arg4[%c0_5, %c0_6] : memref<128x128xf32, #tpu.memory_space<vmem>>, vector<128x128xf32>
    tpu.vector_store %arg4[%c0_5, %c0_6], %5 {strides = array<i32>} : memref<128x128xf32, #tpu.memory_space<vmem>>, vector<128x128xf32>,
    return
  }
  func.func @transform_0(%arg0: i32) -> (i32, i32) {
    %c0_i32 = arith.constant 0 : i32
    %c0_i32_0 = arith.constant 0 : i32
    %c0_i32_1 = arith.constant 0 : i32
    return %c0_i32, %c0_i32_0 : i32, i32
  }
  func.func @transform_1(%arg0: i32) -> (i32, i32) {
    %c0_i32 = arith.constant 0 : i32
    %c0_i32_0 = arith.constant 0 : i32
    return %c0_i32, %arg0 : i32, i32
  }
  func.func @transform_2(%arg0: i32) -> (i32, i32) {
    %c0_i32 = arith.constant 0 : i32
    %c0_i32_0 = arith.constant 0 : i32
    %c0_i32_1 = arith.constant 0 : i32
    return %c0_i32, %c0_i32_0 : i32, i32
  }
  func.func @transform_3(%arg0: i32) -> (i32, i32) {
    %c0_i32 = arith.constant 0 : i32
    %c0_i32_0 = arith.constant 0 : i32
    return %c0_i32, %arg0 : i32, i32
  }
}

</mosaic_0001>

<bundles_post_ra>
// kernel: cnn_forward.6
= control target key start
LH: loop header
LB: loop body
LE: loop exit
PB: predicated region body
PF: predicated region fallthrough
CT: control target
= control target key end

     0   :  { %s2283_s12 = smov 0   ;;  %s2285_s13 = smov 0   ;;  %s2886_s0 = inlined_call_operand.vmem [shape: f32[4,27], index: 0, kind: input, shape index: {}]   ;;  %s2887_s1 = inlined_call_operand.vmem [shape: f32[27,7936], index: 1, kind: input, shape index: {}]   ;;  %s2888_s2 = inlined_call_operand.vmem [shape: f32[4,1], index: 2, kind: input, shape index: {}]   ;;  %s2889_s3 = inlined_call_operand.vmem [shape: f32[4,7936], index: 3, kind: output, shape index: {}]  }
   0x1   :  { %s2287_s14 = smov 0  }
   0x2 LB: > { %s1972_s15 = sadd.s32 4294967295, %s2256_s14   ;;  %s2300_s16 = sadd.s32 1, %s2256_s14   ;;  %s2256_s14 = sphi %s2287_s14, %s2894_s14   ;;  %s2252_s13 = sphi %s2285_s13, %s2893_s13   ;;  %s2248_s12 = sphi %s2283_s12, %s2892_s12  }
   0x3   : > { %s38_s17 = ssub.s32 %s2256_s14, %s2300_s16  ;;  %s41_s18 = sadd.s32 1, %s2252_s13 }
   0x4   : > { %p39_p0 = scmp.eq.s32.totalorder %s38_s17, 0  ;;  %p48_p1 = scmp.ne.s32.totalorder %s2252_s13, %s2248_s12 }
   0x5   : > { %p49_p2 = scmp.eq.s32.totalorder %s2256_s14, 0  ;;  %p1975_p4 = scmp.ge.s32.totalorder %s2256_s14, 2 }
   0x6   : > { %s2309_s19 = scalar_select %p39_p0, %s2252_s13, %s41_s18  }
   0x7   : > { %p50_p3 = por %p49_p2, %p48_p1  ;;  %127 = sbr.rel (%p1975_p4) target bundleno = 81 (0x51), region = 24 }
   0xe   : > { %130 = sbr.rel (!%p50_p3) target bundleno = 81 (0x51), region = 28  ;;  %s132_s20 = sand.u32 (%p50_p3), 1, %s2252_s13  }
   0xf   : > { %s2028_s21 = smul.u32 (%p50_p3), 248, %s2256_s14 }
  0x10   : > { %s2202_s22 = smul.u32 (%p50_p3), 992, %s132_s20 }
  0x11   : > { %s2317_s25 = scalar_lea.vmem (%p50_p3), %s2887_s1, %s2028_s21 }
  0x12   : > { %v150_v0 = vld [vmem:[%s2317_s25] sm:$0xff] (%p50_p3)  ;;  %v152_v1 = vld [vmem:[%s2317_s25 + $0x8] sm:$0xff] (%p50_p3)  ;;  %v154_v2 = vld [vmem:[%s2317_s25 + $0x10] sm:$0xff] (%p50_p3)  ;;  %s2322_s26 = scalar_lea.vmem (%p50_p3), [#allocation2], %s2202_s22 }
  0x13   : > { %151 = vst [vmem:[%s2322_s26] sm:$0xff] (%p50_p3), %v150_v0  ;;  %153 = vst [vmem:[%s2322_s26 + $0x8] sm:$0xff] (%p50_p3), %v152_v1  ;;  %v156_v3 = vld [vmem:[%s2317_s25 + $0x18] sm:$0xff] (%p50_p3)  ;;  %v158_v4 = vld [vmem:[%s2317_s25 + $0x20] sm:$0xff] (%p50_p3) }
  0x14   : > { %155 = vst [vmem:[%s2322_s26 + $0x10] sm:$0xff] (%p50_p3), %v154_v2  ;;  %v160_v5 = vld [vmem:[%s2317_s25 + $0x28] sm:$0xff] (%p50_p3)  ;;  %157 = vst [vmem:[%s2322_s26 + $0x18] sm:$0xff] (%p50_p3), %v156_v3  ;;  %v162_v6 = vld [vmem:[%s2317_s25 + $0x30] sm:$0xff] (%p50_p3) }
  0x15   : > { %159 = vst [vmem:[%s2322_s26 + $0x20] sm:$0xff] %v158_v4  ;;  %161 = vst [vmem:[%s2322_s26 + $0x28] sm:$0xff] %v160_v5  ;;  %v164_v7 = vld [vmem:[%s2317_s25 + $0x38] sm:$0xff]  ;;  %v166_v8 = vld [vmem:[%s2317_s25 + $0x40] sm:$0xff] }
  0x16   : > { %163 = vst [vmem:[%s2322_s26 + $0x30] sm:$0xff] %v162_v6  ;;  %165 = vst [vmem:[%s2322_s26 + $0x38] sm:$0xff] %v164_v7  ;;  %v168_v9 = vld [vmem:[%s2317_s25 + $0x48] sm:$0xff]  ;;  %v170_v10 = vld [vmem:[%s2317_s25 + $0x50] sm:$0xff] }
  0x17   : > { %167 = vst [vmem:[%s2322_s26 + $0x40] sm:$0xff] %v166_v8  ;;  %v172_v11 = vld [vmem:[%s2317_s25 + $0x58] sm:$0xff]  ;;  %169 = vst [vmem:[%s2322_s26 + $0x48] sm:$0xff] %v168_v9  ;;  %v174_v12 = vld [vmem:[%s2317_s25 + $0x60] sm:$0xff] }
  0x18   : > { %171 = vst [vmem:[%s2322_s26 + $0x50] sm:$0xff] %v170_v10  ;;  %173 = vst [vmem:[%s2322_s26 + $0x58] sm:$0xff] %v172_v11  ;;  %v176_v13 = vld [vmem:[%s2317_s25 + $0x68] sm:$0xff]  ;;  %v178_v14 = vld [vmem:[%s2317_s25 + $0x70] sm:$0xff] }
  0x19   : > { %175 = vst [vmem:[%s2322_s26 + $0x60] sm:$0xff] %v174_v12  ;;  %177 = vst [vmem:[%s2322_s26 + $0x68] sm:$0xff] %v176_v13  ;;  %v180_v15 = vld [vmem:[%s2317_s25 + $0x78] sm:$0xff]  ;;  %v182_v16 = vld [vmem:[%s2317_s25 + $0x80] sm:$0xff] }
  0x1a   : > { %179 = vst [vmem:[%s2322_s26 + $0x70] sm:$0xff] %v178_v14  ;;  %v184_v17 = vld [vmem:[%s2317_s25 + $0x88] sm:$0xff]  ;;  %181 = vst [vmem:[%s2322_s26 + $0x78] sm:$0xff] %v180_v15  ;;  %v186_v18 = vld [vmem:[%s2317_s25 + $0x90] sm:$0xff] }
  0x1b   : > { %183 = vst [vmem:[%s2322_s26 + $0x80] sm:$0xff] %v182_v16  ;;  %185 = vst [vmem:[%s2322_s26 + $0x88] sm:$0xff] %v184_v17  ;;  %v188_v19 = vld [vmem:[%s2317_s25 + $0x98] sm:$0xff]  ;;  %v190_v20 = vld [vmem:[%s2317_s25 + $0xa0] sm:$0xff] }
  0x1c   : > { %187 = vst [vmem:[%s2322_s26 + $0x90] sm:$0xff] %v186_v18  ;;  %189 = vst [vmem:[%s2322_s26 + $0x98] sm:$0xff] %v188_v19  ;;  %v192_v21 = vld [vmem:[%s2317_s25 + $0xa8] sm:$0xff]  ;;  %v194_v22 = vld [vmem:[%s2317_s25 + $0xb0] sm:$0xff] }
  0x1d   : > { %191 = vst [vmem:[%s2322_s26 + $0xa0] sm:$0xff] %v190_v20  ;;  %v196_v23 = vld [vmem:[%s2317_s25 + $0xb8] sm:$0xff]  ;;  %193 = vst [vmem:[%s2322_s26 + $0xa8] sm:$0xff] %v192_v21  ;;  %v198_v24 = vld [vmem:[%s2317_s25 + $0xc0] sm:$0xff] }
  0x1e   : > { %195 = vst [vmem:[%s2322_s26 + $0xb0] sm:$0xff] %v194_v22  ;;  %197 = vst [vmem:[%s2322_s26 + $0xb8] sm:$0xff] %v196_v23  ;;  %v200_v25 = vld [vmem:[%s2317_s25 + $0xc8] sm:$0xff]  ;;  %v202_v26 = vld [vmem:[%s2317_s25 + $0xd0] sm:$0xff] }
  0x1f   : > { %199 = vst [vmem:[%s2322_s26 + $0xc0] sm:$0xff] %v198_v24  ;;  %201 = vst [vmem:[%s2322_s26 + $0xc8] sm:$0xff] %v200_v25  ;;  %v204_v27 = vld [vmem:[%s2317_s25 + $0xd8] sm:$0xff]  ;;  %v206_v28 = vld [vmem:[%s2317_s25 + $0xe0] sm:$0xff] }
  0x20   : > { %203 = vst [vmem:[%s2322_s26 + $0xd0] sm:$0xff] %v202_v26  ;;  %v208_v29 = vld [vmem:[%s2317_s25 + $0xe8] sm:$0xff]  ;;  %205 = vst [vmem:[%s2322_s26 + $0xd8] sm:$0xff] %v204_v27  ;;  %v210_v30 = vld [vmem:[%s2317_s25 + $0xf0] sm:$0xff] }
  0x21   : > { %207 = vst [vmem:[%s2322_s26 + $0xe0] sm:$0xff] %v206_v28  ;;  %209 = vst [vmem:[%s2322_s26 + $0xe8] sm:$0xff] %v208_v29  ;;  %v212_v31 = vld [vmem:[%s2317_s25 + $0x1f0] sm:$0xff]  ;;  %v214_v32 = vld [vmem:[%s2317_s25 + $0x1f8] sm:$0xff] }
  0x22   : > { %211 = vst [vmem:[%s2322_s26 + $0xf0] sm:$0xff] %v210_v30  ;;  %213 = vst [vmem:[%s2322_s26 + $0xf8] sm:$0xff] %v212_v31  ;;  %v216_v33 = vld [vmem:[%s2317_s25 + $0x200] sm:$0xff]  ;;  %v218_v34 = vld [vmem:[%s2317_s25 + $0x208] sm:$0xff] }
  0x23   : > { %215 = vst [vmem:[%s2322_s26 + $0x100] sm:$0xff] %v214_v32  ;;  %v220_v35 = vld [vmem:[%s2317_s25 + $0x210] sm:$0xff]  ;;  %217 = vst [vmem:[%s2322_s26 + $0x108] sm:$0xff] %v216_v33  ;;  %v222_v36 = vld [vmem:[%s2317_s25 + $0x218] sm:$0xff] }
  0x24   : > { %219 = vst [vmem:[%s2322_s26 + $0x110] sm:$0xff] %v218_v34  ;;  %221 = vst [vmem:[%s2322_s26 + $0x118] sm:$0xff] %v220_v35  ;;  %v224_v37 = vld [vmem:[%s2317_s25 + $0x220] sm:$0xff]  ;;  %v226_v38 = vld [vmem:[%s2317_s25 + $0x228] sm:$0xff] }
  0x25   : > { %223 = vst [vmem:[%s2322_s26 + $0x120] sm:$0xff] %v222_v36  ;;  %225 = vst [vmem:[%s2322_s26 + $0x128] sm:$0xff] %v224_v37  ;;  %v228_v39 = vld [vmem:[%s2317_s25 + $0x230] sm:$0xff]  ;;  %v230_v40 = vld [vmem:[%s2317_s25 + $0x238] sm:$0xff] }
  0x26   : > { %227 = vst [vmem:[%s2322_s26 + $0x130] sm:$0xff] %v226_v38  ;;  %v232_v41 = vld [vmem:[%s2317_s25 + $0x240] sm:$0xff]  ;;  %229 = vst [vmem:[%s2322_s26 + $0x138] sm:$0xff] %v228_v39  ;;  %v234_v42 = vld [vmem:[%s2317_s25 + $0x248] sm:$0xff] }
  0x27   : > { %231 = vst [vmem:[%s2322_s26 + $0x140] sm:$0xff] %v230_v40  ;;  %233 = vst [vmem:[%s2322_s26 + $0x148] sm:$0xff] %v232_v41  ;;  %v236_v43 = vld [vmem:[%s2317_s25 + $0x250] sm:$0xff]  ;;  %v238_v44 = vld [vmem:[%s2317_s25 + $0x258] sm:$0xff] }
  0x28   : > { %235 = vst [vmem:[%s2322_s26 + $0x150] sm:$0xff] %v234_v42  ;;  %237 = vst [vmem:[%s2322_s26 + $0x158] sm:$0xff] %v236_v43  ;;  %v240_v45 = vld [vmem:[%s2317_s25 + $0x260] sm:$0xff]  ;;  %v242_v46 = vld [vmem:[%s2317_s25 + $0x268] sm:$0xff] }
  0x29   : > { %239 = vst [vmem:[%s2322_s26 + $0x160] sm:$0xff] %v238_v44  ;;  %v244_v47 = vld [vmem:[%s2317_s25 + $0x270] sm:$0xff]  ;;  %241 = vst [vmem:[%s2322_s26 + $0x168] sm:$0xff] %v240_v45  ;;  %v246_v48 = vld [vmem:[%s2317_s25 + $0x278] sm:$0xff] }
  0x2a   : > { %243 = vst [vmem:[%s2322_s26 + $0x170] sm:$0xff] %v242_v46  ;;  %245 = vst [vmem:[%s2322_s26 + $0x178] sm:$0xff] %v244_v47  ;;  %v248_v49 = vld [vmem:[%s2317_s25 + $0x280] sm:$0xff]  ;;  %v250_v50 = vld [vmem:[%s2317_s25 + $0x288] sm:$0xff] }
  0x2b   : > { %247 = vst [vmem:[%s2322_s26 + $0x180] sm:$0xff] %v246_v48  ;;  %249 = vst [vmem:[%s2322_s26 + $0x188] sm:$0xff] %v248_v49  ;;  %v252_v51 = vld [vmem:[%s2317_s25 + $0x290] sm:$0xff]  ;;  %v254_v52 = vld [vmem:[%s2317_s25 + $0x298] sm:$0xff] }
  0x2c   : > { %251 = vst [vmem:[%s2322_s26 + $0x190] sm:$0xff] %v250_v50  ;;  %v256_v53 = vld [vmem:[%s2317_s25 + $0x2a0] sm:$0xff]  ;;  %253 = vst [vmem:[%s2322_s26 + $0x198] sm:$0xff] %v252_v51  ;;  %v258_v54 = vld [vmem:[%s2317_s25 + $0x2a8] sm:$0xff] }
  0x2d   : > { %255 = vst [vmem:[%s2322_s26 + $0x1a0] sm:$0xff] %v254_v52  ;;  %257 = vst [vmem:[%s2322_s26 + $0x1a8] sm:$0xff] %v256_v53  ;;  %v260_v55 = vld [vmem:[%s2317_s25 + $0x2b0] sm:$0xff]  ;;  %v262_v56 = vld [vmem:[%s2317_s25 + $0x2b8] sm:$0xff] }
  0x2e   : > { %259 = vst [vmem:[%s2322_s26 + $0x1b0] sm:$0xff] %v258_v54  ;;  %261 = vst [vmem:[%s2322_s26 + $0x1b8] sm:$0xff] %v260_v55  ;;  %v264_v57 = vld [vmem:[%s2317_s25 + $0x2c0] sm:$0xff]  ;;  %v266_v58 = vld [vmem:[%s2317_s25 + $0x2c8] sm:$0xff] }
  0x2f   : > { %263 = vst [vmem:[%s2322_s26 + $0x1c0] sm:$0xff] %v262_v56  ;;  %v268_v59 = vld [vmem:[%s2317_s25 + $0x2d0] sm:$0xff]  ;;  %265 = vst [vmem:[%s2322_s26 + $0x1c8] sm:$0xff] %v264_v57  ;;  %v270_v60 = vld [vmem:[%s2317_s25 + $0x2d8] sm:$0xff] }
  0x30   : > { %267 = vst [vmem:[%s2322_s26 + $0x1d0] sm:$0xff] %v266_v58  ;;  %269 = vst [vmem:[%s2322_s26 + $0x1d8] sm:$0xff] %v268_v59  ;;  %v272_v61 = vld [vmem:[%s2317_s25 + $0x2e0] sm:$0xff]  ;;  %v276_v63 = vld [vmem:[%s2317_s25 + $0x3e8] sm:$0xff] }
  0x31   : > { %v274_v62 = vld [vmem:[%s2317_s25 + $0x3e0] sm:$0xff]  ;;  %271 = vst [vmem:[%s2322_s26 + $0x1e0] sm:$0xff] %v270_v60  ;;  %273 = vst [vmem:[%s2322_s26 + $0x1e8] sm:$0xff] %v272_v61  ;;  %v278_v0 = vld [vmem:[%s2317_s25 + $0x3f0] sm:$0xff] }
  0x32   : > { %275 = vst [vmem:[%s2322_s26 + $0x1f0] sm:$0xff] %v274_v62  ;;  %v280_v1 = vld [vmem:[%s2317_s25 + $0x3f8] sm:$0xff]  ;;  %277 = vst [vmem:[%s2322_s26 + $0x1f8] sm:$0xff] %v276_v63  ;;  %v282_v2 = vld [vmem:[%s2317_s25 + $0x400] sm:$0xff] }
  0x33   : > { %279 = vst [vmem:[%s2322_s26 + $0x200] sm:$0xff] %v278_v0  ;;  %281 = vst [vmem:[%s2322_s26 + $0x208] sm:$0xff] %v280_v1  ;;  %v284_v3 = vld [vmem:[%s2317_s25 + $0x408] sm:$0xff]  ;;  %v286_v4 = vld [vmem:[%s2317_s25 + $0x410] sm:$0xff] }
  0x34   : > { %283 = vst [vmem:[%s2322_s26 + $0x210] sm:$0xff] %v282_v2  ;;  %285 = vst [vmem:[%s2322_s26 + $0x218] sm:$0xff] %v284_v3  ;;  %v288_v5 = vld [vmem:[%s2317_s25 + $0x418] sm:$0xff]  ;;  %v290_v6 = vld [vmem:[%s2317_s25 + $0x420] sm:$0xff] }
  0x35   : > { %287 = vst [vmem:[%s2322_s26 + $0x220] sm:$0xff] %v286_v4  ;;  %v292_v7 = vld [vmem:[%s2317_s25 + $0x428] sm:$0xff]  ;;  %289 = vst [vmem:[%s2322_s26 + $0x228] sm:$0xff] %v288_v5  ;;  %v294_v8 = vld [vmem:[%s2317_s25 + $0x430] sm:$0xff] }
  0x36   : > { %291 = vst [vmem:[%s2322_s26 + $0x230] sm:$0xff] %v290_v6  ;;  %293 = vst [vmem:[%s2322_s26 + $0x238] sm:$0xff] %v292_v7  ;;  %v296_v9 = vld [vmem:[%s2317_s25 + $0x438] sm:$0xff]  ;;  %v298_v10 = vld [vmem:[%s2317_s25 + $0x440] sm:$0xff] }
  0x37   : > { %295 = vst [vmem:[%s2322_s26 + $0x240] sm:$0xff] %v294_v8  ;;  %297 = vst [vmem:[%s2322_s26 + $0x248] sm:$0xff] %v296_v9  ;;  %v300_v11 = vld [vmem:[%s2317_s25 + $0x448] sm:$0xff]  ;;  %v302_v12 = vld [vmem:[%s2317_s25 + $0x450] sm:$0xff] }
  0x38   : > { %299 = vst [vmem:[%s2322_s26 + $0x250] sm:$0xff] %v298_v10  ;;  %v304_v13 = vld [vmem:[%s2317_s25 + $0x458] sm:$0xff]  ;;  %301 = vst [vmem:[%s2322_s26 + $0x258] sm:$0xff] %v300_v11  ;;  %v306_v14 = vld [vmem:[%s2317_s25 + $0x460] sm:$0xff] }
  0x39   : > { %303 = vst [vmem:[%s2322_s26 + $0x260] sm:$0xff] %v302_v12  ;;  %305 = vst [vmem:[%s2322_s26 + $0x268] sm:$0xff] %v304_v13  ;;  %v308_v15 = vld [vmem:[%s2317_s25 + $0x468] sm:$0xff]  ;;  %v310_v16 = vld [vmem:[%s2317_s25 + $0x470] sm:$0xff] }
  0x3a   : > { %307 = vst [vmem:[%s2322_s26 + $0x270] sm:$0xff] %v306_v14  ;;  %309 = vst [vmem:[%s2322_s26 + $0x278] sm:$0xff] %v308_v15  ;;  %v312_v17 = vld [vmem:[%s2317_s25 + $0x478] sm:$0xff]  ;;  %v314_v18 = vld [vmem:[%s2317_s25 + $0x480] sm:$0xff] }
  0x3b   : > { %311 = vst [vmem:[%s2322_s26 + $0x280] sm:$0xff] %v310_v16  ;;  %v316_v19 = vld [vmem:[%s2317_s25 + $0x488] sm:$0xff]  ;;  %313 = vst [vmem:[%s2322_s26 + $0x288] sm:$0xff] %v312_v17  ;;  %v318_v20 = vld [vmem:[%s2317_s25 + $0x490] sm:$0xff] }
  0x3c   : > { %315 = vst [vmem:[%s2322_s26 + $0x290] sm:$0xff] %v314_v18  ;;  %317 = vst [vmem:[%s2322_s26 + $0x298] sm:$0xff] %v316_v19  ;;  %v320_v21 = vld [vmem:[%s2317_s25 + $0x498] sm:$0xff]  ;;  %v322_v22 = vld [vmem:[%s2317_s25 + $0x4a0] sm:$0xff] }
  0x3d   : > { %319 = vst [vmem:[%s2322_s26 + $0x2a0] sm:$0xff] %v318_v20  ;;  %321 = vst [vmem:[%s2322_s26 + $0x2a8] sm:$0xff] %v320_v21  ;;  %v324_v23 = vld [vmem:[%s2317_s25 + $0x4a8] sm:$0xff]  ;;  %v326_v24 = vld [vmem:[%s2317_s25 + $0x4b0] sm:$0xff] }
  0x3e   : > { %323 = vst [vmem:[%s2322_s26 + $0x2b0] sm:$0xff] %v322_v22  ;;  %v328_v25 = vld [vmem:[%s2317_s25 + $0x4b8] sm:$0xff]  ;;  %325 = vst [vmem:[%s2322_s26 + $0x2b8] sm:$0xff] %v324_v23  ;;  %v330_v26 = vld [vmem:[%s2317_s25 + $0x4c0] sm:$0xff] }
  0x3f   : > { %327 = vst [vmem:[%s2322_s26 + $0x2c0] sm:$0xff] %v326_v24  ;;  %329 = vst [vmem:[%s2322_s26 + $0x2c8] sm:$0xff] %v328_v25  ;;  %v332_v27 = vld [vmem:[%s2317_s25 + $0x4c8] sm:$0xff]  ;;  %v334_v28 = vld [vmem:[%s2317_s25 + $0x4d0] sm:$0xff] }
  0x40   : > { %331 = vst [vmem:[%s2322_s26 + $0x2d0] sm:$0xff] %v330_v26  ;;  %333 = vst [vmem:[%s2322_s26 + $0x2d8] sm:$0xff] %v332_v27  ;;  %v336_v29 = vld [vmem:[%s2317_s25 + $0x5d0] sm:$0xff]  ;;  %v338_v30 = vld [vmem:[%s2317_s25 + $0x5d8] sm:$0xff] }
  0x41   : > { %335 = vst [vmem:[%s2322_s26 + $0x2e0] sm:$0xff] %v334_v28  ;;  %v340_v31 = vld [vmem:[%s2317_s25 + $0x5e0] sm:$0xff]  ;;  %337 = vst [vmem:[%s2322_s26 + $0x2e8] sm:$0xff] %v336_v29  ;;  %v342_v32 = vld [vmem:[%s2317_s25 + $0x5e8] sm:$0xff] }
  0x42   : > { %339 = vst [vmem:[%s2322_s26 + $0x2f0] sm:$0xff] %v338_v30  ;;  %341 = vst [vmem:[%s2322_s26 + $0x2f8] sm:$0xff] %v340_v31  ;;  %v344_v33 = vld [vmem:[%s2317_s25 + $0x5f0] sm:$0xff]  ;;  %v346_v34 = vld [vmem:[%s2317_s25 + $0x5f8] sm:$0xff] }
  0x43   : > { %343 = vst [vmem:[%s2322_s26 + $0x300] sm:$0xff] %v342_v32  ;;  %345 = vst [vmem:[%s2322_s26 + $0x308] sm:$0xff] %v344_v33  ;;  %v348_v35 = vld [vmem:[%s2317_s25 + $0x600] sm:$0xff]  ;;  %v350_v36 = vld [vmem:[%s2317_s25 + $0x608] sm:$0xff] }
  0x44   : > { %347 = vst [vmem:[%s2322_s26 + $0x310] sm:$0xff] %v346_v34  ;;  %v352_v37 = vld [vmem:[%s2317_s25 + $0x610] sm:$0xff]  ;;  %349 = vst [vmem:[%s2322_s26 + $0x318] sm:$0xff] %v348_v35  ;;  %v354_v38 = vld [vmem:[%s2317_s25 + $0x618] sm:$0xff] }
  0x45   : > { %351 = vst [vmem:[%s2322_s26 + $0x320] sm:$0xff] %v350_v36  ;;  %353 = vst [vmem:[%s2322_s26 + $0x328] sm:$0xff] %v352_v37  ;;  %v356_v39 = vld [vmem:[%s2317_s25 + $0x620] sm:$0xff]  ;;  %v358_v40 = vld [vmem:[%s2317_s25 + $0x628] sm:$0xff] }
  0x46   : > { %355 = vst [vmem:[%s2322_s26 + $0x330] sm:$0xff] %v354_v38  ;;  %357 = vst [vmem:[%s2322_s26 + $0x338] sm:$0xff] %v356_v39  ;;  %v360_v41 = vld [vmem:[%s2317_s25 + $0x630] sm:$0xff]  ;;  %v362_v42 = vld [vmem:[%s2317_s25 + $0x638] sm:$0xff] }
  0x47   : > { %359 = vst [vmem:[%s2322_s26 + $0x340] sm:$0xff] %v358_v40  ;;  %v364_v43 = vld [vmem:[%s2317_s25 + $0x640] sm:$0xff]  ;;  %361 = vst [vmem:[%s2322_s26 + $0x348] sm:$0xff] %v360_v41  ;;  %v366_v44 = vld [vmem:[%s2317_s25 + $0x648] sm:$0xff] }
  0x48   : > { %363 = vst [vmem:[%s2322_s26 + $0x350] sm:$0xff] %v362_v42  ;;  %365 = vst [vmem:[%s2322_s26 + $0x358] sm:$0xff] %v364_v43  ;;  %v368_v45 = vld [vmem:[%s2317_s25 + $0x650] sm:$0xff]  ;;  %v370_v46 = vld [vmem:[%s2317_s25 + $0x658] sm:$0xff] }
  0x49   : > { %367 = vst [vmem:[%s2322_s26 + $0x360] sm:$0xff] %v366_v44  ;;  %369 = vst [vmem:[%s2322_s26 + $0x368] sm:$0xff] %v368_v45  ;;  %v372_v47 = vld [vmem:[%s2317_s25 + $0x660] sm:$0xff]  ;;  %v374_v48 = vld [vmem:[%s2317_s25 + $0x668] sm:$0xff] }
  0x4a   : > { %371 = vst [vmem:[%s2322_s26 + $0x370] sm:$0xff] %v370_v46  ;;  %v376_v49 = vld [vmem:[%s2317_s25 + $0x670] sm:$0xff]  ;;  %373 = vst [vmem:[%s2322_s26 + $0x378] sm:$0xff] %v372_v47  ;;  %v378_v50 = vld [vmem:[%s2317_s25 + $0x678] sm:$0xff] }
  0x4b   : > { %375 = vst [vmem:[%s2322_s26 + $0x380] sm:$0xff] %v374_v48  ;;  %377 = vst [vmem:[%s2322_s26 + $0x388] sm:$0xff] %v376_v49  ;;  %v380_v51 = vld [vmem:[%s2317_s25 + $0x680] sm:$0xff]  ;;  %v382_v52 = vld [vmem:[%s2317_s25 + $0x688] sm:$0xff] }
  0x4c   : > { %379 = vst [vmem:[%s2322_s26 + $0x390] sm:$0xff] %v378_v50  ;;  %381 = vst [vmem:[%s2322_s26 + $0x398] sm:$0xff] %v380_v51  ;;  %v384_v53 = vld [vmem:[%s2317_s25 + $0x690] sm:$0xff]  ;;  %v386_v54 = vld [vmem:[%s2317_s25 + $0x698] sm:$0xff] }
  0x4d   : > { %383 = vst [vmem:[%s2322_s26 + $0x3a0] sm:$0xff] %v382_v52  ;;  %v388_v55 = vld [vmem:[%s2317_s25 + $0x6a0] sm:$0xff]  ;;  %385 = vst [vmem:[%s2322_s26 + $0x3a8] sm:$0xff] %v384_v53  ;;  %v390_v56 = vld [vmem:[%s2317_s25 + $0x6a8] sm:$0xff] }
  0x4e   : > { %387 = vst [vmem:[%s2322_s26 + $0x3b0] sm:$0xff] %v386_v54  ;;  %389 = vst [vmem:[%s2322_s26 + $0x3b8] sm:$0xff] %v388_v55  ;;  %v392_v57 = vld [vmem:[%s2317_s25 + $0x6b0] sm:$0xff]  ;;  %v394_v58 = vld [vmem:[%s2317_s25 + $0x6b8] sm:$0xff] }
  0x4f   : > { %391 = vst [vmem:[%s2322_s26 + $0x3c0] sm:$0xff] %v390_v56  ;;  %393 = vst [vmem:[%s2322_s26 + $0x3c8] sm:$0xff] %v392_v57  ;;  %v396_v59 = vld [vmem:[%s2317_s25 + $0x6c0] sm:$0xff] }
  0x50   : > { %395 = vst [vmem:[%s2322_s26 + $0x3d0] sm:$0xff] %v394_v58  ;;  %397 = vst [vmem:[%s2322_s26 + $0x3d8] sm:$0xff] %v396_v59 }
  0x51 PF: > { %p1977_p5 = scmp.ge.s32.totalorder %s2256_s14, 1  ;;  %p402_p6 = scmp.lt.s32.totalorder %s2256_s14, 3 }
  0x53   : > { %p403_p7 = pnand %p1977_p5, %p402_p6 }
  0x54   : > { %s409_s27 = sand.u32 (!%p403_p7), 1, %s2248_s12   ;;  %vm574_vm0 = vcmask (!%p403_p7), 1042432   ;;  %v2258_v60 = vmov (!%p403_p7), 0.0   ;;  %v2259_v61 = vmov (!%p403_p7), 0   ;;  %v564_v62 = vld [vmem:[%s2888_s2] sm:$0xf] (!%p403_p7) }
  0x55   : > { %406 = sbr.rel (%p403_p7) target bundleno = 376 (0x178), region = 51  ;;  %732 = vmatprep.mubr.f32.mxu0 (!%p403_p7), %v2258_v60  ;;  %803 = vmatprep.mubr.f32.mxu1 (!%p403_p7), %v2258_v60  ;;  %vm2260_vm1 = vmmov (!%p403_p7), 1   ;;  %v2606_v26 = vld [vmem:[%s2886_s0] sm:$0xf] (!%p403_p7)  ;;  %vm570_vm3 = vcmask (!%p403_p7), 220160   ;;  %vm2262_vm4 = vmmov (!%p403_p7), 0  }
  0x56   : > { %s2203_s28 = smul.u32 (!%p403_p7), 992, %s409_s27  ;;  %2233 = vset.pattern.permute.xlu0 (!%p403_p7), %v2259_v61  ;;  %vm2577_vm2 = vmpackc.low (!%p403_p7), %vm574_vm0, %vm2260_vm1 }
  0x57   : > { %567 = vperm.xlu0 (!%p403_p7), %2233, %v564_v62   ;;  %s433_s7 = smul.u32 (!%p403_p7), 31, %s1972_s15 }
  0x58   : > { %s2581_s4 = scalar_lea.vmem (!%p403_p7), [#allocation2], %s2203_s28 }
  0x59   : > { %v441_v0 = vld [vmem:[%s2581_s4 + $0x8] sm:$0xff] (!%p403_p7)  ;;  %v472_v1 = vld [vmem:[%s2581_s4 + $0x100] sm:$0xff] (!%p403_p7)  ;;  %v471_v4 = vld [vmem:[%s2581_s4 + $0xf8] sm:$0xff] (!%p403_p7)  ;;  %p434_p8 = scmp.lt.s32.totalorder (!%p403_p7), %s433_s7, 61 }
  0x5a   : > { %v440_v2 = vld [vmem:[%s2581_s4] sm:$0xff] (!%p403_p7)  ;;  %v2045_v3 = vpack.c.bf16 (!%p403_p7), %v472_v1, %v441_v0  ;;  %v443_v5 = vld [vmem:[%s2581_s4 + $0x18] sm:$0xff] (!%p403_p7)  ;;  %v474_v6 = vld [vmem:[%s2581_s4 + $0x110] sm:$0xff] (!%p403_p7) }
  0x5b   : > { %v2047_v7 = vpack.c.bf16 (!%p403_p7), %v471_v4, %v440_v2  ;;  %v2055_v8 = vpack.c.bf16 (!%p403_p7), %v474_v6, %v443_v5  ;;  %v442_v9 = vld [vmem:[%s2581_s4 + $0x10] sm:$0xff] (!%p403_p7)  ;;  %v473_v10 = vld [vmem:[%s2581_s4 + $0x108] sm:$0xff] (!%p403_p7)  ;;  %v503_v11 = vld [vmem:[%s2581_s4 + $0x1f8] sm:$0xff] (!%p403_p7) }
  0x5c   : > { %2046 = vmatprep.subr.bf16.mxu0 %v2045_v3  ;;  %v2057_v12 = vpack.c.bf16 %v473_v10, %v442_v9  ;;  %v534_v13 = vld [vmem:[%s2581_s4 + $0x2f0] sm:$0x7]  ;;  %v533_v15 = vld [vmem:[%s2581_s4 + $0x2e8] sm:$0x7]  ;;  %v536_v19 = vld [vmem:[%s2581_s4 + $0x300] sm:$0x7] }
  0x5d   : > { %v502_v14 = vld [vmem:[%s2581_s4 + $0x1f0] sm:$0xff]  ;;  %2048 = vmatpush1.bf16.msra.mxu0 %v2047_v7  ;;  %2056 = vmatprep.subr.bf16.mxu1 %v2055_v8  ;;  %v2049_v16 = vpack.c.bf16 %v534_v13, %v503_v11  ;;  %v505_v18 = vld [vmem:[%s2581_s4 + $0x208] sm:$0xff]  ;;  %v504_v20 = vld [vmem:[%s2581_s4 + $0x200] sm:$0xff]  ;;  %s2896_s7 = smov (!%p434_p8, %s433_s7), 61 }
  0x5e   : > { %v2052_v17 = vpack.c.bf16 %v533_v15, %v502_v14  ;;  %2058 = vmatpush1.bf16.msra.mxu1 %v2057_v12  ;;  %v2059_v21 = vpack.c.bf16 %v536_v19, %v505_v18  ;;  %v535_v22 = vld [vmem:[%s2581_s4 + $0x2f8] sm:$0x7]  ;;  %v445_v23 = vld [vmem:[%s2581_s4 + $0x28] sm:$0xff]  ;;  %v476_v24 = vld [vmem:[%s2581_s4 + $0x120] sm:$0xff]  ;;  %s1978_s8 = sshll.u32 %s2896_s7, 2 }
  0x5f   : > { %2051 = vmatprep.subr.msk.bf16.mxu0 %vm2577_vm2, %v2049_v16  ;;  %v2062_v25 = vpack.c.bf16 %v535_v22, %v504_v20  ;;  %v2065_v27 = vpack.c.bf16 %v476_v24, %v445_v23  ;;  %v444_v28 = vld [vmem:[%s2581_s4 + $0x20] sm:$0xff]  ;;  %v475_v29 = vld [vmem:[%s2581_s4 + $0x118] sm:$0xff]  ;;  %v478_v31 = vld [vmem:[%s2581_s4 + $0x130] sm:$0xff]  ;;  %s2831_s11 = scalar_lea.vmem %s2889_s3, %s1978_s8 }
  0x60   : > { %v447_v30 = vld [vmem:[%s2581_s4 + $0x38] sm:$0xff]  ;;  %2061 = vmatprep.subr.msk.bf16.mxu1 %vm2577_vm2, %v2059_v21  ;;  %v446_v32 = vld [vmem:[%s2581_s4 + $0x30] sm:$0xff]  ;;  %v477_v33 = vld [vmem:[%s2581_s4 + $0x128] sm:$0xff]  ;;  %v2067_v34 = vpack.c.bf16 %v475_v29, %v444_v28 }
  0x61   : > { %2054 = vmatpush1.bf16.msk.msra.mxu0 %vm2577_vm2, %v2052_v17  ;;  %v2075_v35 = vpack.c.bf16 %v478_v31, %v447_v30  ;;  %v507_v36 = vld [vmem:[%s2581_s4 + $0x218] sm:$0xff]  ;;  %v538_v37 = vld [vmem:[%s2581_s4 + $0x310] sm:$0x7]  ;;  %v2077_v39 = vpack.c.bf16 %v477_v33, %v446_v32  ;;  %v537_v41 = vld [vmem:[%s2581_s4 + $0x308] sm:$0x7] }
  0x62   : > { %v506_v38 = vld [vmem:[%s2581_s4 + $0x210] sm:$0xff]  ;;  %2064 = vmatpush1.bf16.msk.msra.mxu1 %vm2577_vm2, %v2062_v25  ;;  %2066 = vmatprep.subr.bf16.mxu0 %v2065_v27  ;;  %v2069_v40 = vpack.c.bf16 %v538_v37, %v507_v36  ;;  %v509_v42 = vld [vmem:[%s2581_s4 + $0x228] sm:$0xff]  ;;  %v540_v43 = vld [vmem:[%s2581_s4 + $0x320] sm:$0x7] }
  0x63   : > { %2076 = vmatprep.subr.bf16.mxu1 %v2075_v35  ;;  %v2079_v44 = vpack.c.bf16 %v540_v43, %v509_v42  ;;  %v508_v45 = vld [vmem:[%s2581_s4 + $0x220] sm:$0xff]  ;;  %v539_v46 = vld [vmem:[%s2581_s4 + $0x318] sm:$0x7]  ;;  %v449_v47 = vld [vmem:[%s2581_s4 + $0x48] sm:$0xff]  ;;  %v2072_v49 = vpack.c.bf16 %v537_v41, %v506_v38 }
  0x64   : > { %1981 = vmatmul.mubr.msk.f32.vlgmr.msra.gmra.mrb[0].mxu0 %vm570_vm3, %v2606_v26  ;;  %v480_v48 = vld [vmem:[%s2581_s4 + $0x140] sm:$0xff]  ;;  %v451_v50 = vld [vmem:[%s2581_s4 + $0x58] sm:$0xff]  ;;  %v482_v51 = vld [vmem:[%s2581_s4 + $0x150] sm:$0xff]  ;;  %v2082_v52 = vpack.c.bf16 %v539_v46, %v508_v45 }
  0x65   : > { %2068 = vmatpush1.bf16.msra.mxu0 %v2067_v34  ;;  %1984 = vmatmul.mubr.msk.f32.vlgmr.msra.gmra.mrb[0].mxu1 %vm570_vm3, %v2606_v26  ;;  %v2085_v53 = vpack.c.bf16 %v480_v48, %v449_v47  ;;  %v448_v54 = vld [vmem:[%s2581_s4 + $0x40] sm:$0xff]  ;;  %v479_v55 = vld [vmem:[%s2581_s4 + $0x138] sm:$0xff]  ;;  %v450_v56 = vld [vmem:[%s2581_s4 + $0x50] sm:$0xff]  ;;  %v2095_v57 = vpack.c.bf16 %v482_v51, %v451_v50 }
  0x66   : > { %2078 = vmatpush1.bf16.msra.mxu1 %v2077_v39  ;;  %2071 = vmatprep.subr.msk.bf16.mxu0 %vm2577_vm2, %v2069_v40  ;;  %v481_v58 = vld [vmem:[%s2581_s4 + $0x148] sm:$0xff]  ;;  %v511_v59 = vld [vmem:[%s2581_s4 + $0x238] sm:$0xff]  ;;  %v542_v61 = vld [vmem:[%s2581_s4 + $0x330] sm:$0x7]  ;;  %v2087_v1 = vpack.c.bf16 %v479_v55, %v448_v54 }
  0x67   : > { %2081 = vmatprep.subr.msk.bf16.mxu1 %vm2577_vm2, %v2079_v44  ;;  %874 = vmatprep.mubr.f32.mxu0 %v2258_v60  ;;  %v513_v62 = vld [vmem:[%s2581_s4 + $0x248] sm:$0xff]  ;;  %v544_v0 = vld [vmem:[%s2581_s4 + $0x340] sm:$0x7]  ;;  %v2097_v2 = vpack.c.bf16 %v481_v58, %v450_v56  ;;  %v2089_v3 = vpack.c.bf16 %v542_v61, %v511_v59  ;;  %v510_v4 = vld [vmem:[%s2581_s4 + $0x230] sm:$0xff] }
  0x68   : > { %945 = vmatprep.mubr.f32.mxu1 %v2258_v60  ;;  %v541_v5 = vld [vmem:[%s2581_s4 + $0x328] sm:$0x7]  ;;  %v512_v6 = vld [vmem:[%s2581_s4 + $0x240] sm:$0xff]  ;;  %v2099_v7 = vpack.c.bf16 %v544_v0, %v513_v62  ;;  %v543_v8 = vld [vmem:[%s2581_s4 + $0x338] sm:$0x7] }
  0x69   : > { %2074 = vmatpush1.bf16.msk.msra.mxu0 %vm2577_vm2, %v2072_v49  ;;  %v453_v9 = vld [vmem:[%s2581_s4 + $0x68] sm:$0xff]  ;;  %v484_v10 = vld [vmem:[%s2581_s4 + $0x160] sm:$0xff]  ;;  %v455_v11 = vld [vmem:[%s2581_s4 + $0x78] sm:$0xff]  ;;  %v2092_v13 = vpack.c.bf16 %v541_v5, %v510_v4  ;;  %v2102_v14 = vpack.c.bf16 %v543_v8, %v512_v6 }
  0x6a   : > { %2084 = vmatpush1.bf16.msk.msra.mxu1 %vm2577_vm2, %v2082_v52  ;;  %2086 = vmatprep.subr.bf16.mxu0 %v2085_v53  ;;  %v486_v12 = vld [vmem:[%s2581_s4 + $0x170] sm:$0xff]  ;;  %v2105_v15 = vpack.c.bf16 %v484_v10, %v453_v9  ;;  %v452_v16 = vld [vmem:[%s2581_s4 + $0x60] sm:$0xff]  ;;  %v483_v17 = vld [vmem:[%s2581_s4 + $0x158] sm:$0xff] }
  0x6b   : > { %2096 = vmatprep.subr.bf16.mxu1 %v2095_v57  ;;  %v454_v18 = vld [vmem:[%s2581_s4 + $0x70] sm:$0xff]  ;;  %v2115_v19 = vpack.c.bf16 %v486_v12, %v455_v11  ;;  %v485_v20 = vld [vmem:[%s2581_s4 + $0x168] sm:$0xff]  ;;  %v515_v21 = vld [vmem:[%s2581_s4 + $0x258] sm:$0xff]  ;;  %v2107_v25 = vpack.c.bf16 %v483_v17, %v452_v16 }
  0x6c   : > { %1987 = vmatmul.mubr.msk.f32.vlgmr.msra.gmra.mrb[2].mxu0 %vm570_vm3, %v2606_v26  ;;  %v546_v22 = vld [vmem:[%s2581_s4 + $0x350] sm:$0x7]  ;;  %v517_v23 = vld [vmem:[%s2581_s4 + $0x268] sm:$0xff]  ;;  %v548_v24 = vld [vmem:[%s2581_s4 + $0x360] sm:$0x7]  ;;  %v2117_v27 = vpack.c.bf16 %v485_v20, %v454_v18 }
  0x6d   : > { %2088 = vmatpush1.bf16.msra.mxu0 %v2087_v1  ;;  %1990 = vmatmul.mubr.msk.f32.vlgmr.msra.gmra.mrb[2].mxu1 %vm570_vm3, %v2606_v26  ;;  %v2109_v28 = vpack.c.bf16 %v546_v22, %v515_v21  ;;  %v514_v29 = vld [vmem:[%s2581_s4 + $0x250] sm:$0xff]  ;;  %v545_v30 = vld [vmem:[%s2581_s4 + $0x348] sm:$0x7]  ;;  %v516_v31 = vld [vmem:[%s2581_s4 + $0x260] sm:$0xff]  ;;  %v2119_v32 = vpack.c.bf16 %v548_v24, %v517_v23 }
  0x6e   : > { %2098 = vmatpush1.bf16.msra.mxu1 %v2097_v2  ;;  %2091 = vmatprep.subr.msk.bf16.mxu0 %vm2577_vm2, %v2089_v3  ;;  %v547_v33 = vld [vmem:[%s2581_s4 + $0x358] sm:$0x7]  ;;  %v457_v34 = vld [vmem:[%s2581_s4 + $0x88] sm:$0xff]  ;;  %v488_v35 = vld [vmem:[%s2581_s4 + $0x180] sm:$0xff]  ;;  %v2112_v38 = vpack.c.bf16 %v545_v30, %v514_v29 }
  0x6f   : > { %2101 = vmatprep.subr.msk.bf16.mxu1 %vm2577_vm2, %v2099_v7  ;;  %1016 = vmatprep.mubr.f32.mxu0 %v2258_v60  ;;  %v459_v36 = vld [vmem:[%s2581_s4 + $0x98] sm:$0xff]  ;;  %v490_v37 = vld [vmem:[%s2581_s4 + $0x190] sm:$0xff]  ;;  %v2122_v39 = vpack.c.bf16 %v547_v33, %v516_v31  ;;  %v2125_v40 = vpack.c.bf16 %v488_v35, %v457_v34  ;;  %v456_v41 = vld [vmem:[%s2581_s4 + $0x80] sm:$0xff] }
  0x70   : > { %1087 = vmatprep.mubr.f32.mxu1 %v2258_v60  ;;  %v487_v42 = vld [vmem:[%s2581_s4 + $0x178] sm:$0xff]  ;;  %v458_v43 = vld [vmem:[%s2581_s4 + $0x90] sm:$0xff]  ;;  %v2135_v44 = vpack.c.bf16 %v490_v37, %v459_v36  ;;  %v489_v45 = vld [vmem:[%s2581_s4 + $0x188] sm:$0xff] }
  0x71   : > { %2094 = vmatpush1.bf16.msk.msra.mxu0 %vm2577_vm2, %v2092_v13  ;;  %v519_v46 = vld [vmem:[%s2581_s4 + $0x278] sm:$0xff]  ;;  %v550_v47 = vld [vmem:[%s2581_s4 + $0x370] sm:$0x7]  ;;  %v521_v48 = vld [vmem:[%s2581_s4 + $0x288] sm:$0xff]  ;;  %v2127_v50 = vpack.c.bf16 %v487_v42, %v456_v41  ;;  %v2137_v51 = vpack.c.bf16 %v489_v45, %v458_v43 }
  0x72   : > { %2104 = vmatpush1.bf16.msk.msra.mxu1 %vm2577_vm2, %v2102_v14  ;;  %2106 = vmatprep.subr.bf16.mxu0 %v2105_v15  ;;  %v552_v49 = vld [vmem:[%s2581_s4 + $0x380] sm:$0x7]  ;;  %v2129_v52 = vpack.c.bf16 %v550_v47, %v519_v46  ;;  %v518_v53 = vld [vmem:[%s2581_s4 + $0x270] sm:$0xff]  ;;  %v549_v54 = vld [vmem:[%s2581_s4 + $0x368] sm:$0x7] }
  0x73   : > { %2116 = vmatprep.subr.bf16.mxu1 %v2115_v19  ;;  %v520_v55 = vld [vmem:[%s2581_s4 + $0x280] sm:$0xff]  ;;  %v2139_v56 = vpack.c.bf16 %v552_v49, %v521_v48  ;;  %v551_v57 = vld [vmem:[%s2581_s4 + $0x378] sm:$0x7]  ;;  %v461_v58 = vld [vmem:[%s2581_s4 + $0xa8] sm:$0xff]  ;;  %v2132_v0 = vpack.c.bf16 %v549_v54, %v518_v53 }
  0x74   : > { %1993 = vmatmul.mubr.msk.f32.vlgmr.msra.gmra.mrb[4].mxu0 %vm570_vm3, %v2606_v26  ;;  %v492_v59 = vld [vmem:[%s2581_s4 + $0x1a0] sm:$0xff]  ;;  %v463_v61 = vld [vmem:[%s2581_s4 + $0xb8] sm:$0xff]  ;;  %v494_v62 = vld [vmem:[%s2581_s4 + $0x1b0] sm:$0xff]  ;;  %v2142_v1 = vpack.c.bf16 %v551_v57, %v520_v55 }
  0x75   : > { %2108 = vmatpush1.bf16.msra.mxu0 %v2107_v25  ;;  %1996 = vmatmul.mubr.msk.f32.vlgmr.msra.gmra.mrb[4].mxu1 %vm570_vm3, %v2606_v26  ;;  %v2145_v2 = vpack.c.bf16 %v492_v59, %v461_v58  ;;  %v460_v3 = vld [vmem:[%s2581_s4 + $0xa0] sm:$0xff]  ;;  %v491_v4 = vld [vmem:[%s2581_s4 + $0x198] sm:$0xff]  ;;  %v462_v5 = vld [vmem:[%s2581_s4 + $0xb0] sm:$0xff]  ;;  %v2155_v6 = vpack.c.bf16 %v494_v62, %v463_v61  ;;  %v2261_v62 = vmov 0.0|0.0  }
  0x76   : > { %2118 = vmatpush1.bf16.msra.mxu1 %v2117_v27  ;;  %2111 = vmatprep.subr.msk.bf16.mxu0 %vm2577_vm2, %v2109_v28  ;;  %v493_v7 = vld [vmem:[%s2581_s4 + $0x1a8] sm:$0xff]  ;;  %v523_v8 = vld [vmem:[%s2581_s4 + $0x298] sm:$0xff]  ;;  %v554_v9 = vld [vmem:[%s2581_s4 + $0x390] sm:$0x7]  ;;  %v2147_v12 = vpack.c.bf16 %v491_v4, %v460_v3 }
  0x77   : > { %2121 = vmatprep.subr.msk.bf16.mxu1 %vm2577_vm2, %v2119_v32  ;;  %1158 = vmatprep.mubr.f32.mxu0 %v2258_v60  ;;  %v525_v10 = vld [vmem:[%s2581_s4 + $0x2a8] sm:$0xff]  ;;  %v556_v11 = vld [vmem:[%s2581_s4 + $0x3a0] sm:$0x7]  ;;  %v2157_v13 = vpack.c.bf16 %v493_v7, %v462_v5  ;;  %v2149_v14 = vpack.c.bf16 %v554_v9, %v523_v8  ;;  %v522_v15 = vld [vmem:[%s2581_s4 + $0x290] sm:$0xff] }
  0x78   : > { %1229 = vmatprep.mubr.f32.mxu1 %v2258_v60  ;;  %v553_v16 = vld [vmem:[%s2581_s4 + $0x388] sm:$0x7]  ;;  %v524_v17 = vld [vmem:[%s2581_s4 + $0x2a0] sm:$0xff]  ;;  %v2159_v18 = vpack.c.bf16 %v556_v11, %v525_v10  ;;  %v555_v19 = vld [vmem:[%s2581_s4 + $0x398] sm:$0x7] }
  0x79   : > { %2114 = vmatpush1.bf16.msk.msra.mxu0 %vm2577_vm2, %v2112_v38  ;;  %v465_v20 = vld [vmem:[%s2581_s4 + $0xc8] sm:$0xff]  ;;  %v496_v21 = vld [vmem:[%s2581_s4 + $0x1c0] sm:$0xff]  ;;  %v467_v22 = vld [vmem:[%s2581_s4 + $0xd8] sm:$0xff]  ;;  %v2152_v24 = vpack.c.bf16 %v553_v16, %v522_v15  ;;  %v2162_v25 = vpack.c.bf16 %v555_v19, %v524_v17 }
  0x7a   : > { %2124 = vmatpush1.bf16.msk.msra.mxu1 %vm2577_vm2, %v2122_v39  ;;  %2126 = vmatprep.subr.bf16.mxu0 %v2125_v40  ;;  %v498_v23 = vld [vmem:[%s2581_s4 + $0x1d0] sm:$0xff]  ;;  %v2165_v27 = vpack.c.bf16 %v496_v21, %v465_v20  ;;  %v464_v28 = vld [vmem:[%s2581_s4 + $0xc0] sm:$0xff]  ;;  %v495_v29 = vld [vmem:[%s2581_s4 + $0x1b8] sm:$0xff] }
  0x7b   : > { %2136 = vmatprep.subr.bf16.mxu1 %v2135_v44  ;;  %v466_v30 = vld [vmem:[%s2581_s4 + $0xd0] sm:$0xff]  ;;  %v2175_v31 = vpack.c.bf16 %v498_v23, %v467_v22  ;;  %v497_v32 = vld [vmem:[%s2581_s4 + $0x1c8] sm:$0xff]  ;;  %v527_v33 = vld [vmem:[%s2581_s4 + $0x2b8] sm:$0xff]  ;;  %v2167_v37 = vpack.c.bf16 %v495_v29, %v464_v28 }
  0x7c   : > { %1999 = vmatmul.mubr.msk.f32.vlgmr.msra.gmra.mrb[6].mxu0 %vm570_vm3, %v2606_v26  ;;  %v558_v34 = vld [vmem:[%s2581_s4 + $0x3b0] sm:$0x7]  ;;  %v529_v35 = vld [vmem:[%s2581_s4 + $0x2c8] sm:$0xff]  ;;  %v560_v36 = vld [vmem:[%s2581_s4 + $0x3c0] sm:$0x7]  ;;  %v2177_v38 = vpack.c.bf16 %v497_v32, %v466_v30 }
  0x7d   : > { %2128 = vmatpush1.bf16.msra.mxu0 %v2127_v50  ;;  %2002 = vmatmul.mubr.msk.f32.vlgmr.msra.gmra.mrb[6].mxu1 %vm570_vm3, %v2606_v26  ;;  %v2169_v39 = vpack.c.bf16 %v558_v34, %v527_v33  ;;  %v526_v40 = vld [vmem:[%s2581_s4 + $0x2b0] sm:$0xff]  ;;  %v557_v41 = vld [vmem:[%s2581_s4 + $0x3a8] sm:$0x7]  ;;  %v528_v42 = vld [vmem:[%s2581_s4 + $0x2c0] sm:$0xff]  ;;  %v2179_v43 = vpack.c.bf16 %v560_v36, %v529_v35 }
  0x7e   : > { %2138 = vmatpush1.bf16.msra.mxu1 %v2137_v51  ;;  %2131 = vmatprep.subr.msk.bf16.mxu0 %vm2577_vm2, %v2129_v52  ;;  %v559_v44 = vld [vmem:[%s2581_s4 + $0x3b8] sm:$0x7]  ;;  %v469_v45 = vld [vmem:[%s2581_s4 + $0xe8] sm:$0xff]  ;;  %v500_v46 = vld [vmem:[%s2581_s4 + $0x1e0] sm:$0xff]  ;;  %v2172_v47 = vpack.c.bf16 %v557_v41, %v526_v40 }
  0x7f   : > { %2141 = vmatprep.subr.msk.bf16.mxu1 %vm2577_vm2, %v2139_v56  ;;  %1300 = vmatprep.mubr.f32.mxu0 %v2258_v60  ;;  %v2182_v48 = vpack.c.bf16 %v559_v44, %v528_v42  ;;  %v2185_v49 = vpack.c.bf16 %v500_v46, %v469_v45  ;;  %v468_v50 = vld [vmem:[%s2581_s4 + $0xe0] sm:$0xff]  ;;  %v499_v51 = vld [vmem:[%s2581_s4 + $0x1d8] sm:$0xff]  ;;  %v470_v52 = vld [vmem:[%s2581_s4 + $0xf0] sm:$0xff] }
  0x80   : > { %1371 = vmatprep.mubr.f32.mxu1 %v2258_v60  ;;  %v501_v53 = vld [vmem:[%s2581_s4 + $0x1e8] sm:$0xff]  ;;  %v531_v54 = vld [vmem:[%s2581_s4 + $0x2d8] sm:$0xff]  ;;  %v562_v55 = vld [vmem:[%s2581_s4 + $0x3d0] sm:$0x7]  ;;  %v2187_v56 = vpack.c.bf16 %v499_v51, %v468_v50 }
  0x81   : > { %2134 = vmatpush1.bf16.msk.msra.mxu0 %vm2577_vm2, %v2132_v0  ;;  %v2196_v57 = vpack.c.bf16 %v501_v53, %v470_v52  ;;  %v2189_v58 = vpack.c.bf16 %v562_v55, %v531_v54  ;;  %v530_v59 = vld [vmem:[%s2581_s4 + $0x2d0] sm:$0xff]  ;;  %v561_v61 = vld [vmem:[%s2581_s4 + $0x3c8] sm:$0x7]  ;;  %v532_v0 = vld [vmem:[%s2581_s4 + $0x2e0] sm:$0xff] }
  0x82   : > { %2144 = vmatpush1.bf16.msk.msra.mxu1 %vm2577_vm2, %v2142_v1  ;;  %2146 = vmatprep.subr.bf16.mxu0 %v2145_v2  ;;  %v563_v1 = vld [vmem:[%s2581_s4 + $0x3d8] sm:$0x7]  ;;  %v2192_v2 = vpack.c.bf16 %v561_v61, %v530_v59 }
  0x83   : > { %2156 = vmatprep.subr.bf16.mxu1 %v2155_v6  ;;  %v2199_v3 = vpack.c.bf16 %v563_v1, %v532_v0 }
  0x84   : > { %2005 = vmatmul.mubr.msk.f32.vlgmr.msra.gmra.mrb[8].mxu0 %vm570_vm3, %v2606_v26 }
  0x85   : > { %2148 = vmatpush1.bf16.msra.mxu0 %v2147_v12  ;;  %2008 = vmatmul.mubr.msk.f32.vlgmr.msra.gmra.mrb[8].mxu1 %vm570_vm3, %v2606_v26 }
  0x86   : > { %2158 = vmatpush1.bf16.msra.mxu1 %v2157_v13  ;;  %2151 = vmatprep.subr.msk.bf16.mxu0 %vm2577_vm2, %v2149_v14 }
  0x87   : > { %2161 = vmatprep.subr.msk.bf16.mxu1 %vm2577_vm2, %v2159_v18  ;;  %1442 = vmatprep.mubr.f32.mxu0 %v2258_v60 }
  0x88   : > { %1513 = vmatprep.mubr.f32.mxu1 %v2258_v60 }
  0x89   : > { %2154 = vmatpush1.bf16.msk.msra.mxu0 %vm2577_vm2, %v2152_v24 }
  0x8a   : > { %2164 = vmatpush1.bf16.msk.msra.mxu1 %vm2577_vm2, %v2162_v25  ;;  %2166 = vmatprep.subr.bf16.mxu0 %v2165_v27 }
  0x8b   : > { %2176 = vmatprep.subr.bf16.mxu1 %v2175_v31 }
  0x8c   : > { %2011 = vmatmul.mubr.msk.f32.vlgmr.msra.gmra.mrb[10].mxu0 %vm570_vm3, %v2606_v26 }
  0x8d   : > { %2168 = vmatpush1.bf16.msra.mxu0 %v2167_v37  ;;  %2014 = vmatmul.mubr.msk.f32.vlgmr.msra.gmra.mrb[10].mxu1 %vm570_vm3, %v2606_v26 }
  0x8e   : > { %2178 = vmatpush1.bf16.msra.mxu1 %v2177_v38  ;;  %2171 = vmatprep.subr.msk.bf16.mxu0 %vm2577_vm2, %v2169_v39 }
  0x8f   : > { %2181 = vmatprep.subr.msk.bf16.mxu1 %vm2577_vm2, %v2179_v43  ;;  %1584 = vmatprep.mubr.f32.mxu0 %v2258_v60 }
  0x90   : > { %1655 = vmatprep.mubr.f32.mxu1 %v2258_v60 }
  0x91   : > { %2174 = vmatpush1.bf16.msk.msra.mxu0 %vm2577_vm2, %v2172_v47 }
  0x92   : > { %2184 = vmatpush1.bf16.msk.msra.mxu1 %vm2577_vm2, %v2182_v48  ;;  %2186 = vmatprep.subr.bf16.mxu0 %v2185_v49 }
  0x93   : > { %2195 = vmatprep.subr.bf16.mxu1 %v2261_v62 }
  0x94   : > { %2017 = vmatmul.mubr.msk.f32.vlgmr.msra.gmra.mrb[12].mxu0 %vm570_vm3, %v2606_v26 }
  0x95   : > { %2188 = vmatpush1.bf16.msra.mxu0 %v2187_v56  ;;  %2020 = vmatmul.mubr.msk.f32.vlgmr.msra.gmra.mrb[12].mxu1 %vm570_vm3, %v2606_v26 }
  0x96   : > { %2197 = vmatpush3.bf16.msra.mxu1 %v2196_v57  ;;  %2191 = vmatprep.subr.msk.bf16.mxu0 %vm2577_vm2, %v2189_v58 }
  0x97   : > { %2198 = vmatprep.subr.bf16.mxu1 %v2261_v62  ;;  %1726 = vmatprep.mubr.f32.mxu0 %v2258_v60 }
  0x98   : > { %2042 = vmatprep.mubr.msk.f32.mxu1 %vm2262_vm4, %v2258_v60 }
  0x99   : > { %2194 = vmatpush1.bf16.msk.msra.mxu0 %vm2577_vm2, %v2192_v2 }
  0x9a   : > { %2201 = vmatpush3.bf16.msk.msra.mxu1 %vm2577_vm2, %v2199_v3 }
  0x9c   : > { %2023 = vmatmul.mubr.msk.f32.vlgmr.msra.gmra.mrb[14].mxu0 %vm570_vm3, %v2606_v26 }
  0x9d   : > { %2043 = vmatmul.mubr.msk.f32.vlgmr.msra.gmra.mrb[14].mxu1 %vm570_vm3, %v2606_v26 }
  0xd6   : > { %v2822_v4 = vpop.permute.xlu0 %567 }
 0x137   : > { %v734_v5 = vpop.f32.mrb[0].mxu0 }
 0x138   : > { %v735_v60 = vadd.f32 %v734_v5, %v2822_v4  ;;  %v736_v6 = vpop.f32.mrb[1].mxu0  ;;  %v805_v7 = vpop.f32.mrb[0].mxu1 }
 0x139   : > { %v737_v63 = vadd.f32 %v736_v6, %v2822_v4  ;;  %v806_v8 = vadd.f32 %v805_v7, %v2822_v4  ;;  %v807_v9 = vpop.f32.mrb[1].mxu1 }
 0x13a   : > { %v1803_v10 = vmax.f32 %v735_v60, 0.0  ;;  %v808_v26 = vadd.f32 %v807_v9, %v2822_v4 }
 0x13b   : > { %v1804_v11 = vmax.f32 %v737_v63, 0.0  ;;  %v1805_v12 = vmax.f32 %v806_v8, 0.0 }
 0x13c   : > { %v1806_v13 = vmax.f32 %v808_v26, 0.0 }
 0x13d   : > { %v1864_v14 = vcombine.low %v1803_v10, %v1804_v11 }
 0x13e   : > { %v1865_v15 = vcombine.low %v1805_v12, %v1806_v13 }
 0x13f   : > { %1894 = vst [vmem:[%s2831_s11] sm:$0xff] %v1864_v14  ;;  %v876_v16 = vpop.f32.mrb[2].mxu0 }
 0x140   : > { %1895 = vst [vmem:[%s2831_s11 + $0x8] sm:$0xff] %v1865_v15  ;;  %v877_v17 = vadd.f32 %v876_v16, %v2822_v4  ;;  %v878_v18 = vpop.f32.mrb[3].mxu0  ;;  %v947_v19 = vpop.f32.mrb[2].mxu1 }
 0x141   : > { %v879_v20 = vadd.f32 %v878_v18, %v2822_v4  ;;  %v948_v21 = vadd.f32 %v947_v19, %v2822_v4  ;;  %v949_v22 = vpop.f32.mrb[3].mxu1 }
 0x142   : > { %v1807_v23 = vmax.f32 %v877_v17, 0.0  ;;  %v950_v24 = vadd.f32 %v949_v22, %v2822_v4 }
 0x143   : > { %v1808_v25 = vmax.f32 %v879_v20, 0.0  ;;  %v1809_v27 = vmax.f32 %v948_v21, 0.0 }
 0x144   : > { %v1810_v28 = vmax.f32 %v950_v24, 0.0 }
 0x145   : > { %v1866_v29 = vcombine.low %v1807_v23, %v1808_v25 }
 0x146   : > { %v1867_v30 = vcombine.low %v1809_v27, %v1810_v28 }
 0x147   : > { %1896 = vst [vmem:[%s2831_s11 + $0x10] sm:$0xff] %v1866_v29  ;;  %v1018_v31 = vpop.f32.mrb[4].mxu0 }
 0x148   : > { %1897 = vst [vmem:[%s2831_s11 + $0x18] sm:$0xff] %v1867_v30  ;;  %v1019_v32 = vadd.f32 %v1018_v31, %v2822_v4  ;;  %v1020_v33 = vpop.f32.mrb[5].mxu0  ;;  %v1089_v34 = vpop.f32.mrb[4].mxu1 }
 0x149   : > { %v1021_v35 = vadd.f32 %v1020_v33, %v2822_v4  ;;  %v1090_v36 = vadd.f32 %v1089_v34, %v2822_v4  ;;  %v1091_v37 = vpop.f32.mrb[5].mxu1 }
 0x14a   : > { %v1811_v38 = vmax.f32 %v1019_v32, 0.0  ;;  %v1092_v39 = vadd.f32 %v1091_v37, %v2822_v4 }
 0x14b   : > { %v1812_v40 = vmax.f32 %v1021_v35, 0.0  ;;  %v1813_v41 = vmax.f32 %v1090_v36, 0.0 }
 0x14c   : > { %v1814_v42 = vmax.f32 %v1092_v39, 0.0 }
 0x14d   : > { %v1868_v43 = vcombine.low %v1811_v38, %v1812_v40 }
 0x14e   : > { %v1869_v44 = vcombine.low %v1813_v41, %v1814_v42 }
 0x14f   : > { %1898 = vst [vmem:[%s2831_s11 + $0x20] sm:$0xff] %v1868_v43  ;;  %v1160_v45 = vpop.f32.mrb[6].mxu0 }
 0x150   : > { %1899 = vst [vmem:[%s2831_s11 + $0x28] sm:$0xff] %v1869_v44  ;;  %v1161_v46 = vadd.f32 %v1160_v45, %v2822_v4  ;;  %v1162_v47 = vpop.f32.mrb[7].mxu0  ;;  %v1231_v48 = vpop.f32.mrb[6].mxu1 }
 0x151   : > { %v1163_v49 = vadd.f32 %v1162_v47, %v2822_v4  ;;  %v1232_v50 = vadd.f32 %v1231_v48, %v2822_v4  ;;  %v1233_v51 = vpop.f32.mrb[7].mxu1 }
 0x152   : > { %v1815_v52 = vmax.f32 %v1161_v46, 0.0  ;;  %v1234_v53 = vadd.f32 %v1233_v51, %v2822_v4 }
 0x153   : > { %v1816_v54 = vmax.f32 %v1163_v49, 0.0  ;;  %v1817_v55 = vmax.f32 %v1232_v50, 0.0 }
 0x154   : > { %v1818_v56 = vmax.f32 %v1234_v53, 0.0 }
 0x155   : > { %v1870_v57 = vcombine.low %v1815_v52, %v1816_v54 }
 0x156   : > { %v1871_v58 = vcombine.low %v1817_v55, %v1818_v56 }
 0x157   : > { %1900 = vst [vmem:[%s2831_s11 + $0x30] sm:$0xff] %v1870_v57  ;;  %v1302_v59 = vpop.f32.mrb[8].mxu0 }
 0x158   : > { %1901 = vst [vmem:[%s2831_s11 + $0x38] sm:$0xff] %v1871_v58  ;;  %v1303_v61 = vadd.f32 %v1302_v59, %v2822_v4  ;;  %v1304_v62 = vpop.f32.mrb[9].mxu0  ;;  %v1373_v0 = vpop.f32.mrb[8].mxu1 }
 0x159   : > { %v1305_v1 = vadd.f32 %v1304_v62, %v2822_v4  ;;  %v1374_v2 = vadd.f32 %v1373_v0, %v2822_v4  ;;  %v1375_v3 = vpop.f32.mrb[9].mxu1 }
 0x15a   : > { %v1819_v5 = vmax.f32 %v1303_v61, 0.0  ;;  %v1376_v60 = vadd.f32 %v1375_v3, %v2822_v4 }
 0x15b   : > { %v1820_v6 = vmax.f32 %v1305_v1, 0.0  ;;  %v1821_v7 = vmax.f32 %v1374_v2, 0.0 }
 0x15c   : > { %v1822_v63 = vmax.f32 %v1376_v60, 0.0 }
 0x15d   : > { %v1872_v8 = vcombine.low %v1819_v5, %v1820_v6 }
 0x15e   : > { %v1873_v9 = vcombine.low %v1821_v7, %v1822_v63 }
 0x15f   : > { %1902 = vst [vmem:[%s2831_s11 + $0x40] sm:$0xff] %v1872_v8  ;;  %v1444_v10 = vpop.f32.mrb[10].mxu0 }
 0x160   : > { %1903 = vst [vmem:[%s2831_s11 + $0x48] sm:$0xff] %v1873_v9  ;;  %v1445_v26 = vadd.f32 %v1444_v10, %v2822_v4  ;;  %v1446_v11 = vpop.f32.mrb[11].mxu0  ;;  %v1515_v12 = vpop.f32.mrb[10].mxu1 }
 0x161   : > { %v1447_v13 = vadd.f32 %v1446_v11, %v2822_v4  ;;  %v1516_v14 = vadd.f32 %v1515_v12, %v2822_v4  ;;  %v1517_v15 = vpop.f32.mrb[11].mxu1 }
 0x162   : > { %v1823_v16 = vmax.f32 %v1445_v26, 0.0  ;;  %v1518_v17 = vadd.f32 %v1517_v15, %v2822_v4 }
 0x163   : > { %v1824_v18 = vmax.f32 %v1447_v13, 0.0  ;;  %v1825_v19 = vmax.f32 %v1516_v14, 0.0 }
 0x164   : > { %v1826_v20 = vmax.f32 %v1518_v17, 0.0 }
 0x165   : > { %v1874_v21 = vcombine.low %v1823_v16, %v1824_v18 }
 0x166   : > { %v1875_v22 = vcombine.low %v1825_v19, %v1826_v20 }
 0x167   : > { %1904 = vst [vmem:[%s2831_s11 + $0x50] sm:$0xff] %v1874_v21  ;;  %v1586_v23 = vpop.f32.mrb[12].mxu0 }
 0x168   : > { %1905 = vst [vmem:[%s2831_s11 + $0x58] sm:$0xff] %v1875_v22  ;;  %v1587_v24 = vadd.f32 %v1586_v23, %v2822_v4  ;;  %v1588_v25 = vpop.f32.mrb[13].mxu0  ;;  %v1657_v27 = vpop.f32.mrb[12].mxu1 }
 0x169   : > { %v1589_v28 = vadd.f32 %v1588_v25, %v2822_v4  ;;  %v1658_v29 = vadd.f32 %v1657_v27, %v2822_v4  ;;  %v1659_v30 = vpop.f32.mrb[13].mxu1 }
 0x16a   : > { %v1827_v31 = vmax.f32 %v1587_v24, 0.0  ;;  %v1660_v32 = vadd.f32 %v1659_v30, %v2822_v4 }
 0x16b   : > { %v1828_v33 = vmax.f32 %v1589_v28, 0.0  ;;  %v1829_v34 = vmax.f32 %v1658_v29, 0.0 }
 0x16c   : > { %v1830_v35 = vmax.f32 %v1660_v32, 0.0 }
 0x16d   : > { %v1876_v36 = vcombine.low %v1827_v31, %v1828_v33 }
 0x16e   : > { %v1877_v37 = vcombine.low %v1829_v34, %v1830_v35 }
 0x16f   : > { %1906 = vst [vmem:[%s2831_s11 + $0x60] sm:$0xff] %v1876_v36  ;;  %v1728_v38 = vpop.f32.mrb[14].mxu0 }
 0x170   : > { %1907 = vst [vmem:[%s2831_s11 + $0x68] sm:$0xff] %v1877_v37  ;;  %v1729_v39 = vadd.f32 %v1728_v38, %v2822_v4  ;;  %v1730_v40 = vpop.f32.mrb[15].mxu0  ;;  %v1799_v41 = vpop.f32.mrb[14].mxu1 }
 0x171   : > { %v1731_v42 = vadd.f32 %v1730_v40, %v2822_v4  ;;  %v1800_v43 = vadd.f32 %v1799_v41, %v2822_v4  ;;  %v2044_v44 = vpop.f32.mrb[15].mxu1 }
 0x172   : > { %v1831_v45 = vmax.f32 %v1729_v39, 0.0 }
 0x173   : > { %v1832_v46 = vmax.f32 %v1731_v42, 0.0  ;;  %v1833_v47 = vmax.f32 %v1800_v43, 0.0 }
 0x175   : > { %v1878_v48 = vcombine.low %v1831_v45, %v1832_v46  ;;  %1909 = vst [vmem:[%s2831_s11 + $0x78] sm:$0xf] %v1833_v47 }
 0x177   : > { %1908 = vst [vmem:[%s2831_s11 + $0x70] sm:$0xff] %v1878_v48 }
 0x178 PF: > { %p10_p9 = scmp.ge.s32.totalorder %s2300_s16, 4   ;;  %s2892_s12 = smov %s2252_s13 }
 0x179   : > { %s2893_s13 = smov %s2309_s19  ;;  %s2894_s14 = smov %s2300_s16 }
 0x17a   :  { %12 = sbr.rel (!%p10_p9) target bundleno = 2 (0x2), region = 90 }

// kernel: cnn_forward.7
= control target key start
LH: loop header
LB: loop body
LE: loop exit
PB: predicated region body
PF: predicated region fallthrough
CT: control target
= control target key end

     0   :  { %s840_s12 = smov 0   ;;  %s842_s13 = smov 0   ;;  %s1040_s0 = inlined_call_operand.vmem [shape: f32[8,36], index: 0, kind: input, shape index: {}]   ;;  %s1041_s1 = inlined_call_operand.vmem [shape: f32[36,2048], index: 1, kind: input, shape index: {}]   ;;  %s1042_s2 = inlined_call_operand.vmem [shape: f32[8,1], index: 2, kind: input, shape index: {}]   ;;  %s1043_s3 = inlined_call_operand.vmem [shape: f32[8,2048], index: 3, kind: output, shape index: {}]  }
   0x1   :  { %s844_s14 = smov 0  }
   0x2 LB: > { %s709_s15 = sadd.s32 4294967295, %s816_s14   ;;  %s857_s16 = sadd.s32 1, %s816_s14   ;;  %s816_s14 = sphi %s844_s14, %s1046_s14   ;;  %s812_s13 = sphi %s842_s13, %s1045_s13   ;;  %s808_s12 = sphi %s840_s12, %s1044_s12  }
   0x3   : > { %s38_s17 = ssub.s32 %s816_s14, %s857_s16  ;;  %s41_s18 = sadd.s32 1, %s812_s13 }
   0x4   : > { %p39_p0 = scmp.eq.s32.totalorder %s38_s17, 0  ;;  %p48_p1 = scmp.ne.s32.totalorder %s812_s13, %s808_s12 }
   0x5   : > { %p49_p2 = scmp.eq.s32.totalorder %s816_s14, 0  ;;  %p712_p4 = scmp.ge.s32.totalorder %s816_s14, 2 }
   0x6   : > { %s866_s19 = scalar_select %p39_p0, %s812_s13, %s41_s18  }
   0x7   : > { %p50_p3 = por %p49_p2, %p48_p1  ;;  %127 = sbr.rel (%p712_p4) target bundleno = 39 (0x27), region = 24 }
   0xe   : > { %130 = sbr.rel (!%p50_p3) target bundleno = 39 (0x27), region = 28  ;;  %s132_s20 = sand.u32 (%p50_p3), 1, %s812_s13  }
   0xf   : > { %s732_s21 = sshll.u32 (%p50_p3), %s816_s14, 6  ;;  %s765_s22 = smul.u32 (%p50_p3), 320, %s132_s20 }
  0x10   : > { %s874_s25 = scalar_lea.vmem (%p50_p3), %s1041_s1, %s732_s21 }
  0x11   : > { %v150_v0 = vld [vmem:[%s874_s25] sm:$0xff] (%p50_p3)  ;;  %v152_v1 = vld [vmem:[%s874_s25 + $0x8] sm:$0xff] (%p50_p3)  ;;  %v154_v2 = vld [vmem:[%s874_s25 + $0x10] sm:$0xff] (%p50_p3)  ;;  %s882_s26 = scalar_lea.vmem (%p50_p3), [#allocation2], %s765_s22 }
  0x12   : > { %v156_v3 = vld [vmem:[%s874_s25 + $0x18] sm:$0xff] (%p50_p3)  ;;  %v158_v4 = vld [vmem:[%s874_s25 + $0x20] sm:$0xff] (%p50_p3)  ;;  %v160_v5 = vld [vmem:[%s874_s25 + $0x28] sm:$0xff] (%p50_p3)  ;;  %151 = vst [vmem:[%s882_s26] sm:$0xff] (%p50_p3), %v150_v0 }
  0x13   : > { %153 = vst [vmem:[%s882_s26 + $0x8] sm:$0xff] (%p50_p3), %v152_v1  ;;  %155 = vst [vmem:[%s882_s26 + $0x10] sm:$0xff] (%p50_p3), %v154_v2  ;;  %v162_v6 = vld [vmem:[%s874_s25 + $0x30] sm:$0xff] (%p50_p3)  ;;  %v164_v7 = vld [vmem:[%s874_s25 + $0x38] sm:$0xff] (%p50_p3) }
  0x14   : > { %157 = vst [vmem:[%s882_s26 + $0x18] sm:$0xff] (%p50_p3), %v156_v3  ;;  %159 = vst [vmem:[%s882_s26 + $0x20] sm:$0xff] (%p50_p3), %v158_v4  ;;  %v166_v8 = vld [vmem:[%s874_s25 + $0x80] sm:$0xff] (%p50_p3)  ;;  %v168_v9 = vld [vmem:[%s874_s25 + $0x88] sm:$0xff] (%p50_p3) }
  0x15   : > { %161 = vst [vmem:[%s882_s26 + $0x28] sm:$0xff] %v160_v5  ;;  %163 = vst [vmem:[%s882_s26 + $0x30] sm:$0xff] %v162_v6  ;;  %v170_v10 = vld [vmem:[%s874_s25 + $0x90] sm:$0xff]  ;;  %v172_v11 = vld [vmem:[%s874_s25 + $0x98] sm:$0xff] }
  0x16   : > { %165 = vst [vmem:[%s882_s26 + $0x38] sm:$0xff] %v164_v7  ;;  %167 = vst [vmem:[%s882_s26 + $0x40] sm:$0xff] %v166_v8  ;;  %v174_v12 = vld [vmem:[%s874_s25 + $0xa0] sm:$0xff]  ;;  %v176_v13 = vld [vmem:[%s874_s25 + $0xa8] sm:$0xff] }
  0x17   : > { %169 = vst [vmem:[%s882_s26 + $0x48] sm:$0xff] %v168_v9  ;;  %171 = vst [vmem:[%s882_s26 + $0x50] sm:$0xff] %v170_v10  ;;  %v178_v14 = vld [vmem:[%s874_s25 + $0xb0] sm:$0xff]  ;;  %v180_v15 = vld [vmem:[%s874_s25 + $0xb8] sm:$0xff] }
  0x18   : > { %173 = vst [vmem:[%s882_s26 + $0x58] sm:$0xff] %v172_v11  ;;  %175 = vst [vmem:[%s882_s26 + $0x60] sm:$0xff] %v174_v12  ;;  %v182_v16 = vld [vmem:[%s874_s25 + $0x100] sm:$0xff]  ;;  %v184_v17 = vld [vmem:[%s874_s25 + $0x108] sm:$0xff] }
  0x19   : > { %177 = vst [vmem:[%s882_s26 + $0x68] sm:$0xff] %v176_v13  ;;  %179 = vst [vmem:[%s882_s26 + $0x70] sm:$0xff] %v178_v14  ;;  %v186_v18 = vld [vmem:[%s874_s25 + $0x110] sm:$0xff]  ;;  %v188_v19 = vld [vmem:[%s874_s25 + $0x118] sm:$0xff] }
  0x1a   : > { %181 = vst [vmem:[%s882_s26 + $0x78] sm:$0xff] %v180_v15  ;;  %183 = vst [vmem:[%s882_s26 + $0x80] sm:$0xff] %v182_v16  ;;  %v190_v20 = vld [vmem:[%s874_s25 + $0x120] sm:$0xff]  ;;  %v192_v21 = vld [vmem:[%s874_s25 + $0x128] sm:$0xff] }
  0x1b   : > { %185 = vst [vmem:[%s882_s26 + $0x88] sm:$0xff] %v184_v17  ;;  %187 = vst [vmem:[%s882_s26 + $0x90] sm:$0xff] %v186_v18  ;;  %v194_v22 = vld [vmem:[%s874_s25 + $0x130] sm:$0xff]  ;;  %v196_v23 = vld [vmem:[%s874_s25 + $0x138] sm:$0xff] }
  0x1c   : > { %189 = vst [vmem:[%s882_s26 + $0x98] sm:$0xff] %v188_v19  ;;  %191 = vst [vmem:[%s882_s26 + $0xa0] sm:$0xff] %v190_v20  ;;  %v198_v24 = vld [vmem:[%s874_s25 + $0x180] sm:$0xff]  ;;  %v200_v25 = vld [vmem:[%s874_s25 + $0x188] sm:$0xff] }
  0x1d   : > { %193 = vst [vmem:[%s882_s26 + $0xa8] sm:$0xff] %v192_v21  ;;  %195 = vst [vmem:[%s882_s26 + $0xb0] sm:$0xff] %v194_v22  ;;  %v202_v26 = vld [vmem:[%s874_s25 + $0x190] sm:$0xff]  ;;  %v204_v27 = vld [vmem:[%s874_s25 + $0x198] sm:$0xff] }
  0x1e   : > { %197 = vst [vmem:[%s882_s26 + $0xb8] sm:$0xff] %v196_v23  ;;  %199 = vst [vmem:[%s882_s26 + $0xc0] sm:$0xff] %v198_v24  ;;  %v206_v28 = vld [vmem:[%s874_s25 + $0x1a0] sm:$0xff]  ;;  %v208_v29 = vld [vmem:[%s874_s25 + $0x1a8] sm:$0xff] }
  0x1f   : > { %201 = vst [vmem:[%s882_s26 + $0xc8] sm:$0xff] %v200_v25  ;;  %203 = vst [vmem:[%s882_s26 + $0xd0] sm:$0xff] %v202_v26  ;;  %v210_v30 = vld [vmem:[%s874_s25 + $0x1b0] sm:$0xff]  ;;  %v212_v31 = vld [vmem:[%s874_s25 + $0x1b8] sm:$0xff] }
  0x20   : > { %205 = vst [vmem:[%s882_s26 + $0xd8] sm:$0xff] %v204_v27  ;;  %207 = vst [vmem:[%s882_s26 + $0xe0] sm:$0xff] %v206_v28  ;;  %v214_v32 = vld [vmem:[%s874_s25 + $0x200] sm:$0xff]  ;;  %v216_v33 = vld [vmem:[%s874_s25 + $0x208] sm:$0xff] }
  0x21   : > { %209 = vst [vmem:[%s882_s26 + $0xe8] sm:$0xff] %v208_v29  ;;  %211 = vst [vmem:[%s882_s26 + $0xf0] sm:$0xff] %v210_v30  ;;  %v218_v34 = vld [vmem:[%s874_s25 + $0x210] sm:$0xff]  ;;  %v220_v35 = vld [vmem:[%s874_s25 + $0x218] sm:$0xff] }
  0x22   : > { %213 = vst [vmem:[%s882_s26 + $0xf8] sm:$0xff] %v212_v31  ;;  %215 = vst [vmem:[%s882_s26 + $0x100] sm:$0xff] %v214_v32  ;;  %v222_v36 = vld [vmem:[%s874_s25 + $0x220] sm:$0xff]  ;;  %v224_v37 = vld [vmem:[%s874_s25 + $0x228] sm:$0xff] }
  0x23   : > { %217 = vst [vmem:[%s882_s26 + $0x108] sm:$0xff] %v216_v33  ;;  %219 = vst [vmem:[%s882_s26 + $0x110] sm:$0xff] %v218_v34  ;;  %v226_v38 = vld [vmem:[%s874_s25 + $0x230] sm:$0xff]  ;;  %v228_v39 = vld [vmem:[%s874_s25 + $0x238] sm:$0xff] }
  0x24   : > { %221 = vst [vmem:[%s882_s26 + $0x118] sm:$0xff] %v220_v35  ;;  %223 = vst [vmem:[%s882_s26 + $0x120] sm:$0xff] %v222_v36 }
  0x25   : > { %225 = vst [vmem:[%s882_s26 + $0x128] sm:$0xff] %v224_v37  ;;  %227 = vst [vmem:[%s882_s26 + $0x130] sm:$0xff] %v226_v38 }
  0x26   : > { %229 = vst [vmem:[%s882_s26 + $0x138] sm:$0xff] %v228_v39 }
  0x27 PF: > { %p715_p5 = scmp.ge.s32.totalorder %s816_s14, 1  ;;  %p234_p6 = scmp.lt.s32.totalorder %s816_s14, 3 }
  0x29   : > { %p235_p7 = pnand %p715_p5, %p234_p6 }
  0x2a   : > { %s241_s27 = sand.u32 (!%p235_p7), 1, %s808_s12   ;;  %v818_v40 = vmov (!%p235_p7), 0.0   ;;  %v312_v41 = vld [vmem:[%s1042_s2] sm:$0xff] (!%p235_p7)  ;;  %v819_v42 = vmov (!%p235_p7), 0   ;;  %vm322_vm0 = vcmask (!%p235_p7), 1043456   ;;  %vm318_vm1 = vcmask (!%p235_p7), 293888  }
  0x2b   : > { %238 = sbr.rel (%p235_p7) target bundleno = 291 (0x123), region = 51  ;;  %411 = vmatprep.mubr.f32.mxu0 (!%p235_p7), %v818_v40  ;;  %482 = vmatprep.mubr.f32.mxu1 (!%p235_p7), %v818_v40  ;;  %v271_v10 = vld [vmem:[%s1040_s0] sm:$0xff] (!%p235_p7)  ;;  %s716_s7 = sshll.u32 (!%p235_p7), %s709_s15, 3 }
  0x2c   : > { %s766_s28 = smul.u32 (!%p235_p7), 320, %s241_s27  ;;  %793 = vset.pattern.permute.xlu0 (!%p235_p7), %v819_v42  ;;  %p266_p8 = scmp.lt.s32.totalorder (!%p235_p7), %s716_s7, 15 }
  0x2d   : > { %315 = vperm.xlu0 (!%p235_p7), %793, %v312_v41  }
  0x2e   : > { %s966_s4 = scalar_lea.vmem (!%p235_p7), [#allocation2], %s766_s28 }
  0x2f   : > { %v273_v43 = vld [vmem:[%s966_s4 + $0x8] sm:$0xff] (!%p235_p7)  ;;  %v275_v45 = vld [vmem:[%s966_s4 + $0x18] sm:$0xff] (!%p235_p7)  ;;  %v272_v48 = vld [vmem:[%s966_s4] sm:$0xff] (!%p235_p7) }
  0x30   : > { %v281_v44 = vld [vmem:[%s966_s4 + $0x48] sm:$0xff] (!%p235_p7)  ;;  %v283_v47 = vld [vmem:[%s966_s4 + $0x58] sm:$0xff] (!%p235_p7)  ;;  %v280_v49 = vld [vmem:[%s966_s4 + $0x40] sm:$0xff] (!%p235_p7) }
  0x31   : > { %v733_v46 = vpack.c.bf16 (!%p235_p7), %v281_v44, %v273_v43  ;;  %v741_v50 = vpack.c.bf16 (!%p235_p7), %v283_v47, %v275_v45  ;;  %v735_v51 = vpack.c.bf16 (!%p235_p7), %v280_v49, %v272_v48  ;;  %v274_v52 = vld [vmem:[%s966_s4 + $0x10] sm:$0xff] (!%p235_p7)  ;;  %v289_v54 = vld [vmem:[%s966_s4 + $0x88] sm:$0xff] (!%p235_p7)  ;;  %v291_v57 = vld [vmem:[%s966_s4 + $0x98] sm:$0xff] (!%p235_p7) }
  0x32   : > { %v282_v53 = vld [vmem:[%s966_s4 + $0x50] sm:$0xff]  ;;  %v297_v56 = vld [vmem:[%s966_s4 + $0xc8] sm:$0xff]  ;;  %v299_v58 = vld [vmem:[%s966_s4 + $0xd8] sm:$0xff]  ;;  %s1048_s7 = smov (!%p266_p8, %s716_s7), 15 }
  0x33   : > { %734 = vmatprep.subr.bf16.mxu0 %v733_v46  ;;  %v743_v55 = vpack.c.bf16 %v282_v53, %v274_v52  ;;  %742 = vmatprep.subr.bf16.mxu1 %v741_v50  ;;  %v737_v59 = vpack.c.bf16 %v297_v56, %v289_v54  ;;  %v745_v60 = vpack.c.bf16 %v299_v58, %v291_v57  ;;  %v288_v61 = vld [vmem:[%s966_s4 + $0x80] sm:$0xff]  ;;  %v290_v63 = vld [vmem:[%s966_s4 + $0x90] sm:$0xff]  ;;  %v305_v3 = vld [vmem:[%s966_s4 + $0x108] sm:$0xf]  ;;  %s717_s8 = sshll.u32 %s1048_s7, 3 }
  0x34   : > { %736 = vmatpush1.bf16.msra.mxu0 %v735_v51  ;;  %v296_v62 = vld [vmem:[%s966_s4 + $0xc0] sm:$0xff]  ;;  %v298_v1 = vld [vmem:[%s966_s4 + $0xd0] sm:$0xff]  ;;  %v307_v4 = vld [vmem:[%s966_s4 + $0x118] sm:$0xf]  ;;  %s269_s11 = scalar_lea.vmem %s1043_s3, %s717_s8 }
  0x35   : > { %744 = vmatpush1.bf16.msra.mxu1 %v743_v55  ;;  %v739_v0 = vpack.c.bf16 %v296_v62, %v288_v61  ;;  %738 = vmatprep.subr.bf16.mxu0 %v737_v59  ;;  %v747_v2 = vpack.c.bf16 %v298_v1, %v290_v63  ;;  %v277_v5 = vld [vmem:[%s966_s4 + $0x28] sm:$0xff]  ;;  %v304_v6 = vld [vmem:[%s966_s4 + $0x100] sm:$0xf]  ;;  %v279_v8 = vld [vmem:[%s966_s4 + $0x38] sm:$0xff] }
  0x36   : > { %746 = vmatprep.subr.bf16.mxu1 %v745_v60  ;;  %v285_v7 = vld [vmem:[%s966_s4 + $0x68] sm:$0xff]  ;;  %v287_v9 = vld [vmem:[%s966_s4 + $0x78] sm:$0xff]  ;;  %v276_v11 = vld [vmem:[%s966_s4 + $0x20] sm:$0xff] }
  0x37   : > { %v284_v12 = vld [vmem:[%s966_s4 + $0x60] sm:$0xff]  ;;  %v278_v13 = vld [vmem:[%s966_s4 + $0x30] sm:$0xff]  ;;  %v293_v15 = vld [vmem:[%s966_s4 + $0xa8] sm:$0xff]  ;;  %v749_v18 = vpack.c.bf16 %v285_v7, %v277_v5  ;;  %v757_v21 = vpack.c.bf16 %v287_v9, %v279_v8 }
  0x38   : > { %740 = vmatpush1.bf16.msra.mxu0 %v739_v0  ;;  %v286_v14 = vld [vmem:[%s966_s4 + $0x70] sm:$0xff]  ;;  %v301_v16 = vld [vmem:[%s966_s4 + $0xe8] sm:$0xff]  ;;  %v295_v19 = vld [vmem:[%s966_s4 + $0xb8] sm:$0xff]  ;;  %v751_v22 = vpack.c.bf16 %v284_v12, %v276_v11 }
  0x39   : > { %748 = vmatpush1.bf16.msra.mxu1 %v747_v2  ;;  %718 = vmatprep.subr.msk.mxu0 %vm322_vm0, %v305_v3  ;;  %v306_v17 = vld [vmem:[%s966_s4 + $0x110] sm:$0xf]  ;;  %v303_v20 = vld [vmem:[%s966_s4 + $0xf8] sm:$0xff]  ;;  %v759_v23 = vpack.c.bf16 %v286_v14, %v278_v13  ;;  %v753_v24 = vpack.c.bf16 %v301_v16, %v293_v15  ;;  %v292_v25 = vld [vmem:[%s966_s4 + $0xa0] sm:$0xff] }
  0x3a   : > { %721 = vmatprep.subr.msk.mxu1 %vm322_vm0, %v307_v4  ;;  %v300_v26 = vld [vmem:[%s966_s4 + $0xe0] sm:$0xff]  ;;  %v761_v27 = vpack.c.bf16 %v303_v20, %v295_v19  ;;  %v294_v28 = vld [vmem:[%s966_s4 + $0xb0] sm:$0xff]  ;;  %v309_v32 = vld [vmem:[%s966_s4 + $0x128] sm:$0xf] }
  0x3b   : > { %v302_v29 = vld [vmem:[%s966_s4 + $0xf0] sm:$0xff]  ;;  %v755_v30 = vpack.c.bf16 %v300_v26, %v292_v25  ;;  %v311_v33 = vld [vmem:[%s966_s4 + $0x138] sm:$0xf]  ;;  %v308_v34 = vld [vmem:[%s966_s4 + $0x120] sm:$0xf] }
  0x3c   : > { %719 = vmatpush1.msk.msra.mxu0 %vm322_vm0, %v304_v6  ;;  %v763_v31 = vpack.c.bf16 %v302_v29, %v294_v28  ;;  %v310_v35 = vld [vmem:[%s966_s4 + $0x130] sm:$0xf] }
  0x3d   : > { %722 = vmatpush1.msk.msra.mxu1 %vm322_vm0, %v306_v17  ;;  %720 = vmatmul.mubr.msk.f32.vlgmr.msra.gmra.mrb[0].mxu0 %vm318_vm1, %v271_v10 }
  0x3e   : > { %723 = vmatmul.mubr.msk.f32.vlgmr.msra.gmra.mrb[0].mxu1 %vm318_vm1, %v271_v10  ;;  %750 = vmatprep.subr.bf16.mxu0 %v749_v18 }
  0x3f   : > { %758 = vmatprep.subr.bf16.mxu1 %v757_v21  ;;  %752 = vmatpush1.bf16.msra.mxu0 %v751_v22 }
  0x40   : > { %760 = vmatpush1.bf16.msra.mxu1 %v759_v23  ;;  %754 = vmatprep.subr.bf16.mxu0 %v753_v24 }
  0x41   : > { %762 = vmatprep.subr.bf16.mxu1 %v761_v27  ;;  %553 = vmatprep.mubr.f32.mxu0 %v818_v40 }
  0x42   : > { %624 = vmatprep.mubr.f32.mxu1 %v818_v40 }
  0x43   : > { %756 = vmatpush1.bf16.msra.mxu0 %v755_v30 }
  0x44   : > { %764 = vmatpush1.bf16.msra.mxu1 %v763_v31  ;;  %724 = vmatprep.subr.msk.mxu0 %vm322_vm0, %v309_v32 }
  0x45   : > { %727 = vmatprep.subr.msk.mxu1 %vm322_vm0, %v311_v33 }
  0x47   : > { %725 = vmatpush1.msk.msra.mxu0 %vm322_vm0, %v308_v34 }
  0x48   : > { %728 = vmatpush1.msk.msra.mxu1 %vm322_vm0, %v310_v35  ;;  %726 = vmatmul.mubr.msk.f32.vlgmr.msra.gmra.mrb[2].mxu0 %vm318_vm1, %v271_v10 }
  0x49   : > { %729 = vmatmul.mubr.msk.f32.vlgmr.msra.gmra.mrb[2].mxu1 %vm318_vm1, %v271_v10 }
  0xac   : > { %v316_v36 = vpop.permute.xlu0 %315 }
 0x110   : > { %v413_v37 = vpop.f32.mrb[0].mxu0 }
 0x111   : > { %v484_v38 = vpop.f32.mrb[0].mxu1  ;;  %v414_v39 = vadd.f32 %v413_v37, %v316_v36  ;;  %v415_v40 = vpop.f32.mrb[1].mxu0 }
 0x112   : > { %v485_v41 = vadd.f32 %v484_v38, %v316_v36  ;;  %v416_v42 = vadd.f32 %v415_v40, %v316_v36  ;;  %v486_v43 = vpop.f32.mrb[1].mxu1 }
 0x113   : > { %v631_v44 = vmax.f32 %v414_v39, 0.0  ;;  %v487_v45 = vadd.f32 %v486_v43, %v316_v36 }
 0x114   : > { %v633_v46 = vmax.f32 %v485_v41, 0.0  ;;  %v632_v47 = vmax.f32 %v416_v42, 0.0 }
 0x115   : > { %639 = vst [vmem:[%s269_s11] sm:$0xff] %v631_v44  ;;  %v634_v48 = vmax.f32 %v487_v45, 0.0 }
 0x116   : > { %641 = vst [vmem:[%s269_s11 + $0x10] sm:$0xff] %v633_v46  ;;  %640 = vst [vmem:[%s269_s11 + $0x8] sm:$0xff] %v632_v47 }
 0x117   : > { %642 = vst [vmem:[%s269_s11 + $0x18] sm:$0xff] %v634_v48 }
 0x11b   : > { %v555_v49 = vpop.f32.mrb[2].mxu0 }
 0x11c   : > { %v556_v50 = vadd.f32 %v555_v49, %v316_v36  ;;  %v626_v51 = vpop.f32.mrb[2].mxu1  ;;  %v557_v52 = vpop.f32.mrb[3].mxu0 }
 0x11d   : > { %v627_v53 = vadd.f32 %v626_v51, %v316_v36  ;;  %v558_v54 = vadd.f32 %v557_v52, %v316_v36  ;;  %v628_v55 = vpop.f32.mrb[3].mxu1 }
 0x11e   : > { %v635_v56 = vmax.f32 %v556_v50, 0.0  ;;  %v629_v57 = vadd.f32 %v628_v55, %v316_v36 }
 0x11f   : > { %v637_v58 = vmax.f32 %v627_v53, 0.0  ;;  %v636_v59 = vmax.f32 %v558_v54, 0.0 }
 0x120   : > { %643 = vst [vmem:[%s269_s11 + $0x20] sm:$0xff] %v635_v56  ;;  %v638_v60 = vmax.f32 %v629_v57, 0.0 }
 0x121   : > { %645 = vst [vmem:[%s269_s11 + $0x30] sm:$0xff] %v637_v58  ;;  %644 = vst [vmem:[%s269_s11 + $0x28] sm:$0xff] %v636_v59 }
 0x122   : > { %646 = vst [vmem:[%s269_s11 + $0x38] sm:$0xff] %v638_v60 }
 0x123 PF: > { %p10_p9 = scmp.ge.s32.totalorder %s857_s16, 4   ;;  %s1044_s12 = smov %s812_s13 }
 0x124   : > { %s1045_s13 = smov %s866_s19  ;;  %s1046_s14 = smov %s857_s16 }
 0x125   :  { %12 = sbr.rel (!%p10_p9) target bundleno = 2 (0x2), region = 90 }

// kernel: cnn_forward.8
= control target key start
LH: loop header
LB: loop body
LE: loop exit
PB: predicated region body
PF: predicated region fallthrough
CT: control target
= control target key end

     0   :  { %v284_v3 = vmov 0.0   ;;  %v285_v8 = vmov 0   ;;  %vm64_vm0 = vcmask 588800   ;;  %s454_s1 = inlined_call_operand.vmem [shape: f32[72,512], index: 1, kind: input, shape index: {}]   ;;  %s455_s2 = inlined_call_operand.vmem [shape: f32[16,1], index: 2, kind: input, shape index: {}]   ;;  %s456_s0 = inlined_call_operand.vmem [shape: f32[16,72], index: 0, kind: input, shape index: {}]   ;;  %s457_s3 = inlined_call_operand.vmem [shape: f32[16,512], index: 3, kind: output, shape index: {}]  }
   0x1   :  { %v17_v0 = vld [vmem:[%s454_s1 + $0x8] sm:$0xff]  ;;  %v19_v2 = vld [vmem:[%s454_s1 + $0x18] sm:$0xff]  ;;  %135 = vmatprep.mubr.f32.mxu0 %v284_v3  ;;  %212 = vmatprep.mubr.f32.mxu1 %v284_v3  ;;  %v16_v6 = vld [vmem:[%s454_s1] sm:$0xff] }
   0x2   :  { %v21_v1 = vld [vmem:[%s454_s1 + $0x28] sm:$0xff]  ;;  %v23_v5 = vld [vmem:[%s454_s1 + $0x38] sm:$0xff]  ;;  %v20_v7 = vld [vmem:[%s454_s1 + $0x20] sm:$0xff]  ;;  %283 = vset.pattern.permute.xlu0 %v285_v8 }
   0x3   :  { %v249_v4 = vpack.c.bf16 %v21_v1, %v17_v0  ;;  %v265_v9 = vpack.c.bf16 %v23_v5, %v19_v2  ;;  %v251_v10 = vpack.c.bf16 %v20_v7, %v16_v6  ;;  %v18_v11 = vld [vmem:[%s454_s1 + $0x10] sm:$0xff]  ;;  %v25_v13 = vld [vmem:[%s454_s1 + $0x48] sm:$0xff]  ;;  %v27_v16 = vld [vmem:[%s454_s1 + $0x58] sm:$0xff] }
   0x4   :  { %v22_v12 = vld [vmem:[%s454_s1 + $0x30] sm:$0xff]  ;;  %v29_v15 = vld [vmem:[%s454_s1 + $0x68] sm:$0xff]  ;;  %v31_v17 = vld [vmem:[%s454_s1 + $0x78] sm:$0xff] }
   0x5   :  { %250 = vmatprep.subr.bf16.mxu0 %v249_v4  ;;  %v267_v14 = vpack.c.bf16 %v22_v12, %v18_v11  ;;  %266 = vmatprep.subr.bf16.mxu1 %v265_v9  ;;  %v253_v18 = vpack.c.bf16 %v29_v15, %v25_v13  ;;  %v269_v19 = vpack.c.bf16 %v31_v17, %v27_v16  ;;  %v24_v20 = vld [vmem:[%s454_s1 + $0x40] sm:$0xff]  ;;  %v26_v22 = vld [vmem:[%s454_s1 + $0x50] sm:$0xff]  ;;  %v33_v25 = vld [vmem:[%s454_s1 + $0x88] sm:$0xff] }
   0x6   :  { %252 = vmatpush1.bf16.msra.mxu0 %v251_v10  ;;  %v28_v21 = vld [vmem:[%s454_s1 + $0x60] sm:$0xff]  ;;  %v30_v24 = vld [vmem:[%s454_s1 + $0x70] sm:$0xff]  ;;  %v37_v26 = vld [vmem:[%s454_s1 + $0xa8] sm:$0xff] }
   0x7   :  { %268 = vmatpush1.bf16.msra.mxu1 %v267_v14  ;;  %v255_v23 = vpack.c.bf16 %v28_v21, %v24_v20  ;;  %254 = vmatprep.subr.bf16.mxu0 %v253_v18  ;;  %v271_v27 = vpack.c.bf16 %v30_v24, %v26_v22  ;;  %v257_v28 = vpack.c.bf16 %v37_v26, %v33_v25  ;;  %v35_v29 = vld [vmem:[%s454_s1 + $0x98] sm:$0xff]  ;;  %v32_v31 = vld [vmem:[%s454_s1 + $0x80] sm:$0xff]  ;;  %v34_v34 = vld [vmem:[%s454_s1 + $0x90] sm:$0xff] }
   0x8   :  { %270 = vmatprep.subr.bf16.mxu1 %v269_v19  ;;  %v39_v30 = vld [vmem:[%s454_s1 + $0xb8] sm:$0xff]  ;;  %v36_v33 = vld [vmem:[%s454_s1 + $0xa0] sm:$0xff]  ;;  %v38_v35 = vld [vmem:[%s454_s1 + $0xb0] sm:$0xff] }
   0x9   :  { %v273_v32 = vpack.c.bf16 %v39_v30, %v35_v29  ;;  %v259_v36 = vpack.c.bf16 %v36_v33, %v32_v31  ;;  %v41_v37 = vld [vmem:[%s454_s1 + $0xc8] sm:$0xff]  ;;  %v43_v39 = vld [vmem:[%s454_s1 + $0xd8] sm:$0xff]  ;;  %v275_v40 = vpack.c.bf16 %v38_v35, %v34_v34  ;;  %v40_v43 = vld [vmem:[%s454_s1 + $0xc0] sm:$0xff] }
   0xa   :  { %256 = vmatpush1.bf16.msra.mxu0 %v255_v23  ;;  %v45_v38 = vld [vmem:[%s454_s1 + $0xe8] sm:$0xff]  ;;  %v47_v42 = vld [vmem:[%s454_s1 + $0xf8] sm:$0xff]  ;;  %v44_v44 = vld [vmem:[%s454_s1 + $0xe0] sm:$0xff] }
   0xb   :  { %272 = vmatpush1.bf16.msra.mxu1 %v271_v27  ;;  %258 = vmatprep.subr.bf16.mxu0 %v257_v28  ;;  %v261_v41 = vpack.c.bf16 %v45_v38, %v41_v37  ;;  %v277_v45 = vpack.c.bf16 %v47_v42, %v43_v39  ;;  %v42_v46 = vld [vmem:[%s454_s1 + $0xd0] sm:$0xff]  ;;  %v263_v48 = vpack.c.bf16 %v44_v44, %v40_v43  ;;  %v52_v49 = vld [vmem:[%s455_s2] sm:$0xff]  ;;  %v49_v51 = vld [vmem:[%s454_s1 + $0x108] sm:$0xff] }
   0xc   :  { %274 = vmatprep.subr.bf16.mxu1 %v273_v32  ;;  %v46_v47 = vld [vmem:[%s454_s1 + $0xf0] sm:$0xff]  ;;  %56 = vperm.xlu0 %283, %v52_v49   ;;  %v51_v52 = vld [vmem:[%s454_s1 + $0x118] sm:$0xff]  ;;  %v53_v53 = vld [vmem:[%s455_s2 + $0x8] sm:$0xff] }
   0xd   :  { %v279_v50 = vpack.c.bf16 %v46_v47, %v42_v46  ;;  %v48_v54 = vld [vmem:[%s454_s1 + $0x100] sm:$0xff]  ;;  %v50_v55 = vld [vmem:[%s454_s1 + $0x110] sm:$0xff]  ;;  %v15_v57 = vld [vmem:[%s456_s0 + $0x8] sm:$0xff] }
   0xe   :  { %260 = vmatpush1.bf16.msra.mxu0 %v259_v36  ;;  %v14_v56 = vld [vmem:[%s456_s0] sm:$0xff] }
   0xf   :  { %276 = vmatpush1.bf16.msra.mxu1 %v275_v40  ;;  %262 = vmatprep.subr.bf16.mxu0 %v261_v41 }
  0x10   :  { %278 = vmatprep.subr.bf16.mxu1 %v277_v45  ;;  %61 = vperm.xlu0 %283, %v53_v53  }
  0x12   :  { %264 = vmatpush1.bf16.msra.mxu0 %v263_v48 }
  0x13   :  { %280 = vmatpush1.bf16.msra.mxu1 %v279_v50  ;;  %87 = vmatprep.subr.mxu0 %v49_v51 }
  0x14   :  { %164 = vmatprep.subr.mxu1 %v51_v52 }
  0x16   :  { %88 = vmatpush1.msra.mxu0 %v48_v54 }
  0x17   :  { %165 = vmatpush1.msra.mxu1 %v50_v55  ;;  %245 = vmatmul.mubr.msk.f32.vlgmr.msra.gmra.mrb[0].mxu0 %vm64_vm0, %v14_v56 }
  0x18   :  { %247 = vmatmul.mubr.msk.f32.vlgmr.msra.gmra.mrb[0].mxu1 %vm64_vm0, %v14_v56  ;;  %141 = vmatprep.mubr.f32.mxu0 %v284_v3 }
  0x19   :  { %218 = vmatprep.mubr.f32.mxu1 %v284_v3 }
  0x1b   :  { %246 = vmatmul.mubr.msk.f32.gmra.mrb[2].mxu0 %vm64_vm0, %v15_v57 }
  0x1c   :  { %248 = vmatmul.mubr.msk.f32.gmra.mrb[2].mxu1 %vm64_vm0, %v15_v57 }
  0x8b   :  { %v57_v58 = vpop.permute.xlu0 %56 }
  0x8f   :  { %v62_v6 = vpop.permute.xlu0 %61 }
  0xea   :  { %v137_v59 = vpop.f32.mrb[0].mxu0 }
  0xeb   :  { %v138_v60 = vadd.f32 %v137_v59, %v57_v58  ;;  %v214_v61 = vpop.f32.mrb[0].mxu1  ;;  %v139_v62 = vpop.f32.mrb[1].mxu0 }
  0xec   :  { %v215_v63 = vadd.f32 %v214_v61, %v57_v58  ;;  %v140_v0 = vadd.f32 %v139_v62, %v57_v58  ;;  %v216_v1 = vpop.f32.mrb[1].mxu1 }
  0xed   :  { %v225_v2 = vmax.f32 %v138_v60, 0.0  ;;  %v217_v4 = vadd.f32 %v216_v1, %v57_v58 }
  0xee   :  { %v227_v5 = vmax.f32 %v215_v63, 0.0  ;;  %v226_v7 = vmax.f32 %v140_v0, 0.0  ;;  %v143_v8 = vpop.f32.mrb[2].mxu0 }
  0xef   :  { %233 = vst [vmem:[%s457_s3] sm:$0xff] %v225_v2  ;;  %v228_v3 = vmax.f32 %v217_v4, 0.0  ;;  %v144_v9 = vadd.f32 %v143_v8, %v62_v6  ;;  %v220_v10 = vpop.f32.mrb[2].mxu1  ;;  %v145_v11 = vpop.f32.mrb[3].mxu0 }
  0xf0   :  { %235 = vst [vmem:[%s457_s3 + $0x10] sm:$0xff] %v227_v5  ;;  %234 = vst [vmem:[%s457_s3 + $0x8] sm:$0xff] %v226_v7  ;;  %v221_v12 = vadd.f32 %v220_v10, %v62_v6  ;;  %v146_v13 = vadd.f32 %v145_v11, %v62_v6  ;;  %v222_v14 = vpop.f32.mrb[3].mxu1 }
  0xf1   :  { %236 = vst [vmem:[%s457_s3 + $0x18] sm:$0xff] %v228_v3  ;;  %v229_v15 = vmax.f32 %v144_v9, 0.0  ;;  %v223_v16 = vadd.f32 %v222_v14, %v62_v6 }
  0xf2   :  { %v231_v17 = vmax.f32 %v221_v12, 0.0  ;;  %v230_v18 = vmax.f32 %v146_v13, 0.0 }
  0xf3   :  { %237 = vst [vmem:[%s457_s3 + $0x20] sm:$0xff] %v229_v15  ;;  %v232_v19 = vmax.f32 %v223_v16, 0.0 }
  0xf4   :  { %239 = vst [vmem:[%s457_s3 + $0x30] sm:$0xff] %v231_v17  ;;  %238 = vst [vmem:[%s457_s3 + $0x28] sm:$0xff] %v230_v18 }
  0xf5   :  { %240 = vst [vmem:[%s457_s3 + $0x38] sm:$0xff] %v232_v19 }

// kernel: cnn_forward.9
= control target key start
LH: loop header
LB: loop body
LE: loop exit
PB: predicated region body
PF: predicated region fallthrough
CT: control target
= control target key end

     0   :  { %v227_v0 = vmov 0.0|0.0   ;;  %v228_v6 = vmov 0   ;;  %vm64_vm0 = vcmask 130048   ;;  %s373_s1 = inlined_call_operand.vmem [shape: f32[144,128], index: 1, kind: input, shape index: {}]   ;;  %s374_s0 = inlined_call_operand.vmem [shape: f32[32,144], index: 0, kind: input, shape index: {}]   ;;  %s375_s2 = inlined_call_operand.vmem [shape: f32[32,1], index: 2, kind: input, shape index: {}]   ;;  %s376_s3 = inlined_call_operand.vmem [shape: f32[32,128], index: 3, kind: output, shape index: {}]  }
   0x1   :  { %178 = vmatprep.subr.bf16.mxu0 %v227_v0  ;;  %205 = vmatprep.subr.bf16.mxu1 %v227_v0  ;;  %v22_v1 = vld [vmem:[%s373_s1] sm:$0xff]  ;;  %v23_v2 = vld [vmem:[%s373_s1 + $0x8] sm:$0xff]  ;;  %v24_v3 = vld [vmem:[%s373_s1 + $0x10] sm:$0xff] }
   0x2   :  { %v179_v4 = vpack.c.bf16 %v23_v2, %v22_v1  ;;  %v25_v5 = vld [vmem:[%s373_s1 + $0x18] sm:$0xff]  ;;  %226 = vset.pattern.permute.xlu1 %v228_v6  ;;  %225 = vset.pattern.permute.xlu0 %v228_v6  ;;  %v26_v8 = vld [vmem:[%s373_s1 + $0x20] sm:$0xff]  ;;  %v27_v9 = vld [vmem:[%s373_s1 + $0x28] sm:$0xff] }
   0x3   :  { %v182_v7 = vpack.c.bf16 %v25_v5, %v24_v3  ;;  %v15_v10 = vld [vmem:[%s374_s0 + $0x8] sm:$0xff]  ;;  %v185_v12 = vpack.c.bf16 %v27_v9, %v26_v8  ;;  %v28_v13 = vld [vmem:[%s373_s1 + $0x30] sm:$0xff]  ;;  %v29_v14 = vld [vmem:[%s373_s1 + $0x38] sm:$0xff] }
   0x4   :  { %180 = vmatpush1.bf16.msra.mxu0 %v179_v4  ;;  %214 = vmatpush1.bf16.msra.mxu1 %v179_v4  ;;  %v19_v11 = vld [vmem:[%s374_s0 + $0x28] sm:$0xff]  ;;  %v42_v15 = vld [vmem:[%s375_s2 + $0x10] sm:$0xff]  ;;  %v40_v16 = vld [vmem:[%s375_s2] sm:$0xff]  ;;  %v188_v17 = vpack.c.bf16 %v29_v14, %v28_v13 }
   0x5   :  { %181 = vmatprep.subr.bf16.mxu0 %v227_v0  ;;  %206 = vmatprep.subr.bf16.mxu1 %v227_v0  ;;  %v43_v18 = vld [vmem:[%s375_s2 + $0x18] sm:$0xff]  ;;  %v41_v19 = vld [vmem:[%s375_s2 + $0x8] sm:$0xff]  ;;  %v30_v20 = vld [vmem:[%s373_s1 + $0x40] sm:$0xff] }
   0x6   :  { %174 = vmatprep.mubr.msk.f32.mxu0 %vm64_vm0, %v15_v10  ;;  %176 = vmatprep.mubr.msk.f32.mxu1 %vm64_vm0, %v19_v11  ;;  %v31_v21 = vld [vmem:[%s373_s1 + $0x48] sm:$0xff]  ;;  %v32_v23 = vld [vmem:[%s373_s1 + $0x50] sm:$0xff]  ;;  %v33_v24 = vld [vmem:[%s373_s1 + $0x58] sm:$0xff] }
   0x7   :  { %56 = vperm.xlu1 %226, %v42_v15   ;;  %46 = vperm.xlu0 %225, %v40_v16   ;;  %v191_v22 = vpack.c.bf16 %v31_v21, %v30_v20  ;;  %v194_v25 = vpack.c.bf16 %v33_v24, %v32_v23  ;;  %v34_v26 = vld [vmem:[%s373_s1 + $0x60] sm:$0xff]  ;;  %v35_v27 = vld [vmem:[%s373_s1 + $0x68] sm:$0xff]  ;;  %v36_v29 = vld [vmem:[%s373_s1 + $0x70] sm:$0xff] }
   0x8   :  { %183 = vmatpush1.bf16.msra.mxu0 %v182_v7  ;;  %215 = vmatpush1.bf16.msra.mxu1 %v182_v7  ;;  %v197_v28 = vpack.c.bf16 %v35_v27, %v34_v26  ;;  %v37_v30 = vld [vmem:[%s373_s1 + $0x78] sm:$0xff]  ;;  %v38_v32 = vld [vmem:[%s373_s1 + $0x80] sm:$0xff]  ;;  %v39_v33 = vld [vmem:[%s373_s1 + $0x88] sm:$0xff] }
   0x9   :  { %184 = vmatprep.subr.bf16.mxu0 %v227_v0  ;;  %207 = vmatprep.subr.bf16.mxu1 %v227_v0  ;;  %v200_v31 = vpack.c.bf16 %v37_v30, %v36_v29  ;;  %v203_v34 = vpack.c.bf16 %v39_v33, %v38_v32  ;;  %v14_v35 = vld [vmem:[%s374_s0] sm:$0xff]  ;;  %v17_v37 = vld [vmem:[%s374_s0 + $0x18] sm:$0xff]  ;;  %v16_v39 = vld [vmem:[%s374_s0 + $0x10] sm:$0xff] }
   0xa   :  { %v18_v36 = vld [vmem:[%s374_s0 + $0x20] sm:$0xff]  ;;  %v21_v38 = vld [vmem:[%s374_s0 + $0x38] sm:$0xff]  ;;  %v20_v40 = vld [vmem:[%s374_s0 + $0x30] sm:$0xff] }
   0xb   :  { %61 = vperm.xlu1 %226, %v43_v18   ;;  %51 = vperm.xlu0 %225, %v41_v19  }
   0xc   :  { %186 = vmatpush1.bf16.msra.mxu0 %v185_v12  ;;  %216 = vmatpush1.bf16.msra.mxu1 %v185_v12 }
   0xd   :  { %187 = vmatprep.subr.bf16.mxu0 %v227_v0  ;;  %208 = vmatprep.subr.bf16.mxu1 %v227_v0 }
  0x10   :  { %189 = vmatpush1.bf16.msra.mxu0 %v188_v17  ;;  %217 = vmatpush1.bf16.msra.mxu1 %v188_v17 }
  0x11   :  { %190 = vmatprep.subr.bf16.mxu0 %v227_v0  ;;  %209 = vmatprep.subr.bf16.mxu1 %v227_v0 }
  0x14   :  { %192 = vmatpush1.bf16.msra.mxu0 %v191_v22  ;;  %218 = vmatpush1.bf16.msra.mxu1 %v191_v22 }
  0x15   :  { %193 = vmatprep.subr.bf16.mxu0 %v227_v0  ;;  %210 = vmatprep.subr.bf16.mxu1 %v227_v0 }
  0x18   :  { %195 = vmatpush1.bf16.msra.mxu0 %v194_v25  ;;  %219 = vmatpush1.bf16.msra.mxu1 %v194_v25 }
  0x19   :  { %196 = vmatprep.subr.bf16.mxu0 %v227_v0  ;;  %211 = vmatprep.subr.bf16.mxu1 %v227_v0 }
  0x1c   :  { %198 = vmatpush1.bf16.msra.mxu0 %v197_v28  ;;  %220 = vmatpush1.bf16.msra.mxu1 %v197_v28 }
  0x1d   :  { %199 = vmatprep.subr.bf16.mxu0 %v227_v0  ;;  %212 = vmatprep.subr.bf16.mxu1 %v227_v0 }
  0x20   :  { %201 = vmatpush1.bf16.msra.mxu0 %v200_v31  ;;  %221 = vmatpush1.bf16.msra.mxu1 %v200_v31 }
  0x21   :  { %202 = vmatprep.subr.bf16.mxu0 %v227_v0  ;;  %213 = vmatprep.subr.bf16.mxu1 %v227_v0 }
  0x24   :  { %204 = vmatpush1.bf16.msra.mxu0 %v203_v34  ;;  %222 = vmatpush1.bf16.msra.mxu1 %v203_v34 }
  0x27   :  { %142 = vmatmul.mubr.f32.vlgmr.msra.gmra.mrb[0].mxu0 %v14_v35  ;;  %152 = vmatmul.mubr.f32.vlgmr.msra.gmra.mrb[0].mxu1 %v18_v36 }
  0x28   :  { %175 = vmatprep.mubr.msk.f32.mxu0 %vm64_vm0, %v17_v37  ;;  %177 = vmatprep.mubr.msk.f32.mxu1 %vm64_vm0, %v21_v38 }
  0x2b   :  { %147 = vmatmul.mubr.f32.gmra.mrb[2].mxu0 %v16_v39  ;;  %157 = vmatmul.mubr.f32.gmra.mrb[2].mxu1 %v20_v40 }
  0x86   :  { %v57_v41 = vpop.permute.xlu1 %56  ;;  %v47_v42 = vpop.permute.xlu0 %46 }
  0x8a   :  { %v62_v49 = vpop.permute.xlu1 %61  ;;  %v52_v50 = vpop.permute.xlu0 %51 }
  0xfa   :  { %v143_v43 = vpop.f32.mrb[0].mxu0  ;;  %v153_v44 = vpop.f32.mrb[0].mxu1 }
  0xfb   :  { %v144_v45 = vadd.f32 %v143_v43, %v47_v42  ;;  %v154_v46 = vadd.f32 %v153_v44, %v57_v41  ;;  %v145_v47 = vpop.f32.mrb[1].mxu0  ;;  %v155_v48 = vpop.f32.mrb[1].mxu1 }
  0xfd   :  { %v162_v51 = vmax.f32 %v144_v45, 0.0  ;;  %v164_v52 = vmax.f32 %v154_v46, 0.0 }
  0xfe   :  { %v148_v53 = vpop.f32.mrb[2].mxu0  ;;  %v158_v54 = vpop.f32.mrb[2].mxu1 }
  0xff   :  { %166 = vst [vmem:[%s376_s3] sm:$0xff] %v162_v51  ;;  %168 = vst [vmem:[%s376_s3 + $0x10] sm:$0xff] %v164_v52  ;;  %v149_v55 = vadd.f32 %v148_v53, %v52_v50  ;;  %v159_v56 = vadd.f32 %v158_v54, %v62_v49  ;;  %v150_v57 = vpop.f32.mrb[3].mxu0  ;;  %v160_v58 = vpop.f32.mrb[3].mxu1 }
 0x101   :  { %v163_v59 = vmax.f32 %v149_v55, 0.0  ;;  %v165_v60 = vmax.f32 %v159_v56, 0.0 }
 0x103   :  { %167 = vst [vmem:[%s376_s3 + $0x8] sm:$0xff] %v163_v59  ;;  %169 = vst [vmem:[%s376_s3 + $0x18] sm:$0xff] %v165_v60 }

// kernel: cnn_forward.10
= control target key start
LH: loop header
LB: loop body
LE: loop exit
PB: predicated region body
PF: predicated region fallthrough
CT: control target
= control target key end

     0   :  { %v532_v3 = vmov 0   ;;  %vm122_vm0 = vcmask 261120   ;;  %s789_s1 = inlined_call_operand.vmem [shape: f32[288,128], index: 1, kind: input, shape index: {}]   ;;  %s790_s0 = inlined_call_operand.vmem [shape: f32[64,288], index: 0, kind: input, shape index: {}]   ;;  %s791_s2 = inlined_call_operand.vmem [shape: f32[64,1], index: 2, kind: input, shape index: {}]   ;;  %s792_s3 = inlined_call_operand.vmem [shape: f32[64,128], index: 3, kind: output, shape index: {}]  }
   0x1   :  { %v54_v0 = vld [vmem:[%s789_s1 + $0x80] sm:$0xff]  ;;  %v55_v1 = vld [vmem:[%s789_s1 + $0x88] sm:$0xff]  ;;  %530 = vset.pattern.permute.xlu0 %v532_v3  ;;  %531 = vset.pattern.permute.xlu1 %v532_v3  ;;  %v56_v6 = vld [vmem:[%s789_s1 + $0x90] sm:$0xff] }
   0x2   :  { %v38_v2 = vld [vmem:[%s789_s1] sm:$0xff]  ;;  %v473_v4 = vpack.c.bf16 %v55_v1, %v54_v0  ;;  %v39_v5 = vld [vmem:[%s789_s1 + $0x8] sm:$0xff]  ;;  %v57_v7 = vld [vmem:[%s789_s1 + $0x98] sm:$0xff] }
   0x3   :  { %v475_v8 = vpack.c.bf16 %v39_v5, %v38_v2  ;;  %v477_v9 = vpack.c.bf16 %v57_v7, %v56_v6  ;;  %v40_v10 = vld [vmem:[%s789_s1 + $0x10] sm:$0xff]  ;;  %v41_v11 = vld [vmem:[%s789_s1 + $0x18] sm:$0xff]  ;;  %v58_v12 = vld [vmem:[%s789_s1 + $0xa0] sm:$0xff] }
   0x4   :  { %474 = vmatprep.subr.bf16.mxu0 %v473_v4  ;;  %513 = vmatprep.subr.bf16.mxu1 %v473_v4  ;;  %v59_v13 = vld [vmem:[%s789_s1 + $0xa8] sm:$0xff]  ;;  %v479_v14 = vpack.c.bf16 %v41_v11, %v40_v10  ;;  %v42_v16 = vld [vmem:[%s789_s1 + $0x20] sm:$0xff]  ;;  %v60_v18 = vld [vmem:[%s789_s1 + $0xb0] sm:$0xff] }
   0x5   :  { %476 = vmatpush3.bf16.msra.mxu0 %v475_v8  ;;  %521 = vmatpush3.bf16.msra.mxu1 %v475_v8  ;;  %v481_v15 = vpack.c.bf16 %v59_v13, %v58_v12  ;;  %v43_v17 = vld [vmem:[%s789_s1 + $0x28] sm:$0xff]  ;;  %v61_v19 = vld [vmem:[%s789_s1 + $0xb8] sm:$0xff]  ;;  %v44_v22 = vld [vmem:[%s789_s1 + $0x30] sm:$0xff] }
   0x6   :  { %478 = vmatprep.subr.bf16.mxu0 %v477_v9  ;;  %514 = vmatprep.subr.bf16.mxu1 %v477_v9  ;;  %v483_v20 = vpack.c.bf16 %v43_v17, %v42_v16  ;;  %v485_v21 = vpack.c.bf16 %v61_v19, %v60_v18  ;;  %v45_v23 = vld [vmem:[%s789_s1 + $0x38] sm:$0xff]  ;;  %v62_v24 = vld [vmem:[%s789_s1 + $0xc0] sm:$0xff]  ;;  %v63_v25 = vld [vmem:[%s789_s1 + $0xc8] sm:$0xff] }
   0x7   :  { %v15_v26 = vld [vmem:[%s790_s0 + $0x8] sm:$0xff]  ;;  %v33_v27 = vld [vmem:[%s790_s0 + $0x98] sm:$0xff]  ;;  %v487_v28 = vpack.c.bf16 %v45_v23, %v44_v22  ;;  %v489_v29 = vpack.c.bf16 %v63_v25, %v62_v24  ;;  %v46_v30 = vld [vmem:[%s789_s1 + $0x40] sm:$0xff] }
   0x8   :  { %211 = vmatprep.mubr.f32.mxu0 %v15_v26  ;;  %v47_v31 = vld [vmem:[%s789_s1 + $0x48] sm:$0xff]  ;;  %v64_v32 = vld [vmem:[%s789_s1 + $0xd0] sm:$0xff]  ;;  %v65_v33 = vld [vmem:[%s789_s1 + $0xd8] sm:$0xff]  ;;  %241 = vmatprep.mubr.f32.mxu1 %v33_v27 }
   0x9   :  { %480 = vmatpush3.bf16.msra.mxu0 %v479_v14  ;;  %522 = vmatpush3.bf16.msra.mxu1 %v479_v14  ;;  %v491_v34 = vpack.c.bf16 %v47_v31, %v46_v30  ;;  %v493_v35 = vpack.c.bf16 %v65_v33, %v64_v32  ;;  %v48_v36 = vld [vmem:[%s789_s1 + $0x50] sm:$0xff]  ;;  %v49_v37 = vld [vmem:[%s789_s1 + $0x58] sm:$0xff]  ;;  %v66_v38 = vld [vmem:[%s789_s1 + $0xe0] sm:$0xff] }
   0xa   :  { %482 = vmatprep.subr.bf16.mxu0 %v481_v15  ;;  %515 = vmatprep.subr.bf16.mxu1 %v481_v15  ;;  %v67_v39 = vld [vmem:[%s789_s1 + $0xe8] sm:$0xff]  ;;  %v495_v40 = vpack.c.bf16 %v49_v37, %v48_v36  ;;  %v74_v41 = vld [vmem:[%s791_s2] sm:$0xff]  ;;  %v76_v42 = vld [vmem:[%s791_s2 + $0x10] sm:$0xff] }
   0xb   :  { %v497_v43 = vpack.c.bf16 %v67_v39, %v66_v38  ;;  %v50_v44 = vld [vmem:[%s789_s1 + $0x60] sm:$0xff]  ;;  %v51_v45 = vld [vmem:[%s789_s1 + $0x68] sm:$0xff]  ;;  %v68_v46 = vld [vmem:[%s789_s1 + $0xf0] sm:$0xff]  ;;  %84 = vperm.xlu0 %530, %v74_v41   ;;  %94 = vperm.xlu1 %531, %v76_v42  }
   0xc   :  { %v69_v47 = vld [vmem:[%s789_s1 + $0xf8] sm:$0xff]  ;;  %v75_v48 = vld [vmem:[%s791_s2 + $0x8] sm:$0xff]  ;;  %v499_v50 = vpack.c.bf16 %v51_v45, %v50_v44  ;;  %v52_v52 = vld [vmem:[%s789_s1 + $0x70] sm:$0xff] }
   0xd   :  { %484 = vmatpush3.bf16.msra.mxu0 %v483_v20  ;;  %523 = vmatpush3.bf16.msra.mxu1 %v483_v20  ;;  %v77_v49 = vld [vmem:[%s791_s2 + $0x18] sm:$0xff]  ;;  %v501_v51 = vpack.c.bf16 %v69_v47, %v68_v46  ;;  %v70_v54 = vld [vmem:[%s789_s1 + $0x100] sm:$0xff]  ;;  %v71_v55 = vld [vmem:[%s789_s1 + $0x108] sm:$0xff] }
   0xe   :  { %486 = vmatprep.subr.bf16.mxu0 %v485_v21  ;;  %516 = vmatprep.subr.bf16.mxu1 %v485_v21  ;;  %v53_v53 = vld [vmem:[%s789_s1 + $0x78] sm:$0xff]  ;;  %v78_v56 = vld [vmem:[%s791_s2 + $0x20] sm:$0xff]  ;;  %v79_v57 = vld [vmem:[%s791_s2 + $0x28] sm:$0xff]  ;;  %v505_v59 = vpack.c.bf16 %v71_v55, %v70_v54 }
   0xf   :  { %89 = vperm.xlu0 %530, %v75_v48   ;;  %99 = vperm.xlu1 %531, %v77_v49   ;;  %v503_v58 = vpack.c.bf16 %v53_v53, %v52_v52  ;;  %v72_v60 = vld [vmem:[%s789_s1 + $0x110] sm:$0xff]  ;;  %v73_v61 = vld [vmem:[%s789_s1 + $0x118] sm:$0xff]  ;;  %v14_v0 = vld [vmem:[%s790_s0] sm:$0xff] }
  0x10   :  { %v80_v62 = vld [vmem:[%s791_s2 + $0x30] sm:$0xff]  ;;  %v81_v63 = vld [vmem:[%s791_s2 + $0x38] sm:$0xff]  ;;  %v18_v2 = vld [vmem:[%s790_s0 + $0x20] sm:$0xff]  ;;  %v509_v3 = vpack.c.bf16 %v73_v61, %v72_v60 }
  0x11   :  { %488 = vmatpush3.bf16.msra.mxu0 %v487_v28  ;;  %524 = vmatpush3.bf16.msra.mxu1 %v487_v28  ;;  %v32_v1 = vld [vmem:[%s790_s0 + $0x90] sm:$0xff]  ;;  %v17_v5 = vld [vmem:[%s790_s0 + $0x18] sm:$0xff]  ;;  %v35_v6 = vld [vmem:[%s790_s0 + $0xa8] sm:$0xff] }
  0x12   :  { %490 = vmatprep.subr.bf16.mxu0 %v489_v29  ;;  %517 = vmatprep.subr.bf16.mxu1 %v489_v29  ;;  %v36_v4 = vld [vmem:[%s790_s0 + $0xb0] sm:$0xff]  ;;  %v21_v7 = vld [vmem:[%s790_s0 + $0x38] sm:$0xff]  ;;  %v19_v10 = vld [vmem:[%s790_s0 + $0x28] sm:$0xff] }
  0x13   :  { %104 = vperm.xlu0 %530, %v78_v56   ;;  %109 = vperm.xlu1 %531, %v79_v57   ;;  %v16_v8 = vld [vmem:[%s790_s0 + $0x10] sm:$0xff]  ;;  %v22_v12 = vld [vmem:[%s790_s0 + $0x40] sm:$0xff]  ;;  %v23_v13 = vld [vmem:[%s790_s0 + $0x48] sm:$0xff] }
  0x14   :  { %v20_v9 = vld [vmem:[%s790_s0 + $0x30] sm:$0xff]  ;;  %v25_v14 = vld [vmem:[%s790_s0 + $0x58] sm:$0xff]  ;;  %v27_v15 = vld [vmem:[%s790_s0 + $0x68] sm:$0xff] }
  0x15   :  { %492 = vmatpush3.bf16.msra.mxu0 %v491_v34  ;;  %525 = vmatpush3.bf16.msra.mxu1 %v491_v34  ;;  %v24_v11 = vld [vmem:[%s790_s0 + $0x50] sm:$0xff]  ;;  %v26_v17 = vld [vmem:[%s790_s0 + $0x60] sm:$0xff]  ;;  %v31_v18 = vld [vmem:[%s790_s0 + $0x88] sm:$0xff] }
  0x16   :  { %494 = vmatprep.subr.bf16.mxu0 %v493_v35  ;;  %518 = vmatprep.subr.bf16.mxu1 %v493_v35  ;;  %v28_v16 = vld [vmem:[%s790_s0 + $0x70] sm:$0xff]  ;;  %v30_v19 = vld [vmem:[%s790_s0 + $0x80] sm:$0xff]  ;;  %v29_v21 = vld [vmem:[%s790_s0 + $0x78] sm:$0xff] }
  0x17   :  { %114 = vperm.xlu0 %530, %v80_v62   ;;  %119 = vperm.xlu1 %531, %v81_v63   ;;  %v34_v20 = vld [vmem:[%s790_s0 + $0xa0] sm:$0xff]  ;;  %v37_v22 = vld [vmem:[%s790_s0 + $0xb8] sm:$0xff] }
  0x19   :  { %496 = vmatpush3.bf16.msra.mxu0 %v495_v40  ;;  %526 = vmatpush3.bf16.msra.mxu1 %v495_v40 }
  0x1a   :  { %498 = vmatprep.subr.bf16.mxu0 %v497_v43  ;;  %519 = vmatprep.subr.bf16.mxu1 %v497_v43 }
  0x1d   :  { %500 = vmatpush3.bf16.msra.mxu0 %v499_v50  ;;  %527 = vmatpush3.bf16.msra.mxu1 %v499_v50 }
  0x1e   :  { %502 = vmatprep.subr.bf16.mxu0 %v501_v51  ;;  %520 = vmatprep.subr.bf16.mxu1 %v501_v51 }
  0x21   :  { %504 = vmatpush3.bf16.msra.mxu0 %v503_v58  ;;  %528 = vmatpush3.bf16.msra.mxu1 %v503_v58 }
  0x22   :  { %506 = vmatprep.subr.bf16.mxu1 %v505_v59 }
  0x24   :  { %212 = vmatmul.mubr.f32.vlgmr.msra.gmra.mrb[0].mxu0 %v14_v0  ;;  %242 = vmatmul.mubr.f32.vlgmr.msra.gmra.mrb[0].mxu1 %v32_v1 }
  0x25   :  { %508 = vmatpush3.bf16.msra.mxu1 %v505_v59  ;;  %216 = vmatprep.mubr.f32.mxu0 %v18_v2 }
  0x26   :  { %246 = vmatprep.mubr.f32.mxu1 %v36_v4  ;;  %510 = vmatprep.subr.bf16.mxu1 %v509_v3 }
  0x28   :  { %217 = vmatmul.mubr.f32.gmra.mrb[2].mxu0 %v17_v5  ;;  %247 = vmatmul.mubr.f32.gmra.mrb[2].mxu1 %v35_v6 }
  0x29   :  { %512 = vmatpush3.bf16.msra.mxu1 %v509_v3  ;;  %221 = vmatprep.mubr.f32.mxu0 %v21_v7 }
  0x2a   :  { %461 = vmatprep.mubr.msk.f32.mxu1 %vm122_vm0, %v16_v8 }
  0x2c   :  { %222 = vmatmul.mubr.f32.gmra.mrb[4].mxu0 %v20_v9  ;;  %462 = vmatmul.mubr.msk.f32.vlgmr.msra.gmra.mrb[4].mxu1 %vm122_vm0, %v19_v10 }
  0x2d   :  { %226 = vmatprep.mubr.f32.mxu0 %v24_v11  ;;  %464 = vmatprep.mubr.msk.f32.mxu1 %vm122_vm0, %v22_v12 }
  0x30   :  { %227 = vmatmul.mubr.f32.gmra.mrb[6].mxu0 %v23_v13  ;;  %465 = vmatmul.mubr.msk.f32.gmra.mrb[6].mxu1 %vm122_vm0, %v25_v14 }
  0x31   :  { %231 = vmatprep.mubr.f32.mxu0 %v27_v15  ;;  %467 = vmatprep.mubr.msk.f32.mxu1 %vm122_vm0, %v28_v16 }
  0x34   :  { %232 = vmatmul.mubr.f32.gmra.mrb[8].mxu0 %v26_v17  ;;  %468 = vmatmul.mubr.msk.f32.gmra.mrb[8].mxu1 %vm122_vm0, %v31_v18 }
  0x35   :  { %236 = vmatprep.mubr.f32.mxu0 %v30_v19  ;;  %470 = vmatprep.mubr.msk.f32.mxu1 %vm122_vm0, %v34_v20 }
  0x38   :  { %237 = vmatmul.mubr.f32.gmra.mrb[10].mxu0 %v29_v21  ;;  %471 = vmatmul.mubr.msk.f32.gmra.mrb[10].mxu1 %vm122_vm0, %v37_v22 }
  0x8a   :  { %v85_v23 = vpop.permute.xlu0 %84  ;;  %v95_v24 = vpop.permute.xlu1 %94 }
  0x8e   :  { %v90_v25 = vpop.permute.xlu0 %89  ;;  %v100_v26 = vpop.permute.xlu1 %99 }
  0x92   :  { %v105_v39 = vpop.permute.xlu0 %104  ;;  %v110_v40 = vpop.permute.xlu1 %109 }
  0x96   :  { %v115_v59 = vpop.permute.xlu0 %114  ;;  %v120_v60 = vpop.permute.xlu1 %119 }
  0xf7   :  { %v417_v27 = vpop.f32.mrb[0].mxu0  ;;  %v435_v28 = vpop.f32.mrb[0].mxu1 }
  0xf8   :  { %v418_v29 = vpop.f32.mrb[1].mxu0  ;;  %v436_v30 = vpop.f32.mrb[1].mxu1 }
  0xf9   :  { %v419_v31 = vadd.f32 %v418_v29, %v417_v27  ;;  %v437_v32 = vadd.f32 %v436_v30, %v435_v28 }
  0xfb   :  { %v420_v33 = vpop.f32.mrb[2].mxu0  ;;  %v438_v34 = vpop.f32.mrb[2].mxu1  ;;  %v214_v44 = vadd.f32 %v419_v31, %v85_v23  ;;  %v244_v6 = vadd.f32 %v437_v32, %v115_v59 }
  0xfc   :  { %v421_v35 = vpop.f32.mrb[3].mxu0  ;;  %v439_v36 = vpop.f32.mrb[3].mxu1 }
  0xfd   :  { %v422_v37 = vadd.f32 %v421_v35, %v420_v33  ;;  %v440_v38 = vadd.f32 %v439_v36, %v438_v34 }
  0xff   :  { %v423_v41 = vpop.f32.mrb[4].mxu0  ;;  %v219_v42 = vadd.f32 %v422_v37, %v90_v25  ;;  %v463_v43 = vpop.f32.mrb[4].mxu1  ;;  %v249_v5 = vadd.f32 %v440_v38, %v120_v60 }
 0x100   :  { %v424_v45 = vpop.f32.mrb[5].mxu0  ;;  %v318_v46 = vpop.f32.mrb[5].mxu1 }
 0x101   :  { %v324_v47 = vadd.f32 %v463_v43, %v219_v42  ;;  %v425_v48 = vadd.f32 %v424_v45, %v423_v41  ;;  %v319_v49 = vadd.f32 %v318_v46, %v214_v44 }
 0x103   :  { %v358_v50 = vmax.f32 %v324_v47, 0.0  ;;  %v357_v51 = vmax.f32 %v319_v49, 0.0  ;;  %v426_v52 = vpop.f32.mrb[6].mxu0  ;;  %v466_v53 = vpop.f32.mrb[6].mxu1  ;;  %v224_v54 = vadd.f32 %v425_v48, %v95_v24 }
 0x104   :  { %v427_v55 = vpop.f32.mrb[7].mxu0  ;;  %v328_v56 = vpop.f32.mrb[7].mxu1 }
 0x105   :  { %366 = vst [vmem:[%s792_s3 + $0x8] sm:$0xff] %v358_v50  ;;  %365 = vst [vmem:[%s792_s3] sm:$0xff] %v357_v51  ;;  %v428_v57 = vadd.f32 %v427_v55, %v426_v52  ;;  %v329_v58 = vadd.f32 %v328_v56, %v224_v54 }
 0x107   :  { %v229_v61 = vadd.f32 %v428_v57, %v100_v26  ;;  %v359_v62 = vmax.f32 %v329_v58, 0.0  ;;  %v429_v63 = vpop.f32.mrb[8].mxu0  ;;  %v469_v0 = vpop.f32.mrb[8].mxu1 }
 0x108   :  { %v430_v1 = vpop.f32.mrb[9].mxu0  ;;  %v338_v2 = vpop.f32.mrb[9].mxu1 }
 0x109   :  { %v334_v3 = vadd.f32 %v466_v53, %v229_v61  ;;  %367 = vst [vmem:[%s792_s3 + $0x10] sm:$0xff] %v359_v62  ;;  %v431_v4 = vadd.f32 %v430_v1, %v429_v63 }
 0x10b   :  { %v360_v7 = vmax.f32 %v334_v3, 0.0  ;;  %v234_v8 = vadd.f32 %v431_v4, %v105_v39  ;;  %v432_v9 = vpop.f32.mrb[10].mxu0  ;;  %v472_v10 = vpop.f32.mrb[10].mxu1 }
 0x10c   :  { %v354_v11 = vadd.f32 %v472_v10, %v249_v5  ;;  %v433_v12 = vpop.f32.mrb[11].mxu0  ;;  %v348_v13 = vpop.f32.mrb[11].mxu1 }
 0x10d   :  { %368 = vst [vmem:[%s792_s3 + $0x18] sm:$0xff] %v360_v7  ;;  %v339_v14 = vadd.f32 %v338_v2, %v234_v8  ;;  %v434_v15 = vadd.f32 %v433_v12, %v432_v9  ;;  %v349_v16 = vadd.f32 %v348_v13, %v244_v6 }
 0x10e   :  { %v364_v17 = vmax.f32 %v354_v11, 0.0 }
 0x10f   :  { %v361_v18 = vmax.f32 %v339_v14, 0.0  ;;  %v239_v19 = vadd.f32 %v434_v15, %v110_v40  ;;  %v363_v20 = vmax.f32 %v349_v16, 0.0 }
 0x110   :  { %372 = vst [vmem:[%s792_s3 + $0x38] sm:$0xff] %v364_v17 }
 0x111   :  { %369 = vst [vmem:[%s792_s3 + $0x20] sm:$0xff] %v361_v18  ;;  %v344_v21 = vadd.f32 %v469_v0, %v239_v19  ;;  %371 = vst [vmem:[%s792_s3 + $0x30] sm:$0xff] %v363_v20 }
 0x113   :  { %v362_v22 = vmax.f32 %v344_v21, 0.0 }
 0x115   :  { %370 = vst [vmem:[%s792_s3 + $0x28] sm:$0xff] %v362_v22 }

// kernel: cnn_forward.11
= control target key start
LH: loop header
LB: loop body
LE: loop exit
PB: predicated region body
PF: predicated region fallthrough
CT: control target
= control target key end

     0   :  { %v1097_v3 = vmov 0   ;;  %vm262_vm0 = vcmask 523264   ;;  %s1713_s1 = inlined_call_operand.vmem [shape: f32[576,128], index: 1, kind: input, shape index: {}]   ;;  %s1714_s0 = inlined_call_operand.vmem [shape: f32[128,576], index: 0, kind: input, shape index: {}]   ;;  %s1715_s2 = inlined_call_operand.vmem [shape: f32[128,1], index: 2, kind: input, shape index: {}]   ;;  %s1716_s3 = inlined_call_operand.vmem [shape: f32[128,128], index: 3, kind: output, shape index: {}]  }
   0x1   :  { %v110_v0 = vld [vmem:[%s1713_s1 + $0x80] sm:$0xff]  ;;  %v111_v1 = vld [vmem:[%s1713_s1 + $0x88] sm:$0xff]  ;;  %1095 = vset.pattern.permute.xlu0 %v1097_v3  ;;  %1096 = vset.pattern.permute.xlu1 %v1097_v3  ;;  %v112_v12 = vld [vmem:[%s1713_s1 + $0x90] sm:$0xff] }
   0x2   :  { %v142_v2 = vld [vmem:[%s1713_s1 + $0x180] sm:$0xff]  ;;  %v1006_v4 = vpack.c.bf16 %v111_v1, %v110_v0  ;;  %v143_v5 = vld [vmem:[%s1713_s1 + $0x188] sm:$0xff]  ;;  %v113_v14 = vld [vmem:[%s1713_s1 + $0x98] sm:$0xff] }
   0x3   :  { %v94_v6 = vld [vmem:[%s1713_s1] sm:$0xff]  ;;  %v95_v7 = vld [vmem:[%s1713_s1 + $0x8] sm:$0xff]  ;;  %v1038_v8 = vpack.c.bf16 %v143_v5, %v142_v2  ;;  %v144_v15 = vld [vmem:[%s1713_s1 + $0x190] sm:$0xff]  ;;  %v1010_v17 = vpack.c.bf16 %v113_v14, %v112_v12 }
   0x4   :  { %v1008_v9 = vpack.c.bf16 %v95_v7, %v94_v6  ;;  %v126_v10 = vld [vmem:[%s1713_s1 + $0x100] sm:$0xff]  ;;  %v127_v11 = vld [vmem:[%s1713_s1 + $0x108] sm:$0xff]  ;;  %1007 = vmatprep.subr.bf16.mxu0 %v1006_v4  ;;  %v145_v16 = vld [vmem:[%s1713_s1 + $0x198] sm:$0xff] }
   0x5   :  { %v1040_v13 = vpack.c.bf16 %v127_v11, %v126_v10  ;;  %1039 = vmatprep.subr.bf16.mxu1 %v1038_v8  ;;  %v1042_v18 = vpack.c.bf16 %v145_v16, %v144_v15  ;;  %v96_v19 = vld [vmem:[%s1713_s1 + $0x10] sm:$0xff]  ;;  %v97_v20 = vld [vmem:[%s1713_s1 + $0x18] sm:$0xff]  ;;  %v114_v24 = vld [vmem:[%s1713_s1 + $0xa0] sm:$0xff] }
   0x6   :  { %1009 = vmatpush3.bf16.msra.mxu0 %v1008_v9  ;;  %v128_v21 = vld [vmem:[%s1713_s1 + $0x110] sm:$0xff]  ;;  %v1012_v22 = vpack.c.bf16 %v97_v20, %v96_v19  ;;  %v129_v23 = vld [vmem:[%s1713_s1 + $0x118] sm:$0xff]  ;;  %v115_v25 = vld [vmem:[%s1713_s1 + $0xa8] sm:$0xff] }
   0x7   :  { %1041 = vmatpush3.bf16.msra.mxu1 %v1040_v13  ;;  %1011 = vmatprep.subr.bf16.mxu0 %v1010_v17  ;;  %v1044_v26 = vpack.c.bf16 %v129_v23, %v128_v21  ;;  %v1014_v27 = vpack.c.bf16 %v115_v25, %v114_v24  ;;  %v146_v28 = vld [vmem:[%s1713_s1 + $0x1a0] sm:$0xff]  ;;  %v147_v29 = vld [vmem:[%s1713_s1 + $0x1a8] sm:$0xff]  ;;  %v116_v36 = vld [vmem:[%s1713_s1 + $0xb0] sm:$0xff] }
   0x8   :  { %1043 = vmatprep.subr.bf16.mxu1 %v1042_v18  ;;  %v98_v30 = vld [vmem:[%s1713_s1 + $0x20] sm:$0xff]  ;;  %v1046_v31 = vpack.c.bf16 %v147_v29, %v146_v28  ;;  %v99_v32 = vld [vmem:[%s1713_s1 + $0x28] sm:$0xff]  ;;  %v117_v37 = vld [vmem:[%s1713_s1 + $0xb8] sm:$0xff] }
   0x9   :  { %v130_v33 = vld [vmem:[%s1713_s1 + $0x120] sm:$0xff]  ;;  %v131_v34 = vld [vmem:[%s1713_s1 + $0x128] sm:$0xff]  ;;  %v1016_v35 = vpack.c.bf16 %v99_v32, %v98_v30  ;;  %v148_v38 = vld [vmem:[%s1713_s1 + $0x1b0] sm:$0xff]  ;;  %v1018_v40 = vpack.c.bf16 %v117_v37, %v116_v36 }
   0xa   :  { %1013 = vmatpush3.bf16.msra.mxu0 %v1012_v22  ;;  %v1048_v39 = vpack.c.bf16 %v131_v34, %v130_v33  ;;  %v149_v41 = vld [vmem:[%s1713_s1 + $0x1b8] sm:$0xff]  ;;  %v100_v42 = vld [vmem:[%s1713_s1 + $0x30] sm:$0xff]  ;;  %v118_v47 = vld [vmem:[%s1713_s1 + $0xc0] sm:$0xff] }
   0xb   :  { %1045 = vmatpush3.bf16.msra.mxu1 %v1044_v26  ;;  %1015 = vmatprep.subr.bf16.mxu0 %v1014_v27  ;;  %v101_v43 = vld [vmem:[%s1713_s1 + $0x38] sm:$0xff]  ;;  %v1050_v44 = vpack.c.bf16 %v149_v41, %v148_v38  ;;  %v132_v45 = vld [vmem:[%s1713_s1 + $0x130] sm:$0xff]  ;;  %v119_v48 = vld [vmem:[%s1713_s1 + $0xc8] sm:$0xff] }
   0xc   :  { %1047 = vmatprep.subr.bf16.mxu1 %v1046_v31  ;;  %v133_v46 = vld [vmem:[%s1713_s1 + $0x138] sm:$0xff]  ;;  %v150_v49 = vld [vmem:[%s1713_s1 + $0x1c0] sm:$0xff]  ;;  %v151_v50 = vld [vmem:[%s1713_s1 + $0x1c8] sm:$0xff]  ;;  %v1020_v51 = vpack.c.bf16 %v101_v43, %v100_v42  ;;  %v1022_v53 = vpack.c.bf16 %v119_v48, %v118_v47 }
   0xd   :  { %v1052_v52 = vpack.c.bf16 %v133_v46, %v132_v45  ;;  %v102_v54 = vld [vmem:[%s1713_s1 + $0x40] sm:$0xff]  ;;  %v103_v55 = vld [vmem:[%s1713_s1 + $0x48] sm:$0xff]  ;;  %v1054_v57 = vpack.c.bf16 %v151_v50, %v150_v49  ;;  %v120_v59 = vld [vmem:[%s1713_s1 + $0xd0] sm:$0xff] }
   0xe   :  { %1017 = vmatpush3.bf16.msra.mxu0 %v1016_v35  ;;  %v134_v56 = vld [vmem:[%s1713_s1 + $0x140] sm:$0xff]  ;;  %v135_v58 = vld [vmem:[%s1713_s1 + $0x148] sm:$0xff]  ;;  %v121_v60 = vld [vmem:[%s1713_s1 + $0xd8] sm:$0xff]  ;;  %v1024_v63 = vpack.c.bf16 %v103_v55, %v102_v54 }
   0xf   :  { %1049 = vmatpush3.bf16.msra.mxu1 %v1048_v39  ;;  %1019 = vmatprep.subr.bf16.mxu0 %v1018_v40  ;;  %v152_v61 = vld [vmem:[%s1713_s1 + $0x1d0] sm:$0xff]  ;;  %v153_v62 = vld [vmem:[%s1713_s1 + $0x1d8] sm:$0xff]  ;;  %v1056_v0 = vpack.c.bf16 %v135_v58, %v134_v56  ;;  %v1026_v1 = vpack.c.bf16 %v121_v60, %v120_v59  ;;  %v122_v7 = vld [vmem:[%s1713_s1 + $0xe0] sm:$0xff] }
  0x10   :  { %1051 = vmatprep.subr.bf16.mxu1 %v1050_v44  ;;  %v104_v2 = vld [vmem:[%s1713_s1 + $0x50] sm:$0xff]  ;;  %v105_v3 = vld [vmem:[%s1713_s1 + $0x58] sm:$0xff]  ;;  %v1058_v5 = vpack.c.bf16 %v153_v62, %v152_v61  ;;  %v123_v8 = vld [vmem:[%s1713_s1 + $0xe8] sm:$0xff] }
  0x11   :  { %v136_v4 = vld [vmem:[%s1713_s1 + $0x150] sm:$0xff]  ;;  %v137_v6 = vld [vmem:[%s1713_s1 + $0x158] sm:$0xff]  ;;  %v154_v9 = vld [vmem:[%s1713_s1 + $0x1e0] sm:$0xff]  ;;  %v1028_v11 = vpack.c.bf16 %v105_v3, %v104_v2  ;;  %v1030_v15 = vpack.c.bf16 %v123_v8, %v122_v7 }
  0x12   :  { %1021 = vmatpush3.bf16.msra.mxu0 %v1020_v51  ;;  %v155_v10 = vld [vmem:[%s1713_s1 + $0x1e8] sm:$0xff]  ;;  %v106_v12 = vld [vmem:[%s1713_s1 + $0x60] sm:$0xff]  ;;  %v1060_v14 = vpack.c.bf16 %v137_v6, %v136_v4  ;;  %v17_v18 = vld [vmem:[%s1714_s0 + $0x18] sm:$0xff] }
  0x13   :  { %1053 = vmatpush3.bf16.msra.mxu1 %v1052_v52  ;;  %1023 = vmatprep.subr.bf16.mxu0 %v1022_v53  ;;  %v107_v13 = vld [vmem:[%s1713_s1 + $0x68] sm:$0xff]  ;;  %v138_v16 = vld [vmem:[%s1713_s1 + $0x160] sm:$0xff]  ;;  %v1062_v19 = vpack.c.bf16 %v155_v10, %v154_v9  ;;  %v124_v21 = vld [vmem:[%s1713_s1 + $0xf0] sm:$0xff] }
  0x14   :  { %1055 = vmatprep.subr.bf16.mxu1 %v1054_v57  ;;  %v15_v17 = vld [vmem:[%s1714_s0 + $0x8] sm:$0xff]  ;;  %v125_v22 = vld [vmem:[%s1713_s1 + $0xf8] sm:$0xff]  ;;  %v156_v23 = vld [vmem:[%s1713_s1 + $0x1f0] sm:$0xff]  ;;  %520 = vmatprep.mubr.f32.mxu1 %v17_v18  ;;  %v1032_v25 = vpack.c.bf16 %v107_v13, %v106_v12 }
  0x15   :  { %v139_v20 = vld [vmem:[%s1713_s1 + $0x168] sm:$0xff]  ;;  %375 = vmatprep.mubr.f32.mxu0 %v15_v17  ;;  %v157_v24 = vld [vmem:[%s1713_s1 + $0x1f8] sm:$0xff]  ;;  %v1034_v27 = vpack.c.bf16 %v125_v22, %v124_v21  ;;  %v108_v28 = vld [vmem:[%s1713_s1 + $0x70] sm:$0xff] }
  0x16   :  { %1025 = vmatpush3.bf16.msra.mxu0 %v1024_v63  ;;  %v1064_v26 = vpack.c.bf16 %v139_v20, %v138_v16  ;;  %v109_v29 = vld [vmem:[%s1713_s1 + $0x78] sm:$0xff]  ;;  %v140_v30 = vld [vmem:[%s1713_s1 + $0x170] sm:$0xff]  ;;  %v1066_v31 = vpack.c.bf16 %v157_v24, %v156_v23  ;;  %v158_v33 = vld [vmem:[%s1713_s1 + $0x200] sm:$0xff] }
  0x17   :  { %1057 = vmatpush3.bf16.msra.mxu1 %v1056_v0  ;;  %1027 = vmatprep.subr.bf16.mxu0 %v1026_v1  ;;  %v141_v32 = vld [vmem:[%s1713_s1 + $0x178] sm:$0xff]  ;;  %v159_v34 = vld [vmem:[%s1713_s1 + $0x208] sm:$0xff]  ;;  %v1036_v35 = vpack.c.bf16 %v109_v29, %v108_v28  ;;  %v160_v38 = vld [vmem:[%s1713_s1 + $0x210] sm:$0xff] }
  0x18   :  { %1059 = vmatprep.subr.bf16.mxu1 %v1058_v5  ;;  %v1068_v36 = vpack.c.bf16 %v141_v32, %v140_v30  ;;  %v1070_v37 = vpack.c.bf16 %v159_v34, %v158_v33  ;;  %v161_v39 = vld [vmem:[%s1713_s1 + $0x218] sm:$0xff]  ;;  %v14_v40 = vld [vmem:[%s1714_s0] sm:$0xff]  ;;  %v16_v41 = vld [vmem:[%s1714_s0 + $0x10] sm:$0xff] }
  0x19   :  { %v20_v42 = vld [vmem:[%s1714_s0 + $0x30] sm:$0xff]  ;;  %v1074_v43 = vpack.c.bf16 %v161_v39, %v160_v38  ;;  %v22_v44 = vld [vmem:[%s1714_s0 + $0x40] sm:$0xff]  ;;  %v163_v46 = vld [vmem:[%s1713_s1 + $0x228] sm:$0xff] }
  0x1a   :  { %1029 = vmatpush3.bf16.msra.mxu0 %v1028_v11  ;;  %v162_v45 = vld [vmem:[%s1713_s1 + $0x220] sm:$0xff]  ;;  %v19_v47 = vld [vmem:[%s1714_s0 + $0x28] sm:$0xff]  ;;  %v21_v48 = vld [vmem:[%s1714_s0 + $0x38] sm:$0xff] }
  0x1b   :  { %1061 = vmatpush3.bf16.msra.mxu1 %v1060_v14  ;;  %1031 = vmatprep.subr.bf16.mxu0 %v1030_v15  ;;  %v25_v49 = vld [vmem:[%s1714_s0 + $0x58] sm:$0xff]  ;;  %v27_v50 = vld [vmem:[%s1714_s0 + $0x68] sm:$0xff]  ;;  %v1078_v51 = vpack.c.bf16 %v163_v46, %v162_v45  ;;  %v24_v52 = vld [vmem:[%s1714_s0 + $0x50] sm:$0xff] }
  0x1c   :  { %1063 = vmatprep.subr.bf16.mxu1 %v1062_v19  ;;  %v164_v53 = vld [vmem:[%s1713_s1 + $0x230] sm:$0xff]  ;;  %v26_v54 = vld [vmem:[%s1714_s0 + $0x60] sm:$0xff]  ;;  %v165_v56 = vld [vmem:[%s1713_s1 + $0x238] sm:$0xff] }
  0x1d   :  { %v30_v55 = vld [vmem:[%s1714_s0 + $0x80] sm:$0xff]  ;;  %v32_v57 = vld [vmem:[%s1714_s0 + $0x90] sm:$0xff]  ;;  %v1082_v58 = vpack.c.bf16 %v165_v56, %v164_v53  ;;  %v29_v59 = vld [vmem:[%s1714_s0 + $0x78] sm:$0xff] }
  0x1e   :  { %1033 = vmatpush3.bf16.msra.mxu0 %v1032_v25  ;;  %v31_v60 = vld [vmem:[%s1714_s0 + $0x88] sm:$0xff]  ;;  %v37_v62 = vld [vmem:[%s1714_s0 + $0xb8] sm:$0xff]  ;;  %v34_v63 = vld [vmem:[%s1714_s0 + $0xa0] sm:$0xff] }
  0x1f   :  { %1065 = vmatpush3.bf16.msra.mxu1 %v1064_v26  ;;  %1035 = vmatprep.subr.bf16.mxu0 %v1034_v27  ;;  %v35_v61 = vld [vmem:[%s1714_s0 + $0xa8] sm:$0xff]  ;;  %v36_v0 = vld [vmem:[%s1714_s0 + $0xb0] sm:$0xff]  ;;  %v42_v2 = vld [vmem:[%s1714_s0 + $0xe0] sm:$0xff] }
  0x20   :  { %1067 = vmatprep.subr.bf16.mxu1 %v1066_v31  ;;  %v40_v1 = vld [vmem:[%s1714_s0 + $0xd0] sm:$0xff]  ;;  %v166_v3 = vld [vmem:[%s1715_s2] sm:$0xff]  ;;  %v39_v5 = vld [vmem:[%s1714_s0 + $0xc8] sm:$0xff] }
  0x21   :  { %184 = vperm.xlu0 %1095, %v166_v3   ;;  %v168_v4 = vld [vmem:[%s1715_s2 + $0x10] sm:$0xff]  ;;  %v167_v6 = vld [vmem:[%s1715_s2 + $0x8] sm:$0xff]  ;;  %v41_v7 = vld [vmem:[%s1714_s0 + $0xd8] sm:$0xff] }
  0x22   :  { %1037 = vmatpush3.bf16.msra.mxu0 %v1036_v35  ;;  %v45_v8 = vld [vmem:[%s1714_s0 + $0xf8] sm:$0xff]  ;;  %194 = vperm.xlu1 %1096, %v168_v4   ;;  %v47_v9 = vld [vmem:[%s1714_s0 + $0x108] sm:$0xff]  ;;  %v44_v11 = vld [vmem:[%s1714_s0 + $0xf0] sm:$0xff] }
  0x23   :  { %1069 = vmatpush3.bf16.msra.mxu1 %v1068_v36  ;;  %1071 = vmatprep.subr.bf16.mxu0 %v1070_v37  ;;  %v169_v10 = vld [vmem:[%s1715_s2 + $0x18] sm:$0xff]  ;;  %v170_v12 = vld [vmem:[%s1715_s2 + $0x20] sm:$0xff]  ;;  %v52_v15 = vld [vmem:[%s1714_s0 + $0x130] sm:$0xff] }
  0x24   :  { %1086 = vmatprep.subr.bf16.mxu1 %v1070_v37  ;;  %v46_v13 = vld [vmem:[%s1714_s0 + $0x100] sm:$0xff]  ;;  %v171_v16 = vld [vmem:[%s1715_s2 + $0x28] sm:$0xff]  ;;  %v49_v17 = vld [vmem:[%s1714_s0 + $0x118] sm:$0xff] }
  0x25   :  { %376 = vmatmul.mubr.f32.vlgmr.msra.gmra.mrb[0].mxu0 %v14_v40  ;;  %189 = vperm.xlu0 %1095, %v167_v6   ;;  %v50_v14 = vld [vmem:[%s1714_s0 + $0x120] sm:$0xff]  ;;  %v172_v18 = vld [vmem:[%s1715_s2 + $0x30] sm:$0xff]  ;;  %v51_v19 = vld [vmem:[%s1714_s0 + $0x128] sm:$0xff] }
  0x26   :  { %521 = vmatmul.mubr.f32.vlgmr.msra.gmra.mrb[0].mxu1 %v16_v41  ;;  %1073 = vmatpush3.bf16.msra.mxu0 %v1070_v37  ;;  %v55_v20 = vld [vmem:[%s1714_s0 + $0x148] sm:$0xff]  ;;  %v57_v21 = vld [vmem:[%s1714_s0 + $0x158] sm:$0xff]  ;;  %v54_v23 = vld [vmem:[%s1714_s0 + $0x140] sm:$0xff] }
  0x27   :  { %1090 = vmatpush3.bf16.msra.mxu1 %v1070_v37  ;;  %380 = vmatprep.mubr.f32.mxu0 %v20_v42  ;;  %v173_v22 = vld [vmem:[%s1715_s2 + $0x38] sm:$0xff]  ;;  %v174_v24 = vld [vmem:[%s1715_s2 + $0x40] sm:$0xff]  ;;  %v56_v25 = vld [vmem:[%s1714_s0 + $0x150] sm:$0xff] }
  0x28   :  { %525 = vmatprep.mubr.f32.mxu1 %v22_v44  ;;  %1075 = vmatprep.subr.bf16.mxu0 %v1074_v43  ;;  %v60_v26 = vld [vmem:[%s1714_s0 + $0x170] sm:$0xff]  ;;  %v62_v27 = vld [vmem:[%s1714_s0 + $0x180] sm:$0xff]  ;;  %v175_v28 = vld [vmem:[%s1715_s2 + $0x48] sm:$0xff] }
  0x29   :  { %381 = vmatmul.mubr.f32.gmra.mrb[2].mxu0 %v19_v47  ;;  %1087 = vmatprep.subr.bf16.mxu1 %v1074_v43  ;;  %v59_v29 = vld [vmem:[%s1714_s0 + $0x168] sm:$0xff]  ;;  %v176_v30 = vld [vmem:[%s1715_s2 + $0x50] sm:$0xff]  ;;  %v61_v31 = vld [vmem:[%s1714_s0 + $0x178] sm:$0xff] }
  0x2a   :  { %526 = vmatmul.mubr.f32.gmra.mrb[2].mxu1 %v21_v48  ;;  %385 = vmatprep.mubr.f32.mxu0 %v25_v49  ;;  %v65_v32 = vld [vmem:[%s1714_s0 + $0x198] sm:$0xff]  ;;  %v67_v33 = vld [vmem:[%s1714_s0 + $0x1a8] sm:$0xff]  ;;  %v64_v35 = vld [vmem:[%s1714_s0 + $0x190] sm:$0xff] }
  0x2b   :  { %530 = vmatprep.mubr.f32.mxu1 %v27_v50  ;;  %1077 = vmatpush3.bf16.msra.mxu0 %v1074_v43  ;;  %v177_v34 = vld [vmem:[%s1715_s2 + $0x58] sm:$0xff]  ;;  %v178_v36 = vld [vmem:[%s1715_s2 + $0x60] sm:$0xff]  ;;  %v72_v39 = vld [vmem:[%s1714_s0 + $0x1d0] sm:$0xff] }
  0x2c   :  { %1091 = vmatpush3.bf16.msra.mxu1 %v1074_v43  ;;  %1079 = vmatprep.subr.bf16.mxu0 %v1078_v51  ;;  %v66_v37 = vld [vmem:[%s1714_s0 + $0x1a0] sm:$0xff]  ;;  %v179_v40 = vld [vmem:[%s1715_s2 + $0x68] sm:$0xff]  ;;  %v69_v41 = vld [vmem:[%s1714_s0 + $0x1b8] sm:$0xff] }
  0x2d   :  { %386 = vmatmul.mubr.f32.gmra.mrb[4].mxu0 %v24_v52  ;;  %1088 = vmatprep.subr.bf16.mxu1 %v1078_v51  ;;  %v70_v38 = vld [vmem:[%s1714_s0 + $0x1c0] sm:$0xff]  ;;  %v180_v42 = vld [vmem:[%s1715_s2 + $0x70] sm:$0xff]  ;;  %v71_v43 = vld [vmem:[%s1714_s0 + $0x1c8] sm:$0xff] }
  0x2e   :  { %531 = vmatmul.mubr.f32.gmra.mrb[4].mxu1 %v26_v54  ;;  %390 = vmatprep.mubr.f32.mxu0 %v30_v55  ;;  %v75_v44 = vld [vmem:[%s1714_s0 + $0x1e8] sm:$0xff]  ;;  %v77_v45 = vld [vmem:[%s1714_s0 + $0x1f8] sm:$0xff]  ;;  %v74_v47 = vld [vmem:[%s1714_s0 + $0x1e0] sm:$0xff] }
  0x2f   :  { %535 = vmatprep.mubr.f32.mxu1 %v32_v57  ;;  %1081 = vmatpush3.bf16.msra.mxu0 %v1078_v51  ;;  %v181_v46 = vld [vmem:[%s1715_s2 + $0x78] sm:$0xff]  ;;  %v76_v48 = vld [vmem:[%s1714_s0 + $0x1f0] sm:$0xff]  ;;  %v82_v50 = vld [vmem:[%s1714_s0 + $0x220] sm:$0xff] }
  0x30   :  { %1092 = vmatpush3.bf16.msra.mxu1 %v1078_v51  ;;  %1083 = vmatprep.subr.bf16.mxu0 %v1082_v58  ;;  %v80_v49 = vld [vmem:[%s1714_s0 + $0x210] sm:$0xff]  ;;  %v79_v51 = vld [vmem:[%s1714_s0 + $0x208] sm:$0xff]  ;;  %v81_v52 = vld [vmem:[%s1714_s0 + $0x218] sm:$0xff] }
  0x31   :  { %391 = vmatmul.mubr.f32.gmra.mrb[6].mxu0 %v29_v59  ;;  %1089 = vmatprep.subr.bf16.mxu1 %v1082_v58  ;;  %v85_v53 = vld [vmem:[%s1714_s0 + $0x238] sm:$0xff]  ;;  %v87_v54 = vld [vmem:[%s1714_s0 + $0x248] sm:$0xff]  ;;  %v84_v55 = vld [vmem:[%s1714_s0 + $0x230] sm:$0xff] }
  0x32   :  { %536 = vmatmul.mubr.f32.gmra.mrb[6].mxu1 %v31_v60  ;;  %395 = vmatprep.mubr.f32.mxu0 %v35_v61  ;;  %v86_v56 = vld [vmem:[%s1714_s0 + $0x240] sm:$0xff]  ;;  %v89_v59 = vld [vmem:[%s1714_s0 + $0x258] sm:$0xff]  ;;  %v91_v60 = vld [vmem:[%s1714_s0 + $0x268] sm:$0xff] }
  0x33   :  { %540 = vmatprep.mubr.f32.mxu1 %v37_v62  ;;  %1085 = vmatpush3.bf16.msra.mxu0 %v1082_v58  ;;  %v90_v57 = vld [vmem:[%s1714_s0 + $0x260] sm:$0xff]  ;;  %v33_v3 = vld [vmem:[%s1714_s0 + $0x98] sm:$0xff] }
  0x34   :  { %1093 = vmatpush3.bf16.msra.mxu1 %v1082_v58  ;;  %199 = vperm.xlu1 %1096, %v169_v10   ;;  %v92_v58 = vld [vmem:[%s1714_s0 + $0x270] sm:$0xff]  ;;  %v18_v61 = vld [vmem:[%s1714_s0 + $0x20] sm:$0xff]  ;;  %v73_v4 = vld [vmem:[%s1714_s0 + $0x1d8] sm:$0xff] }
  0x35   :  { %396 = vmatmul.mubr.f32.gmra.mrb[8].mxu0 %v34_v63  ;;  %204 = vperm.xlu0 %1095, %v170_v12   ;;  %v58_v62 = vld [vmem:[%s1714_s0 + $0x160] sm:$0xff]  ;;  %v23_v63 = vld [vmem:[%s1714_s0 + $0x48] sm:$0xff]  ;;  %v88_v10 = vld [vmem:[%s1714_s0 + $0x250] sm:$0xff] }
  0x36   :  { %541 = vmatmul.mubr.f32.gmra.mrb[8].mxu1 %v36_v0  ;;  %400 = vmatprep.mubr.f32.mxu0 %v40_v1  ;;  %v63_v0 = vld [vmem:[%s1714_s0 + $0x188] sm:$0xff]  ;;  %v28_v1 = vld [vmem:[%s1714_s0 + $0x70] sm:$0xff]  ;;  %v78_v6 = vld [vmem:[%s1714_s0 + $0x200] sm:$0xff] }
  0x37   :  { %545 = vmatprep.mubr.f32.mxu1 %v42_v2  ;;  %v68_v2 = vld [vmem:[%s1714_s0 + $0x1b0] sm:$0xff]  ;;  %v93_v12 = vld [vmem:[%s1714_s0 + $0x278] sm:$0xff] }
  0x38   :  { %209 = vperm.xlu1 %1096, %v171_v16  }
  0x39   :  { %401 = vmatmul.mubr.f32.gmra.mrb[10].mxu0 %v39_v5  ;;  %214 = vperm.xlu0 %1095, %v172_v18   ;;  %v38_v5 = vld [vmem:[%s1714_s0 + $0xc0] sm:$0xff] }
  0x3a   :  { %546 = vmatmul.mubr.f32.gmra.mrb[10].mxu1 %v41_v7  ;;  %405 = vmatprep.mubr.f32.mxu0 %v45_v8  ;;  %v43_v7 = vld [vmem:[%s1714_s0 + $0xe8] sm:$0xff] }
  0x3b   :  { %550 = vmatprep.mubr.f32.mxu1 %v47_v9  ;;  %v83_v8 = vld [vmem:[%s1714_s0 + $0x228] sm:$0xff]  ;;  %v48_v9 = vld [vmem:[%s1714_s0 + $0x110] sm:$0xff] }
  0x3c   :  { %219 = vperm.xlu1 %1096, %v173_v22  }
  0x3d   :  { %406 = vmatmul.mubr.f32.gmra.mrb[12].mxu0 %v44_v11  ;;  %224 = vperm.xlu0 %1095, %v174_v24   ;;  %v53_v11 = vld [vmem:[%s1714_s0 + $0x138] sm:$0xff] }
  0x3e   :  { %551 = vmatmul.mubr.f32.gmra.mrb[12].mxu1 %v46_v13  ;;  %410 = vmatprep.mubr.f32.mxu0 %v50_v14 }
  0x3f   :  { %555 = vmatprep.mubr.f32.mxu1 %v52_v15 }
  0x40   :  { %229 = vperm.xlu1 %1096, %v175_v28  }
  0x41   :  { %411 = vmatmul.mubr.f32.gmra.mrb[14].mxu0 %v49_v17  ;;  %234 = vperm.xlu0 %1095, %v176_v30  }
  0x42   :  { %556 = vmatmul.mubr.f32.gmra.mrb[14].mxu1 %v51_v19  ;;  %415 = vmatprep.mubr.f32.mxu0 %v55_v20 }
  0x43   :  { %560 = vmatprep.mubr.f32.mxu1 %v57_v21 }
  0x44   :  { %239 = vperm.xlu1 %1096, %v177_v34  }
  0x45   :  { %416 = vmatmul.mubr.f32.gmra.mrb[16].mxu0 %v54_v23  ;;  %244 = vperm.xlu0 %1095, %v178_v36  }
  0x46   :  { %561 = vmatmul.mubr.f32.gmra.mrb[16].mxu1 %v56_v25  ;;  %420 = vmatprep.mubr.f32.mxu0 %v60_v26 }
  0x47   :  { %565 = vmatprep.mubr.f32.mxu1 %v62_v27 }
  0x48   :  { %249 = vperm.xlu1 %1096, %v179_v40  }
  0x49   :  { %421 = vmatmul.mubr.f32.gmra.mrb[18].mxu0 %v59_v29  ;;  %254 = vperm.xlu0 %1095, %v180_v42  }
  0x4a   :  { %566 = vmatmul.mubr.f32.gmra.mrb[18].mxu1 %v61_v31  ;;  %425 = vmatprep.mubr.f32.mxu0 %v65_v32 }
  0x4b   :  { %570 = vmatprep.mubr.f32.mxu1 %v67_v33 }
  0x4c   :  { %259 = vperm.xlu1 %1096, %v181_v46  }
  0x4d   :  { %426 = vmatmul.mubr.f32.gmra.mrb[20].mxu0 %v64_v35 }
  0x4e   :  { %571 = vmatmul.mubr.f32.gmra.mrb[20].mxu1 %v66_v37  ;;  %430 = vmatprep.mubr.f32.mxu0 %v70_v38 }
  0x4f   :  { %575 = vmatprep.mubr.f32.mxu1 %v72_v39 }
  0x51   :  { %431 = vmatmul.mubr.f32.gmra.mrb[22].mxu0 %v69_v41 }
  0x52   :  { %576 = vmatmul.mubr.f32.gmra.mrb[22].mxu1 %v71_v43  ;;  %435 = vmatprep.mubr.f32.mxu0 %v75_v44 }
  0x53   :  { %580 = vmatprep.mubr.f32.mxu1 %v77_v45 }
  0x55   :  { %436 = vmatmul.mubr.f32.gmra.mrb[24].mxu0 %v74_v47 }
  0x56   :  { %581 = vmatmul.mubr.f32.gmra.mrb[24].mxu1 %v76_v48  ;;  %440 = vmatprep.mubr.f32.mxu0 %v80_v49 }
  0x57   :  { %585 = vmatprep.mubr.f32.mxu1 %v82_v50 }
  0x59   :  { %441 = vmatmul.mubr.f32.gmra.mrb[26].mxu0 %v79_v51 }
  0x5a   :  { %586 = vmatmul.mubr.f32.gmra.mrb[26].mxu1 %v81_v52  ;;  %445 = vmatprep.mubr.f32.mxu0 %v85_v53 }
  0x5b   :  { %590 = vmatprep.mubr.f32.mxu1 %v87_v54 }
  0x5d   :  { %446 = vmatmul.mubr.f32.gmra.mrb[28].mxu0 %v84_v55 }
  0x5e   :  { %591 = vmatmul.mubr.f32.gmra.mrb[28].mxu1 %v86_v56  ;;  %450 = vmatprep.mubr.f32.mxu0 %v90_v57 }
  0x5f   :  { %595 = vmatprep.mubr.f32.mxu1 %v92_v58 }
  0x61   :  { %451 = vmatmul.mubr.f32.gmra.mrb[30].mxu0 %v89_v59 }
  0x62   :  { %596 = vmatmul.mubr.f32.gmra.mrb[30].mxu1 %v91_v60  ;;  %982 = vmatprep.mubr.msk.f32.mxu0 %vm262_vm0, %v18_v61 }
  0x63   :  { %994 = vmatprep.mubr.msk.f32.mxu1 %vm262_vm0, %v58_v62 }
  0x65   :  { %983 = vmatmul.mubr.msk.f32.vlgmr.msra.gmra.mrb[32].mxu0 %vm262_vm0, %v23_v63 }
  0x66   :  { %995 = vmatmul.mubr.msk.f32.vlgmr.msra.gmra.mrb[32].mxu1 %vm262_vm0, %v63_v0  ;;  %985 = vmatprep.mubr.msk.f32.mxu0 %vm262_vm0, %v28_v1 }
  0x67   :  { %997 = vmatprep.mubr.msk.f32.mxu1 %vm262_vm0, %v68_v2 }
  0x69   :  { %986 = vmatmul.mubr.msk.f32.gmra.mrb[34].mxu0 %vm262_vm0, %v33_v3 }
  0x6a   :  { %998 = vmatmul.mubr.msk.f32.gmra.mrb[34].mxu1 %vm262_vm0, %v73_v4  ;;  %988 = vmatprep.mubr.msk.f32.mxu0 %vm262_vm0, %v38_v5 }
  0x6b   :  { %1000 = vmatprep.mubr.msk.f32.mxu1 %vm262_vm0, %v78_v6 }
  0x6d   :  { %989 = vmatmul.mubr.msk.f32.gmra.mrb[36].mxu0 %vm262_vm0, %v43_v7 }
  0x6e   :  { %1001 = vmatmul.mubr.msk.f32.gmra.mrb[36].mxu1 %vm262_vm0, %v83_v8  ;;  %991 = vmatprep.mubr.msk.f32.mxu0 %vm262_vm0, %v48_v9 }
  0x6f   :  { %1003 = vmatprep.mubr.msk.f32.mxu1 %vm262_vm0, %v88_v10 }
  0x71   :  { %992 = vmatmul.mubr.msk.f32.gmra.mrb[38].mxu0 %vm262_vm0, %v53_v11 }
  0x72   :  { %1004 = vmatmul.mubr.msk.f32.gmra.mrb[38].mxu1 %vm262_vm0, %v93_v12 }
  0xa0   :  { %v185_v13 = vpop.permute.xlu0 %184 }
  0xa1   :  { %v195_v27 = vpop.permute.xlu1 %194 }
  0xa4   :  { %v190_v22 = vpop.permute.xlu0 %189 }
  0xb3   :  { %v200_v40 = vpop.permute.xlu1 %199 }
  0xb4   :  { %v205_v49 = vpop.permute.xlu0 %204 }
  0xb7   :  { %v210_v58 = vpop.permute.xlu1 %209 }
  0xb8   :  { %v215_v3 = vpop.permute.xlu0 %214 }
  0xf8   :  { %v814_v14 = vpop.f32.mrb[0].mxu0 }
  0xf9   :  { %v894_v15 = vpop.f32.mrb[0].mxu1  ;;  %v815_v16 = vpop.f32.mrb[1].mxu0 }
  0xfa   :  { %v816_v17 = vadd.f32 %v815_v16, %v814_v14  ;;  %v895_v18 = vpop.f32.mrb[1].mxu1 }
  0xfb   :  { %v896_v19 = vadd.f32 %v895_v18, %v894_v15  ;;  %v220_v18 = vpop.permute.xlu1 %219 }
  0xfc   :  { %v378_v20 = vadd.f32 %v816_v17, %v185_v13  ;;  %v817_v21 = vpop.f32.mrb[2].mxu0 }
  0xfd   :  { %v897_v23 = vpop.f32.mrb[2].mxu1  ;;  %v818_v24 = vpop.f32.mrb[3].mxu0 }
  0xfe   :  { %v819_v25 = vadd.f32 %v818_v24, %v817_v21  ;;  %v898_v26 = vpop.f32.mrb[3].mxu1  ;;  %v1638_v28 = vadd.f32 %v896_v19, %v378_v20 }
  0xff   :  { %v899_v29 = vadd.f32 %v898_v26, %v897_v23 }
 0x100   :  { %v383_v30 = vadd.f32 %v819_v25, %v190_v22  ;;  %v820_v31 = vpop.f32.mrb[4].mxu0 }
 0x101   :  { %v900_v32 = vpop.f32.mrb[4].mxu1  ;;  %v821_v33 = vpop.f32.mrb[5].mxu0 }
 0x102   :  { %v822_v34 = vadd.f32 %v821_v33, %v820_v31  ;;  %v901_v35 = vpop.f32.mrb[5].mxu1  ;;  %v1640_v36 = vadd.f32 %v899_v29, %v383_v30 }
 0x103   :  { %v902_v37 = vadd.f32 %v901_v35, %v900_v32 }
 0x104   :  { %v388_v38 = vadd.f32 %v822_v34, %v195_v27  ;;  %v823_v39 = vpop.f32.mrb[6].mxu0  ;;  %v225_v27 = vpop.permute.xlu0 %224 }
 0x105   :  { %v903_v41 = vpop.f32.mrb[6].mxu1  ;;  %v824_v42 = vpop.f32.mrb[7].mxu0 }
 0x106   :  { %v825_v43 = vadd.f32 %v824_v42, %v823_v39  ;;  %v904_v44 = vpop.f32.mrb[7].mxu1  ;;  %v1642_v45 = vadd.f32 %v902_v37, %v388_v38  ;;  %v230_v37 = vpop.permute.xlu1 %229 }
 0x107   :  { %v905_v46 = vadd.f32 %v904_v44, %v903_v41 }
 0x108   :  { %v393_v47 = vadd.f32 %v825_v43, %v200_v40  ;;  %v826_v48 = vpop.f32.mrb[8].mxu0 }
 0x109   :  { %v906_v50 = vpop.f32.mrb[8].mxu1  ;;  %v827_v51 = vpop.f32.mrb[9].mxu0 }
 0x10a   :  { %v828_v52 = vadd.f32 %v827_v51, %v826_v48  ;;  %v907_v53 = vpop.f32.mrb[9].mxu1  ;;  %v1644_v54 = vadd.f32 %v905_v46, %v393_v47  ;;  %v235_v47 = vpop.permute.xlu0 %234 }
 0x10b   :  { %v908_v55 = vadd.f32 %v907_v53, %v906_v50 }
 0x10c   :  { %v398_v56 = vadd.f32 %v828_v52, %v205_v49  ;;  %v829_v57 = vpop.f32.mrb[10].mxu0 }
 0x10d   :  { %v909_v59 = vpop.f32.mrb[10].mxu1  ;;  %v830_v60 = vpop.f32.mrb[11].mxu0 }
 0x10e   :  { %v831_v61 = vadd.f32 %v830_v60, %v829_v57  ;;  %v910_v62 = vpop.f32.mrb[11].mxu1  ;;  %v1646_v63 = vadd.f32 %v908_v55, %v398_v56  ;;  %v240_v57 = vpop.permute.xlu1 %239 }
 0x10f   :  { %v911_v0 = vadd.f32 %v910_v62, %v909_v59 }
 0x110   :  { %v403_v1 = vadd.f32 %v831_v61, %v210_v58  ;;  %v832_v2 = vpop.f32.mrb[12].mxu0 }
 0x111   :  { %v912_v4 = vpop.f32.mrb[12].mxu1  ;;  %v833_v5 = vpop.f32.mrb[13].mxu0 }
 0x112   :  { %v834_v6 = vadd.f32 %v833_v5, %v832_v2  ;;  %v913_v7 = vpop.f32.mrb[13].mxu1  ;;  %v1648_v8 = vadd.f32 %v911_v0, %v403_v1 }
 0x113   :  { %v914_v9 = vadd.f32 %v913_v7, %v912_v4 }
 0x114   :  { %v408_v10 = vadd.f32 %v834_v6, %v215_v3  ;;  %v835_v11 = vpop.f32.mrb[14].mxu0  ;;  %v245_v3 = vpop.permute.xlu0 %244 }
 0x115   :  { %v915_v12 = vpop.f32.mrb[14].mxu1  ;;  %v836_v13 = vpop.f32.mrb[15].mxu0 }
 0x116   :  { %v837_v14 = vadd.f32 %v836_v13, %v835_v11  ;;  %v916_v15 = vpop.f32.mrb[15].mxu1  ;;  %v1650_v16 = vadd.f32 %v914_v9, %v408_v10  ;;  %v250_v13 = vpop.permute.xlu1 %249 }
 0x117   :  { %v917_v17 = vadd.f32 %v916_v15, %v915_v12 }
 0x118   :  { %v413_v19 = vadd.f32 %v837_v14, %v220_v18  ;;  %v838_v20 = vpop.f32.mrb[16].mxu0 }
 0x119   :  { %v918_v21 = vpop.f32.mrb[16].mxu1  ;;  %v839_v22 = vpop.f32.mrb[17].mxu0 }
 0x11a   :  { %v840_v23 = vadd.f32 %v839_v22, %v838_v20  ;;  %v919_v24 = vpop.f32.mrb[17].mxu1  ;;  %v1652_v25 = vadd.f32 %v917_v17, %v413_v19 }
 0x11b   :  { %v920_v26 = vadd.f32 %v919_v24, %v918_v21 }
 0x11c   :  { %v418_v29 = vadd.f32 %v840_v23, %v225_v27  ;;  %v841_v30 = vpop.f32.mrb[18].mxu0  ;;  %v255_v23 = vpop.permute.xlu0 %254 }
 0x11d   :  { %v921_v31 = vpop.f32.mrb[18].mxu1  ;;  %v842_v32 = vpop.f32.mrb[19].mxu0 }
 0x11e   :  { %v843_v33 = vadd.f32 %v842_v32, %v841_v30  ;;  %v922_v34 = vpop.f32.mrb[19].mxu1  ;;  %v1654_v35 = vadd.f32 %v920_v26, %v418_v29 }
 0x11f   :  { %v923_v38 = vadd.f32 %v922_v34, %v921_v31  ;;  %v260_v34 = vpop.permute.xlu1 %259 }
 0x120   :  { %v423_v39 = vadd.f32 %v843_v33, %v230_v37  ;;  %v844_v40 = vpop.f32.mrb[20].mxu0 }
 0x121   :  { %v924_v41 = vpop.f32.mrb[20].mxu1  ;;  %v845_v42 = vpop.f32.mrb[21].mxu0 }
 0x122   :  { %v846_v43 = vadd.f32 %v845_v42, %v844_v40  ;;  %v925_v44 = vpop.f32.mrb[21].mxu1  ;;  %v568_v46 = vadd.f32 %v923_v38, %v423_v39 }
 0x123   :  { %v926_v48 = vadd.f32 %v925_v44, %v924_v41 }
 0x124   :  { %v428_v49 = vadd.f32 %v846_v43, %v235_v47  ;;  %v847_v50 = vpop.f32.mrb[22].mxu0 }
 0x125   :  { %v927_v51 = vpop.f32.mrb[22].mxu1  ;;  %v848_v52 = vpop.f32.mrb[23].mxu0 }
 0x126   :  { %v849_v53 = vadd.f32 %v848_v52, %v847_v50  ;;  %v928_v55 = vpop.f32.mrb[23].mxu1  ;;  %v573_v56 = vadd.f32 %v926_v48, %v428_v49 }
 0x127   :  { %v929_v58 = vadd.f32 %v928_v55, %v927_v51 }
 0x128   :  { %v433_v59 = vadd.f32 %v849_v53, %v240_v57  ;;  %v850_v60 = vpop.f32.mrb[24].mxu0 }
 0x129   :  { %v930_v61 = vpop.f32.mrb[24].mxu1  ;;  %v851_v62 = vpop.f32.mrb[25].mxu0 }
 0x12a   :  { %v852_v0 = vadd.f32 %v851_v62, %v850_v60  ;;  %v931_v1 = vpop.f32.mrb[25].mxu1  ;;  %v578_v2 = vadd.f32 %v929_v58, %v433_v59 }
 0x12b   :  { %v932_v4 = vadd.f32 %v931_v1, %v930_v61 }
 0x12c   :  { %v438_v5 = vadd.f32 %v852_v0, %v245_v3  ;;  %v853_v6 = vpop.f32.mrb[26].mxu0 }
 0x12d   :  { %v933_v7 = vpop.f32.mrb[26].mxu1  ;;  %v854_v9 = vpop.f32.mrb[27].mxu0 }
 0x12e   :  { %v855_v10 = vadd.f32 %v854_v9, %v853_v6  ;;  %v934_v11 = vpop.f32.mrb[27].mxu1  ;;  %v583_v12 = vadd.f32 %v932_v4, %v438_v5 }
 0x12f   :  { %v935_v14 = vadd.f32 %v934_v11, %v933_v7 }
 0x130   :  { %v443_v15 = vadd.f32 %v855_v10, %v250_v13  ;;  %v856_v17 = vpop.f32.mrb[28].mxu0 }
 0x131   :  { %v936_v18 = vpop.f32.mrb[28].mxu1  ;;  %v857_v19 = vpop.f32.mrb[29].mxu0 }
 0x132   :  { %v858_v20 = vadd.f32 %v857_v19, %v856_v17  ;;  %v937_v21 = vpop.f32.mrb[29].mxu1  ;;  %v588_v22 = vadd.f32 %v935_v14, %v443_v15 }
 0x133   :  { %v938_v24 = vadd.f32 %v937_v21, %v936_v18 }
 0x134   :  { %v448_v26 = vadd.f32 %v858_v20, %v255_v23  ;;  %v859_v27 = vpop.f32.mrb[30].mxu0 }
 0x135   :  { %v939_v29 = vpop.f32.mrb[30].mxu1  ;;  %v860_v30 = vpop.f32.mrb[31].mxu0 }
 0x136   :  { %v861_v31 = vadd.f32 %v860_v30, %v859_v27  ;;  %v940_v32 = vpop.f32.mrb[31].mxu1  ;;  %v593_v33 = vadd.f32 %v938_v24, %v448_v26 }
 0x137   :  { %v941_v37 = vadd.f32 %v940_v32, %v939_v29 }
 0x138   :  { %v453_v38 = vadd.f32 %v861_v31, %v260_v34  ;;  %v984_v39 = vpop.f32.mrb[32].mxu0 }
 0x139   :  { %v673_v40 = vadd.f32 %v984_v39, %v1640_v36  ;;  %v996_v41 = vpop.f32.mrb[32].mxu1  ;;  %v667_v42 = vpop.f32.mrb[33].mxu0 }
 0x13a   :  { %v713_v43 = vadd.f32 %v996_v41, %v568_v46  ;;  %v668_v44 = vadd.f32 %v667_v42, %v1638_v28  ;;  %v707_v47 = vpop.f32.mrb[33].mxu1  ;;  %v598_v48 = vadd.f32 %v941_v37, %v453_v38 }
 0x13b   :  { %747 = vst [vmem:[%s1716_s3 + $0x8] sm:$0xff] %v673_v40  ;;  %v708_v49 = vadd.f32 %v707_v47, %v1654_v35 }
 0x13c   :  { %755 = vst [vmem:[%s1716_s3 + $0x48] sm:$0xff] %v713_v43  ;;  %746 = vst [vmem:[%s1716_s3] sm:$0xff] %v668_v44  ;;  %v987_v36 = vpop.f32.mrb[34].mxu0 }
 0x13d   :  { %754 = vst [vmem:[%s1716_s3 + $0x40] sm:$0xff] %v708_v49  ;;  %v683_v28 = vadd.f32 %v987_v36, %v1644_v54  ;;  %v999_v46 = vpop.f32.mrb[34].mxu1  ;;  %v677_v50 = vpop.f32.mrb[35].mxu0 }
 0x13e   :  { %v723_v51 = vadd.f32 %v999_v46, %v578_v2  ;;  %v678_v35 = vadd.f32 %v677_v50, %v1642_v45  ;;  %v717_v52 = vpop.f32.mrb[35].mxu1 }
 0x13f   :  { %749 = vst [vmem:[%s1716_s3 + $0x18] sm:$0xff] %v683_v28  ;;  %v718_v53 = vadd.f32 %v717_v52, %v573_v56 }
 0x140   :  { %757 = vst [vmem:[%s1716_s3 + $0x58] sm:$0xff] %v723_v51  ;;  %748 = vst [vmem:[%s1716_s3 + $0x10] sm:$0xff] %v678_v35  ;;  %v990_v54 = vpop.f32.mrb[36].mxu0 }
 0x141   :  { %756 = vst [vmem:[%s1716_s3 + $0x50] sm:$0xff] %v718_v53  ;;  %v693_v45 = vadd.f32 %v990_v54, %v1648_v8  ;;  %v1002_v55 = vpop.f32.mrb[36].mxu1  ;;  %v687_v57 = vpop.f32.mrb[37].mxu0 }
 0x142   :  { %v733_v58 = vadd.f32 %v1002_v55, %v588_v22  ;;  %v688_v56 = vadd.f32 %v687_v57, %v1646_v63  ;;  %v727_v59 = vpop.f32.mrb[37].mxu1 }
 0x143   :  { %751 = vst [vmem:[%s1716_s3 + $0x28] sm:$0xff] %v693_v45  ;;  %v728_v60 = vadd.f32 %v727_v59, %v583_v12 }
 0x144   :  { %759 = vst [vmem:[%s1716_s3 + $0x68] sm:$0xff] %v733_v58  ;;  %750 = vst [vmem:[%s1716_s3 + $0x20] sm:$0xff] %v688_v56  ;;  %v993_v8 = vpop.f32.mrb[38].mxu0 }
 0x145   :  { %758 = vst [vmem:[%s1716_s3 + $0x60] sm:$0xff] %v728_v60  ;;  %v703_v63 = vadd.f32 %v993_v8, %v1652_v25  ;;  %v1005_v61 = vpop.f32.mrb[38].mxu1  ;;  %v697_v62 = vpop.f32.mrb[39].mxu0 }
 0x146   :  { %v743_v0 = vadd.f32 %v1005_v61, %v598_v48  ;;  %v698_v1 = vadd.f32 %v697_v62, %v1650_v16  ;;  %v737_v2 = vpop.f32.mrb[39].mxu1 }
 0x147   :  { %753 = vst [vmem:[%s1716_s3 + $0x38] sm:$0xff] %v703_v63  ;;  %v738_v3 = vadd.f32 %v737_v2, %v593_v33 }
 0x148   :  { %761 = vst [vmem:[%s1716_s3 + $0x78] sm:$0xff] %v743_v0  ;;  %752 = vst [vmem:[%s1716_s3 + $0x30] sm:$0xff] %v698_v1 }
 0x149   :  { %760 = vst [vmem:[%s1716_s3 + $0x70] sm:$0xff] %v738_v3 }

</bundles_post_ra>
